<compile_context>
chip_gen: v6e
topology: v6e:2x2x1
jax: 0.10.0
libtpu: 0.0.40
codegen_flags: <defaults>
</compile_context>

<pallas_src>
import functools

import jax
import jax.numpy as jnp
from jax.experimental import pallas as pl
from jax.experimental.pallas import tpu as pltpu


# ------------------------------ Pallas kernel -------------------------------

def _simple_cnn_kernel(xp_ref, t1_ref, b1_ref, t2_ref, b2_ref,
                       w3_ref, b3_ref, w4_ref, b4_ref, out_ref):
    """Whole SimpleCNN forward for one batch tile, entirely on-chip.

    xp_ref : (bt, 32, 28)   images, rows 0..27 = data, rows 28..31 = 0 pad
    t1_ref : (3, 28, 512)   conv1 banded weights  [kh, win, even/odd (w,o)]
    t2_ref : (3, 256, 512)  conv2 banded weights  [kh, win*16+c, even/odd (w,o)]
    w3_ref : (7, 256, 128)  fc1 weights           [h, w*32+c (pad 224->256), out]
    w4_ref : (128, 128)     fc2 weights, output padded 10 -> 128
    out_ref: (bt, 128)      padded logits (single lane-dense store)
    """
    bt = xp_ref.shape[0]
    mm = t1_ref.dtype                    # bf16 (default) or f32 MXU operand dtype
    f32 = jnp.float32

    # ---- Conv1 (1->16, 3x3, pad 1): 3 banded MXU matmuls --------------------
    n1 = bt * 32
    x = xp_ref[...].reshape(n1, 28)      # rows 0..27 image, 28..31 zero pad
    # kh = 0 / 2 taps need the input shifted by -1 / +1 rows; roll the SMALL
    # f32 input on the sublane axis (XLU) instead of slicing the big outputs.
    # Zero pad rows (28..31 of every image) make the wrap-around harmless.
    x_dn = pltpu.roll(x, 1, axis=0)          # x_dn[r] = x[r-1]
    x_up = pltpu.roll(x, n1 - 1, axis=0)     # x_up[r] = x[r+1]
    acc = jnp.dot(x.astype(mm),    t1_ref[1], preferred_element_type=f32)
    acc += jnp.dot(x_dn.astype(mm), t1_ref[0], preferred_element_type=f32)
    acc += jnp.dot(x_up.astype(mm), t1_ref[2], preferred_element_type=f32)
    y1 = jnp.maximum(acc + b1_ref[...], 0.0)           # (n1, 512); rows 28..31 junk

    # ---- ReLU + 2x2 max-pool epilogue ---------------------------------------
    # W-pool: even/odd output-column layout -> one aligned 256-lane max.
    # H-pool: one sublane-pair max.  Junk pooled rows 14/15 of each image are
    # zeroed so they double as conv2's H zero-padding under the rolls below.
    wp1 = jnp.maximum(y1[:, :256], y1[:, 256:])         # (n1, 256)
    p1 = wp1.reshape(bt * 16, 2, 256).max(axis=1)       # (bt*16, 256)
    row = jax.lax.broadcasted_iota(jnp.int32, (bt * 16, 1), 0)
    p1 = jnp.where(row % 16 < 14, p1, 0.0)              # rows 0..13 data, 14/15 zero

    # ---- Conv2 (16->32, 3x3, pad 1): same banded structure ------------------
    n2 = bt * 16
    p1_dn = pltpu.roll(p1, 1, axis=0)
    p1_up = pltpu.roll(p1, n2 - 1, axis=0)
    acc2 = jnp.dot(p1.astype(mm),    t2_ref[1], preferred_element_type=f32)
    acc2 += jnp.dot(p1_dn.astype(mm), t2_ref[0], preferred_element_type=f32)
    acc2 += jnp.dot(p1_up.astype(mm), t2_ref[2], preferred_element_type=f32)
    y2 = jnp.maximum(acc2 + b2_ref[...], 0.0)           # (n2, 512); rows 14/15 junk

    wp2 = jnp.maximum(y2[:, :256], y2[:, 256:])          # (n2, 256)
    p2 = wp2.reshape(bt * 8, 2, 256).max(axis=1)         # (bt*8, 256); row 7/img junk

    # ---- fc1 (1568 -> 128) + ReLU -------------------------------------------
    # fp[b, h, w*32+c]; junk row h=7 is never read, junk lanes >=224 hit the
    # zero rows of w3, so no masking is needed here.
    fp = p2.reshape(bt, 8, 256)
    hid = jnp.dot(fp[:, 0, :].astype(mm), w3_ref[0], preferred_element_type=f32)
    for h in range(1, 7):
        hid += jnp.dot(fp[:, h, :].astype(mm), w3_ref[h], preferred_element_type=f32)
    hid = jnp.maximum(hid + b3_ref[...], 0.0)            # (bt, 128)

    # ---- fc2 (128 -> 10, lane-padded to 128): single unmasked store ---------
    logits = (jnp.dot(hid.astype(mm), w4_ref[...], preferred_element_type=f32)
              + b4_ref[...])
    out_ref[...] = logits.astype(out_ref.dtype)


# ------------------------- one-time weight packing ---------------------------

def pack_params(params, dtype=jnp.bfloat16):
    """Hoists all layout work out of the forward path (done once per model).

    Builds truncated-banded conv matrices (W zero-padding folded into the band)
    with the [even-w | pad | odd-w | pad] output-column layout, the fc1 weight
    permuted from PyTorch's (c,h,w) flatten order to the kernel's (h, w*32+c)
    feature layout (padded 224 -> 256 rows), and the lane-padded fc2 weight.
    """
    hp = jax.lax.Precision.HIGHEST
    f32 = jnp.float32
    w1, b1 = params["w1"].astype(f32), params["b1"].astype(f32)   # (16,1,3,3),(16,)
    w2, b2 = params["w2"].astype(f32), params["b2"].astype(f32)   # (32,16,3,3),(32,)
    w3, b3 = params["w3"].astype(f32), params["b3"].astype(f32)   # (128,1568),(128,)
    w4, b4 = params["w4"].astype(f32), params["b4"].astype(f32)   # (10,128),(10,)

    # conv1: t1[kh][win, col(w,o)] = w1[o,0,kh, win-w+1]  (truncated band = pad)
    band1 = jnp.stack([jnp.eye(28, 28, k=1 - kw, dtype=f32) for kw in range(3)])
    t1n = jnp.einsum("kpw,hko->hpwo", band1,
                     jnp.transpose(w1[:, 0], (1, 2, 0)), precision=hp)  # (3,28,28,16)
    t1 = jnp.zeros((3, 28, 512), f32)
    t1 = t1.at[:, :, 0:224].set(t1n[:, :, 0::2, :].reshape(3, 28, 224))    # even w
    t1 = t1.at[:, :, 256:480].set(t1n[:, :, 1::2, :].reshape(3, 28, 224))  # odd w
    b1t = jnp.tile(b1, 14)
    b1p = jnp.zeros((1, 512), f32).at[0, 0:224].set(b1t).at[0, 256:480].set(b1t)

    # conv2: t2[kh][win*16+c, col(w,o)] = w2[o,c,kh, win-w+1]
    band2 = jnp.stack([jnp.eye(14, 14, k=1 - kw, dtype=f32) for kw in range(3)])
    t2n = jnp.einsum("kpw,hkco->hpcwo", band2,
                     jnp.transpose(w2, (2, 3, 1, 0)), precision=hp)       # (3,14,16,14,32)
    t2n = t2n.reshape(3, 224, 14, 32)
    t2 = jnp.zeros((3, 256, 512), f32)                  # rows 224..255 stay zero
    t2 = t2.at[:, 0:224, 0:224].set(t2n[:, :, 0::2, :].reshape(3, 224, 224))
    t2 = t2.at[:, 0:224, 256:480].set(t2n[:, :, 1::2, :].reshape(3, 224, 224))
    b2t = jnp.tile(b2, 7)
    b2p = jnp.zeros((1, 512), f32).at[0, 0:224].set(b2t).at[0, 256:480].set(b2t)

    # fc1: PyTorch flatten order is (c,h,w); kernel features are (h, w*32+c)
    w3p = jnp.transpose(w3.reshape(128, 32, 7, 7), (2, 3, 1, 0)).reshape(7, 224, 128)
    w3r = jnp.zeros((7, 256, 128), f32).at[:, 0:224, :].set(w3p)

    # fc2: transpose + pad N from 10 to 128 for a lane-dense output store
    w4p = jnp.zeros((128, 128), f32).at[:, :10].set(w4.T)
    b4p = jnp.zeros((1, 128), f32).at[0, :10].set(b4)

    return {"t1": t1.astype(dtype), "b1": b1p,
            "t2": t2.astype(dtype), "b2": b2p,
            "w3": w3r.astype(dtype), "b3": b3.reshape(1, 128),
            "w4": w4p.astype(dtype), "b4": b4p}


# ------------------------------ forward wrapper ------------------------------

def _round_up(a, m):
    return -(-a // m) * m


def _pick_tile(batch, batch_tile):
    """Batch tile: full tiles when possible, >=2 grid steps for medium batches
    (keeps both v7x TensorCores busy), whole batch when it is tiny."""
    if batch >= 2 * batch_tile:
        return batch_tile
    if batch >= 16:
        return min(batch_tile, _round_up((batch + 1) // 2, 8))
    return batch


@functools.partial(jax.jit, static_argnames=("batch_tile",))
def simple_cnn_forward(packed, x_nchw, batch_tile=128):
    """x_nchw: (B, 1, 28, 28) float32 -> logits (B, 10) float32.

    batch_tile: 128 is a good default for v7x / v5e; use 256 on v6e.
    """
    B = x_nchw.shape[0]
    assert x_nchw.shape[1:] == (1, 28, 28), x_nchw.shape
    bt = _pick_tile(B, max(8, _round_up(batch_tile, 8)))
    Bp = pl.cdiv(B, bt) * bt

    # Pad the tiny input once: H 28 -> 32 (bottom zero rows are reused as the
    # conv1 H padding by the in-kernel rolls) and batch B -> Bp (tile multiple,
    # so the last tile never reads stale data).
    xp = jnp.pad(x_nchw[:, 0].astype(jnp.float32), ((0, Bp - B), (0, 4), (0, 0)))

    out = pl.pallas_call(
        _simple_cnn_kernel,
        out_shape=jax.ShapeDtypeStruct((Bp, 128), jnp.float32),
        grid=(Bp // bt,),
        in_specs=[
            pl.BlockSpec((bt, 32, 28), lambda i: (i, 0, 0)),    # images
            pl.BlockSpec((3, 28, 512), lambda i: (0, 0, 0)),    # conv1 band
            pl.BlockSpec((1, 512), lambda i: (0, 0)),           # conv1 bias (tiled)
            pl.BlockSpec((3, 256, 512), lambda i: (0, 0, 0)),   # conv2 band
            pl.BlockSpec((1, 512), lambda i: (0, 0)),           # conv2 bias (tiled)
            pl.BlockSpec((7, 256, 128), lambda i: (0, 0, 0)),   # fc1 weight
            pl.BlockSpec((1, 128), lambda i: (0, 0)),           # fc1 bias
            pl.BlockSpec((128, 128), lambda i: (0, 0)),         # fc2 weight (padded)
            pl.BlockSpec((1, 128), lambda i: (0, 0)),           # fc2 bias (padded)
        ],
        out_specs=pl.BlockSpec((bt, 128), lambda i: (i, 0)),
        compiler_params=pltpu.CompilerParams(
            dimension_semantics=("parallel",),                  # shard tiles across TCs
            vmem_limit_bytes=48 * 1024 * 1024),
    )(xp, packed["t1"], packed["b1"], packed["t2"], packed["b2"],
      packed["w3"], packed["b3"], packed["w4"], packed["b4"])
    return out[:B, :10]


# --------------------------- params / reference ------------------------------

def init_params(key):
    """PyTorch-style default init: uniform(-1/sqrt(fan_in), 1/sqrt(fan_in))."""
    ks = jax.random.split(key, 8)

    def uni(k, shape, fan_in):
        bound = 1.0 / float(fan_in) ** 0.5
        return jax.random.uniform(k, shape, jnp.float32, -bound, bound)

    return {
        "w1": uni(ks[0], (16, 1, 3, 3), 1 * 9),
        "b1": uni(ks[1], (16,), 1 * 9),
        "w2": uni(ks[2], (32, 16, 3, 3), 16 * 9),
        "b2": uni(ks[3], (32,), 16 * 9),
        "w3": uni(ks[4], (128, 32 * 7 * 7), 32 * 7 * 7),
        "b3": uni(ks[5], (128,), 32 * 7 * 7),
        "w4": uni(ks[6], (10, 128), 128),
        "b4": uni(ks[7], (10,), 128),
    }


def _reference_forward(params, x):
    """Pure JAX/XLA reference with exact PyTorch semantics (self-check only)."""
    hp = jax.lax.Precision.HIGHEST
    B = x.shape[0]
    y = jax.lax.conv_general_dilated(
        x, params["w1"], (1, 1), ((1, 1), (1, 1)),
        dimension_numbers=("NCHW", "OIHW", "NCHW"), precision=hp)
    y = jnp.maximum(y + params["b1"][None, :, None, None], 0.0)
    y = y.reshape(B, 16, 14, 2, 14, 2).max(axis=(3, 5))
    y = jax.lax.conv_general_dilated(
        y, params["w2"], (1, 1), ((1, 1), (1, 1)),
        dimension_numbers=("NCHW", "OIHW", "NCHW"), precision=hp)
    y = jnp.maximum(y + params["b2"][None, :, None, None], 0.0)
    y = y.reshape(B, 32, 7, 2, 7, 2).max(axis=(3, 5))
    y = y.reshape(B, 32 * 7 * 7)
    y = jnp.maximum(jnp.dot(y, params["w3"].T, precision=hp) + params["b3"], 0.0)
    return jnp.dot(y, params["w4"].T, precision=hp) + params["b4"]


if __name__ == "__main__":
    key = jax.random.PRNGKey(0)
    pkey, xkey = jax.random.split(key)
    params = init_params(pkey)
    # Input must be 28x28 / 1 channel so Flatten yields 32*7*7 features.
    x = jax.random.normal(xkey, (2, 1, 28, 28), jnp.float32)

    ref = _reference_forward(params, x)

    # Exact-layout check with f32 MXU operands.
    out_f32 = simple_cnn_forward(pack_params(params, jnp.float32), x)
    jax.block_until_ready(out_f32)
    assert out_f32.shape == (2, 10) and out_f32.dtype == jnp.float32
    err_f32 = float(jnp.max(jnp.abs(out_f32 - ref)))
    if not err_f32 < 1e-3:
        raise AssertionError(f"f32 Pallas forward mismatch: max|diff|={err_f32:.3e}")

    # Default fast path: bf16 MXU operands (f32 accumulate / f32 epilogues);
    # tolerance documents the ~1e-3-level bf16 operand quantization error.
    out = simple_cnn_forward(pack_params(params), x)
    jax.block_until_ready(out)
    assert out.shape == (2, 10) and out.dtype == jnp.float32
    err_bf16 = float(jnp.max(jnp.abs(out - ref)))
    if not err_bf16 < 2e-2:
        raise AssertionError(f"bf16 Pallas forward mismatch: max|diff|={err_bf16:.3e}")

    print("KERNEL_OK")
</pallas_src>

<mosaic_0001>
module attributes {stable_mosaic.version = 11 : i64} {
  func.func @_simple_cnn_kernel(%arg0: i32, %arg1: memref<2x32x28xf32, #tpu.memory_space<vmem>>, %arg2: memref<3x28x512xf32, #tpu.memory_space<vmem>>, %arg3: memref<1x512xf32, #tpu.memory_space<vmem>>, %arg4: memref<3x256x512xf32, #tpu.memory_space<vmem>>, %arg5: memref<1x512xf32, #tpu.memory_space<vmem>>, %arg6: memref<7x256x128xf32, #tpu.memory_space<vmem>>, %arg7: memref<1x128xf32, #tpu.memory_space<vmem>>, %arg8: memref<128x128xf32, #tpu.memory_space<vmem>>, %arg9: memref<1x128xf32, #tpu.memory_space<vmem>>, %arg10: memref<2x128xf32, #tpu.memory_space<vmem>>) attributes {dimension_semantics = [#tpu.dimension_semantics<parallel>], iteration_bounds = array<i64: 1>, scalar_prefetch = 0 : i64, scratch_operands = 0 : i64, tpu.core_type = #tpu.core_type<tc>, window_params = [{transform_indices = @transform_0, window_bounds = array<i64: 2, 32, 28>}, {pipeline_mode = #tpu.pipeline_mode<synchronous>, transform_indices = @transform_1, window_bounds = array<i64: 3, 28, 512>}, {pipeline_mode = #tpu.pipeline_mode<synchronous>, transform_indices = @transform_2, window_bounds = array<i64: 1, 512>}, {pipeline_mode = #tpu.pipeline_mode<synchronous>, transform_indices = @transform_3, window_bounds = array<i64: 3, 256, 512>}, {pipeline_mode = #tpu.pipeline_mode<synchronous>, transform_indices = @transform_4, window_bounds = array<i64: 1, 512>}, {pipeline_mode = #tpu.pipeline_mode<synchronous>, transform_indices = @transform_5, window_bounds = array<i64: 7, 256, 128>}, {pipeline_mode = #tpu.pipeline_mode<synchronous>, transform_indices = @transform_6, window_bounds = array<i64: 1, 128>}, {pipeline_mode = #tpu.pipeline_mode<synchronous>, transform_indices = @transform_7, window_bounds = array<i64: 128, 128>}, {pipeline_mode = #tpu.pipeline_mode<synchronous>, transform_indices = @transform_8, window_bounds = array<i64: 1, 128>}, {transform_indices = @transform_9, window_bounds = array<i64: 2, 128>}]} {
    %c0 = arith.constant 0 : index
    %c0_0 = arith.constant 0 : index
    %c0_1 = arith.constant 0 : index
    %0 = vector.load %arg1[%c0, %c0_0, %c0_1] : memref<2x32x28xf32, #tpu.memory_space<vmem>>, vector<2x32x28xf32>
    %1 = vector.shape_cast %0 : vector<2x32x28xf32> to vector<64x28xf32>
    %c1_i32 = arith.constant 1 : i32
    %2 = tpu.dynamic_rotate %1 by %c1_i32 dim 0 : vector<64x28xf32>, i32 -> vector<64x28xf32>
    %c63_i32 = arith.constant 63 : i32
    %3 = tpu.dynamic_rotate %1 by %c63_i32 dim 0 : vector<64x28xf32>, i32 -> vector<64x28xf32>
    %c1 = arith.constant 1 : index
    %c0_2 = arith.constant 0 : index
    %c0_3 = arith.constant 0 : index
    %4 = vector.load %arg2[%c1, %c0_2, %c0_3] : memref<3x28x512xf32, #tpu.memory_space<vmem>>, vector<1x28x512xf32>
    %5 = vector.shape_cast %4 : vector<1x28x512xf32> to vector<28x512xf32>
    %cst = arith.constant dense<0.000000e+00> : vector<64x512xf32>
    %6 = tpu.matmul %1, %5, %cst {dimension_numbers = #tpu.dot_dimension_numbers<[1], [0], [0], [1], [0, 0, 1, 1], [], []>} : vector<64x28xf32>, vector<28x512xf32>, vector<64x512xf32> -> vector<64x512xf32>
    %c0_4 = arith.constant 0 : index
    %c0_5 = arith.constant 0 : index
    %c0_6 = arith.constant 0 : index
    %7 = vector.load %arg2[%c0_4, %c0_5, %c0_6] : memref<3x28x512xf32, #tpu.memory_space<vmem>>, vector<1x28x512xf32>
    %8 = vector.shape_cast %7 : vector<1x28x512xf32> to vector<28x512xf32>
    %cst_7 = arith.constant dense<0.000000e+00> : vector<64x512xf32>
    %9 = tpu.matmul %2, %8, %cst_7 {dimension_numbers = #tpu.dot_dimension_numbers<[1], [0], [0], [1], [0, 0, 1, 1], [], []>} : vector<64x28xf32>, vector<28x512xf32>, vector<64x512xf32> -> vector<64x512xf32>
    %10 = arith.addf %6, %9 : vector<64x512xf32>
    %c2 = arith.constant 2 : index
    %c0_8 = arith.constant 0 : index
    %c0_9 = arith.constant 0 : index
    %11 = vector.load %arg2[%c2, %c0_8, %c0_9] : memref<3x28x512xf32, #tpu.memory_space<vmem>>, vector<1x28x512xf32>
    %12 = vector.shape_cast %11 : vector<1x28x512xf32> to vector<28x512xf32>
    %cst_10 = arith.constant dense<0.000000e+00> : vector<64x512xf32>
    %13 = tpu.matmul %3, %12, %cst_10 {dimension_numbers = #tpu.dot_dimension_numbers<[1], [0], [0], [1], [0, 0, 1, 1], [], []>} : vector<64x28xf32>, vector<28x512xf32>, vector<64x512xf32> -> vector<64x512xf32>
    %14 = arith.addf %10, %13 : vector<64x512xf32>
    %c0_11 = arith.constant 0 : index
    %c0_12 = arith.constant 0 : index
    %15 = vector.load %arg3[%c0_11, %c0_12] : memref<1x512xf32, #tpu.memory_space<vmem>>, vector<1x512xf32>
    %16 = vector.broadcast %15 : vector<1x512xf32> to vector<64x512xf32>
    %17 = arith.addf %14, %16 : vector<64x512xf32>
    %cst_13 = arith.constant 0.000000e+00 : f32
    %18 = vector.broadcast %cst_13 : f32 to vector<64x512xf32>
    %19 = arith.maximumf %17, %18 : vector<64x512xf32>
    %20 = vector.extract_strided_slice %19 {offsets = [0, 0], sizes = [64, 256], strides = [1, 1]} : vector<64x512xf32> to vector<64x256xf32>
    %21 = vector.extract_strided_slice %19 {offsets = [0, 256], sizes = [64, 256], strides = [1, 1]} : vector<64x512xf32> to vector<64x256xf32>
    %22 = arith.maximumf %20, %21 : vector<64x256xf32>
    %23 = vector.shape_cast %22 : vector<64x256xf32> to vector<32x2x256xf32>
    %cst_14 = arith.constant dense<0xFF800000> : vector<32x256xf32>
    %24 = vector.multi_reduction <maximumf>, %23, %cst_14 [1] : vector<32x2x256xf32> to vector<32x256xf32>
    %25 = tpu.iota {dimensions = array<i32: 0>} : vector<32x1xi32>
    %c16_i32 = arith.constant 16 : i32
    %c0_i32 = arith.constant 0 : i32
    %26 = arith.cmpi eq, %c16_i32, %c0_i32 : i32
    %c1_i32_15 = arith.constant 1 : i32
    %27 = arith.select %26, %c1_i32_15, %c16_i32 : i32
    %28 = vector.broadcast %27 : i32 to vector<32x1xi32>
    %29 = arith.remsi %25, %28 : vector<32x1xi32>
    %c0_i32_16 = arith.constant 0 : i32
    %30 = vector.broadcast %c0_i32_16 : i32 to vector<32x1xi32>
    %31 = arith.cmpi ne, %29, %30 : vector<32x1xi32>
    %c0_i32_17 = arith.constant 0 : i32
    %32 = vector.broadcast %c0_i32_17 : i32 to vector<32x1xi32>
    %33 = arith.cmpi slt, %29, %32 : vector<32x1xi32>
    %c0_i32_18 = arith.constant 0 : i32
    %34 = arith.cmpi slt, %27, %c0_i32_18 : i32
    %35 = vector.broadcast %34 : i1 to vector<32x1xi1>
    %36 = vector.broadcast %35 : vector<32x1xi1> to vector<32x1xi1>
    %37 = arith.xori %33, %36 : vector<32x1xi1>
    %38 = arith.andi %37, %31 : vector<32x1xi1>
    %39 = vector.broadcast %27 : i32 to vector<32x1xi32>
    %40 = arith.addi %29, %39 : vector<32x1xi32>
    %41 = arith.select %38, %40, %29 : vector<32x1xi1>, vector<32x1xi32>
    %c14_i32 = arith.constant 14 : i32
    %42 = vector.broadcast %c14_i32 : i32 to vector<32x1xi32>
    %43 = arith.cmpi slt, %41, %42 : vector<32x1xi32>
    %cst_19 = arith.constant 0.000000e+00 : f32
    %44 = vector.shape_cast %43 : vector<32x1xi1> to vector<32x1xi1>
    %45 = vector.broadcast %44 : vector<32x1xi1> to vector<32x256xi1>
    %46 = vector.broadcast %cst_19 : f32 to vector<32x256xf32>
    %47 = arith.select %45, %24, %46 : vector<32x256xi1>, vector<32x256xf32>
    %c1_i32_20 = arith.constant 1 : i32
    %48 = tpu.dynamic_rotate %47 by %c1_i32_20 dim 0 : vector<32x256xf32>, i32 -> vector<32x256xf32>
    %c31_i32 = arith.constant 31 : i32
    %49 = tpu.dynamic_rotate %47 by %c31_i32 dim 0 : vector<32x256xf32>, i32 -> vector<32x256xf32>
    %c1_21 = arith.constant 1 : index
    %c0_22 = arith.constant 0 : index
    %c0_23 = arith.constant 0 : index
    %50 = vector.load %arg4[%c1_21, %c0_22, %c0_23] : memref<3x256x512xf32, #tpu.memory_space<vmem>>, vector<1x256x512xf32>
    %51 = vector.shape_cast %50 : vector<1x256x512xf32> to vector<256x512xf32>
    %cst_24 = arith.constant dense<0.000000e+00> : vector<32x512xf32>
    %52 = tpu.matmul %47, %51, %cst_24 {dimension_numbers = #tpu.dot_dimension_numbers<[1], [0], [0], [1], [0, 0, 1, 1], [], []>} : vector<32x256xf32>, vector<256x512xf32>, vector<32x512xf32> -> vector<32x512xf32>
    %c0_25 = arith.constant 0 : index
    %c0_26 = arith.constant 0 : index
    %c0_27 = arith.constant 0 : index
    %53 = vector.load %arg4[%c0_25, %c0_26, %c0_27] : memref<3x256x512xf32, #tpu.memory_space<vmem>>, vector<1x256x512xf32>
    %54 = vector.shape_cast %53 : vector<1x256x512xf32> to vector<256x512xf32>
    %cst_28 = arith.constant dense<0.000000e+00> : vector<32x512xf32>
    %55 = tpu.matmul %48, %54, %cst_28 {dimension_numbers = #tpu.dot_dimension_numbers<[1], [0], [0], [1], [0, 0, 1, 1], [], []>} : vector<32x256xf32>, vector<256x512xf32>, vector<32x512xf32> -> vector<32x512xf32>
    %56 = arith.addf %52, %55 : vector<32x512xf32>
    %c2_29 = arith.constant 2 : index
    %c0_30 = arith.constant 0 : index
    %c0_31 = arith.constant 0 : index
    %57 = vector.load %arg4[%c2_29, %c0_30, %c0_31] : memref<3x256x512xf32, #tpu.memory_space<vmem>>, vector<1x256x512xf32>
    %58 = vector.shape_cast %57 : vector<1x256x512xf32> to vector<256x512xf32>
    %cst_32 = arith.constant dense<0.000000e+00> : vector<32x512xf32>
    %59 = tpu.matmul %49, %58, %cst_32 {dimension_numbers = #tpu.dot_dimension_numbers<[1], [0], [0], [1], [0, 0, 1, 1], [], []>} : vector<32x256xf32>, vector<256x512xf32>, vector<32x512xf32> -> vector<32x512xf32>
    %60 = arith.addf %56, %59 : vector<32x512xf32>
    %c0_33 = arith.constant 0 : index
    %c0_34 = arith.constant 0 : index
    %61 = vector.load %arg5[%c0_33, %c0_34] : memref<1x512xf32, #tpu.memory_space<vmem>>, vector<1x512xf32>
    %62 = vector.broadcast %61 : vector<1x512xf32> to vector<32x512xf32>
    %63 = arith.addf %60, %62 : vector<32x512xf32>
    %cst_35 = arith.constant 0.000000e+00 : f32
    %64 = vector.broadcast %cst_35 : f32 to vector<32x512xf32>
    %65 = arith.maximumf %63, %64 : vector<32x512xf32>
    %66 = vector.extract_strided_slice %65 {offsets = [0, 0], sizes = [32, 256], strides = [1, 1]} : vector<32x512xf32> to vector<32x256xf32>
    %67 = vector.extract_strided_slice %65 {offsets = [0, 256], sizes = [32, 256], strides = [1, 1]} : vector<32x512xf32> to vector<32x256xf32>
    %68 = arith.maximumf %66, %67 : vector<32x256xf32>
    %69 = vector.shape_cast %68 : vector<32x256xf32> to vector<16x2x256xf32>
    %cst_36 = arith.constant dense<0xFF800000> : vector<16x256xf32>
    %70 = vector.multi_reduction <maximumf>, %69, %cst_36 [1] : vector<16x2x256xf32> to vector<16x256xf32>
    %71 = vector.shape_cast %70 : vector<16x256xf32> to vector<2x8x256xf32>
    %72 = vector.extract_strided_slice %71 {offsets = [0, 0, 0], sizes = [2, 1, 256], strides = [1, 1, 1]} : vector<2x8x256xf32> to vector<2x1x256xf32>
    %73 = vector.shape_cast %72 : vector<2x1x256xf32> to vector<2x256xf32>
    %c0_37 = arith.constant 0 : index
    %c0_38 = arith.constant 0 : index
    %c0_39 = arith.constant 0 : index
    %74 = vector.load %arg6[%c0_37, %c0_38, %c0_39] : memref<7x256x128xf32, #tpu.memory_space<vmem>>, vector<1x256x128xf32>
    %75 = vector.shape_cast %74 : vector<1x256x128xf32> to vector<256x128xf32>
    %cst_40 = arith.constant dense<0.000000e+00> : vector<2x128xf32>
    %76 = tpu.matmul %73, %75, %cst_40 {dimension_numbers = #tpu.dot_dimension_numbers<[1], [0], [0], [1], [0, 0, 1, 1], [], []>} : vector<2x256xf32>, vector<256x128xf32>, vector<2x128xf32> -> vector<2x128xf32>
    %77 = vector.extract_strided_slice %71 {offsets = [0, 1, 0], sizes = [2, 1, 256], strides = [1, 1, 1]} : vector<2x8x256xf32> to vector<2x1x256xf32>
    %78 = vector.shape_cast %77 : vector<2x1x256xf32> to vector<2x256xf32>
    %c1_41 = arith.constant 1 : index
    %c0_42 = arith.constant 0 : index
    %c0_43 = arith.constant 0 : index
    %79 = vector.load %arg6[%c1_41, %c0_42, %c0_43] : memref<7x256x128xf32, #tpu.memory_space<vmem>>, vector<1x256x128xf32>
    %80 = vector.shape_cast %79 : vector<1x256x128xf32> to vector<256x128xf32>
    %cst_44 = arith.constant dense<0.000000e+00> : vector<2x128xf32>
    %81 = tpu.matmul %78, %80, %cst_44 {dimension_numbers = #tpu.dot_dimension_numbers<[1], [0], [0], [1], [0, 0, 1, 1], [], []>} : vector<2x256xf32>, vector<256x128xf32>, vector<2x128xf32> -> vector<2x128xf32>
    %82 = arith.addf %76, %81 : vector<2x128xf32>
    %83 = vector.extract_strided_slice %71 {offsets = [0, 2, 0], sizes = [2, 1, 256], strides = [1, 1, 1]} : vector<2x8x256xf32> to vector<2x1x256xf32>
    %84 = vector.shape_cast %83 : vector<2x1x256xf32> to vector<2x256xf32>
    %c2_45 = arith.constant 2 : index
    %c0_46 = arith.constant 0 : index
    %c0_47 = arith.constant 0 : index
    %85 = vector.load %arg6[%c2_45, %c0_46, %c0_47] : memref<7x256x128xf32, #tpu.memory_space<vmem>>, vector<1x256x128xf32>
    %86 = vector.shape_cast %85 : vector<1x256x128xf32> to vector<256x128xf32>
    %cst_48 = arith.constant dense<0.000000e+00> : vector<2x128xf32>
    %87 = tpu.matmul %84, %86, %cst_48 {dimension_numbers = #tpu.dot_dimension_numbers<[1], [0], [0], [1], [0, 0, 1, 1], [], []>} : vector<2x256xf32>, vector<256x128xf32>, vector<2x128xf32> -> vector<2x128xf32>
    %88 = arith.addf %82, %87 : vector<2x128xf32>
    %89 = vector.extract_strided_slice %71 {offsets = [0, 3, 0], sizes = [2, 1, 256], strides = [1, 1, 1]} : vector<2x8x256xf32> to vector<2x1x256xf32>
    %90 = vector.shape_cast %89 : vector<2x1x256xf32> to vector<2x256xf32>
    %c3 = arith.constant 3 : index
    %c0_49 = arith.constant 0 : index
    %c0_50 = arith.constant 0 : index
    %91 = vector.load %arg6[%c3, %c0_49, %c0_50] : memref<7x256x128xf32, #tpu.memory_space<vmem>>, vector<1x256x128xf32>
    %92 = vector.shape_cast %91 : vector<1x256x128xf32> to vector<256x128xf32>
    %cst_51 = arith.constant dense<0.000000e+00> : vector<2x128xf32>
    %93 = tpu.matmul %90, %92, %cst_51 {dimension_numbers = #tpu.dot_dimension_numbers<[1], [0], [0], [1], [0, 0, 1, 1], [], []>} : vector<2x256xf32>, vector<256x128xf32>, vector<2x128xf32> -> vector<2x128xf32>
    %94 = arith.addf %88, %93 : vector<2x128xf32>
    %95 = vector.extract_strided_slice %71 {offsets = [0, 4, 0], sizes = [2, 1, 256], strides = [1, 1, 1]} : vector<2x8x256xf32> to vector<2x1x256xf32>
    %96 = vector.shape_cast %95 : vector<2x1x256xf32> to vector<2x256xf32>
    %c4 = arith.constant 4 : index
    %c0_52 = arith.constant 0 : index
    %c0_53 = arith.constant 0 : index
    %97 = vector.load %arg6[%c4, %c0_52, %c0_53] : memref<7x256x128xf32, #tpu.memory_space<vmem>>, vector<1x256x128xf32>
    %98 = vector.shape_cast %97 : vector<1x256x128xf32> to vector<256x128xf32>
    %cst_54 = arith.constant dense<0.000000e+00> : vector<2x128xf32>
    %99 = tpu.matmul %96, %98, %cst_54 {dimension_numbers = #tpu.dot_dimension_numbers<[1], [0], [0], [1], [0, 0, 1, 1], [], []>} : vector<2x256xf32>, vector<256x128xf32>, vector<2x128xf32> -> vector<2x128xf32>
    %100 = arith.addf %94, %99 : vector<2x128xf32>
    %101 = vector.extract_strided_slice %71 {offsets = [0, 5, 0], sizes = [2, 1, 256], strides = [1, 1, 1]} : vector<2x8x256xf32> to vector<2x1x256xf32>
    %102 = vector.shape_cast %101 : vector<2x1x256xf32> to vector<2x256xf32>
    %c5 = arith.constant 5 : index
    %c0_55 = arith.constant 0 : index
    %c0_56 = arith.constant 0 : index
    %103 = vector.load %arg6[%c5, %c0_55, %c0_56] : memref<7x256x128xf32, #tpu.memory_space<vmem>>, vector<1x256x128xf32>
    %104 = vector.shape_cast %103 : vector<1x256x128xf32> to vector<256x128xf32>
    %cst_57 = arith.constant dense<0.000000e+00> : vector<2x128xf32>
    %105 = tpu.matmul %102, %104, %cst_57 {dimension_numbers = #tpu.dot_dimension_numbers<[1], [0], [0], [1], [0, 0, 1, 1], [], []>} : vector<2x256xf32>, vector<256x128xf32>, vector<2x128xf32> -> vector<2x128xf32>
    %106 = arith.addf %100, %105 : vector<2x128xf32>
    %107 = vector.extract_strided_slice %71 {offsets = [0, 6, 0], sizes = [2, 1, 256], strides = [1, 1, 1]} : vector<2x8x256xf32> to vector<2x1x256xf32>
    %108 = vector.shape_cast %107 : vector<2x1x256xf32> to vector<2x256xf32>
    %c6 = arith.constant 6 : index
    %c0_58 = arith.constant 0 : index
    %c0_59 = arith.constant 0 : index
    %109 = vector.load %arg6[%c6, %c0_58, %c0_59] : memref<7x256x128xf32, #tpu.memory_space<vmem>>, vector<1x256x128xf32>
    %110 = vector.shape_cast %109 : vector<1x256x128xf32> to vector<256x128xf32>
    %cst_60 = arith.constant dense<0.000000e+00> : vector<2x128xf32>
    %111 = tpu.matmul %108, %110, %cst_60 {dimension_numbers = #tpu.dot_dimension_numbers<[1], [0], [0], [1], [0, 0, 1, 1], [], []>} : vector<2x256xf32>, vector<256x128xf32>, vector<2x128xf32> -> vector<2x128xf32>
    %112 = arith.addf %106, %111 : vector<2x128xf32>
    %c0_61 = arith.constant 0 : index
    %c0_62 = arith.constant 0 : index
    %113 = vector.load %arg7[%c0_61, %c0_62] : memref<1x128xf32, #tpu.memory_space<vmem>>, vector<1x128xf32>
    %114 = vector.broadcast %113 : vector<1x128xf32> to vector<2x128xf32>
    %115 = arith.addf %112, %114 : vector<2x128xf32>
    %cst_63 = arith.constant 0.000000e+00 : f32
    %116 = vector.broadcast %cst_63 : f32 to vector<2x128xf32>
    %117 = arith.maximumf %115, %116 : vector<2x128xf32>
    %c0_64 = arith.constant 0 : index
    %c0_65 = arith.constant 0 : index
    %118 = vector.load %arg8[%c0_64, %c0_65] : memref<128x128xf32, #tpu.memory_space<vmem>>, vector<128x128xf32>
    %cst_66 = arith.constant dense<0.000000e+00> : vector<2x128xf32>
    %119 = tpu.matmul %117, %118, %cst_66 {dimension_numbers = #tpu.dot_dimension_numbers<[1], [0], [0], [1], [0, 0, 1, 1], [], []>} : vector<2x128xf32>, vector<128x128xf32>, vector<2x128xf32> -> vector<2x128xf32>
    %c0_67 = arith.constant 0 : index
    %c0_68 = arith.constant 0 : index
    %120 = vector.load %arg9[%c0_67, %c0_68] : memref<1x128xf32, #tpu.memory_space<vmem>>, vector<1x128xf32>
    %121 = vector.broadcast %120 : vector<1x128xf32> to vector<2x128xf32>
    %122 = arith.addf %119, %121 : vector<2x128xf32>
    %c0_69 = arith.constant 0 : index
    %c0_70 = arith.constant 0 : index
    %123 = vector.load %arg10[%c0_69, %c0_70] : memref<2x128xf32, #tpu.memory_space<vmem>>, vector<2x128xf32>
    tpu.vector_store %arg10[%c0_69, %c0_70], %122 {strides = array<i32>} : memref<2x128xf32, #tpu.memory_space<vmem>>, vector<2x128xf32>,
    return
  }
  func.func @transform_0(%arg0: i32) -> (i32, i32, i32) {
    %c0_i32 = arith.constant 0 : i32
    %c0_i32_0 = arith.constant 0 : i32
    %c0_i32_1 = arith.constant 0 : i32
    return %arg0, %c0_i32, %c0_i32_0 : i32, i32, i32
  }
  func.func @transform_1(%arg0: i32) -> (i32, i32, i32) {
    %c0_i32 = arith.constant 0 : i32
    %c0_i32_0 = arith.constant 0 : i32
    %c0_i32_1 = arith.constant 0 : i32
    %c0_i32_2 = arith.constant 0 : i32
    return %c0_i32, %c0_i32_0, %c0_i32_1 : i32, i32, i32
  }
  func.func @transform_2(%arg0: i32) -> (i32, i32) {
    %c0_i32 = arith.constant 0 : i32
    %c0_i32_0 = arith.constant 0 : i32
    %c0_i32_1 = arith.constant 0 : i32
    return %c0_i32, %c0_i32_0 : i32, i32
  }
  func.func @transform_3(%arg0: i32) -> (i32, i32, i32) {
    %c0_i32 = arith.constant 0 : i32
    %c0_i32_0 = arith.constant 0 : i32
    %c0_i32_1 = arith.constant 0 : i32
    %c0_i32_2 = arith.constant 0 : i32
    return %c0_i32, %c0_i32_0, %c0_i32_1 : i32, i32, i32
  }
  func.func @transform_4(%arg0: i32) -> (i32, i32) {
    %c0_i32 = arith.constant 0 : i32
    %c0_i32_0 = arith.constant 0 : i32
    %c0_i32_1 = arith.constant 0 : i32
    return %c0_i32, %c0_i32_0 : i32, i32
  }
  func.func @transform_5(%arg0: i32) -> (i32, i32, i32) {
    %c0_i32 = arith.constant 0 : i32
    %c0_i32_0 = arith.constant 0 : i32
    %c0_i32_1 = arith.constant 0 : i32
    %c0_i32_2 = arith.constant 0 : i32
    return %c0_i32, %c0_i32_0, %c0_i32_1 : i32, i32, i32
  }
  func.func @transform_6(%arg0: i32) -> (i32, i32) {
    %c0_i32 = arith.constant 0 : i32
    %c0_i32_0 = arith.constant 0 : i32
    %c0_i32_1 = arith.constant 0 : i32
    return %c0_i32, %c0_i32_0 : i32, i32
  }
  func.func @transform_7(%arg0: i32) -> (i32, i32) {
    %c0_i32 = arith.constant 0 : i32
    %c0_i32_0 = arith.constant 0 : i32
    %c0_i32_1 = arith.constant 0 : i32
    return %c0_i32, %c0_i32_0 : i32, i32
  }
  func.func @transform_8(%arg0: i32) -> (i32, i32) {
    %c0_i32 = arith.constant 0 : i32
    %c0_i32_0 = arith.constant 0 : i32
    %c0_i32_1 = arith.constant 0 : i32
    return %c0_i32, %c0_i32_0 : i32, i32
  }
  func.func @transform_9(%arg0: i32) -> (i32, i32) {
    %c0_i32 = arith.constant 0 : i32
    %c0_i32_0 = arith.constant 0 : i32
    return %arg0, %c0_i32 : i32, i32
  }
}

</mosaic_0001>

<bundles_post_ra>
// kernel: simple_cnn_forward.1
= control target key start
LH: loop header
LB: loop body
LE: loop exit
PB: predicated region body
PF: predicated region fallthrough
CT: control target
= control target key end

     0   :  { %14 = vsyncpa [#allocation3], 0  ;;  %s6749_s0 = inlined_call_operand.vmem [shape: f32[2,32,28], index: 0, kind: input, shape index: {}]   ;;  %s6750_s1 = inlined_call_operand.hbm [shape: f32[3,28,512], index: 1, kind: input, shape index: {}]   ;;  %s6751_s2 = inlined_call_operand.hbm [shape: f32[1,512], index: 2, kind: input, shape index: {}]   ;;  %s6752_s3 = inlined_call_operand.hbm [shape: f32[3,256,512], index: 3, kind: input, shape index: {}]   ;;  %s6753_s4 = inlined_call_operand.hbm [shape: f32[1,512], index: 4, kind: input, shape index: {}]   ;;  %s6754_s5 = inlined_call_operand.hbm [shape: f32[7,256,128], index: 5, kind: input, shape index: {}]   ;;  %s6755_s6 = inlined_call_operand.hbm [shape: f32[1,128], index: 6, kind: input, shape index: {}]   ;;  %s6756_s7 = inlined_call_operand.hbm [shape: f32[128,128], index: 7, kind: input, shape index: {}]   ;;  %s6757_s8 = inlined_call_operand.hbm [shape: f32[1,128], index: 8, kind: input, shape index: {}]   ;;  %s6758_s9 = inlined_call_operand.hbm [shape: f32[2,128], index: 9, kind: output, shape index: {}]  }
   0x1   :  { %15 = vsyncpa [#allocation6], 0 }
   0x2   :  { %16 = vsyncpa [#allocation9], 0 }
   0x3   :  { %17 = vsyncpa [#allocation12], 0 }
   0x4   :  { %18 = vsyncpa [#allocation15], 0 }
   0x5   :  { %19 = vsyncpa [#allocation4], 0  ;;  %s5207_s30 = smov [#allocation5]   ;;  %s5208_s11 = smov [#allocation8]  }
   0x6   :  { %s40_s10 = sshll.u32 %s5207_s30, 4  ;;  %s62_s12 = sshll.u32 %s5208_s11, 4  ;;  %s41_s10 = int_to_ptr.vmem [resolvable:$true] %s40_s10  ;;  %s63_s12 = int_to_ptr.vmem [resolvable:$true] %s62_s12 }
   0x7   :  { %s5023_s13 = scalar_lea.vmem %s41_s10, 64  ;;  %p5028_p1 = scmp.lt.s32.totalorder %s41_s10, %s41_s10 }
   0x8   :  { %p5024_p0 = scmp.ne.s32.totalorder %s41_s10, %s5023_s13  ;;  %p5029_p2 = scmp.lt.s32.totalorder %s5023_s13, %s5023_s13 }
   0xa   :  { %p5030_p3 = por %p5029_p2, %p5028_p1 }
   0xc   :  { %p5031_p4 = pnand %p5030_p3, %p5024_p0 }
   0xe   :  { %5034 = shalt.err (!%p5031_p4)
}
   0xf   :  { %43 = dma.hbm_to_vmem [thread:$0]  %s6751_s2, 64, %s41_s10, [#allocation6]  }
  0x10   :  { %s5043_s16 = scalar_lea.vmem %s63_s12, 64  ;;  %p5048_p6 = scmp.lt.s32.totalorder %s63_s12, %s63_s12 }
  0x11   :  { %p5044_p5 = scmp.ne.s32.totalorder %s63_s12, %s5043_s16  ;;  %p5049_p7 = scmp.lt.s32.totalorder %s5043_s16, %s5043_s16 }
  0x13   :  { %p5050_p8 = por %p5049_p7, %p5048_p6 }
  0x15   :  { %p5051_p9 = pnand %p5050_p8, %p5044_p5 }
  0x17   :  { %5054 = shalt.err (!%p5051_p9)
}
  0x18   :  { %65 = dma.hbm_to_vmem [thread:$0]  %s6753_s4, 64, %s63_s12, [#allocation9]  }
  0x19   :  { %s5209_s19 = smov [#allocation11]   ;;  %s5210_s21 = smov [#allocation2]  }
  0x1a   :  { %s84_s20 = sshll.u32 %s5209_s19, 4  ;;  %s27_s22 = sshll.u32 %s5210_s21, 4  ;;  %s85_s20 = int_to_ptr.vmem [resolvable:$true] %s84_s20  ;;  %s28_s22 = int_to_ptr.vmem [resolvable:$true] %s27_s22 }
  0x1b   :  { %s5063_s23 = scalar_lea.vmem %s85_s20, 16  ;;  %s5067_s2 = scalar_lea.vmem %s85_s20, 32 }
  0x1c   :  { %p5064_p10 = scmp.ne.s32.totalorder %s85_s20, %s5063_s23  ;;  %p5068_p11 = scmp.lt.s32.totalorder %s85_s20, %s85_s20 }
  0x1d   :  { %p5069_p12 = scmp.lt.s32.totalorder %s5067_s2, %s5063_s23 }
  0x1f   :  { %p5070_p13 = por %p5069_p12, %p5068_p11 }
  0x21   :  { %p5071_p0 = pnand %p5070_p13, %p5064_p10 }
  0x23   :  { %5074 = shalt.err (!%p5071_p0)
}
  0x24   :  { %87 = dma.hbm_to_vmem [thread:$0]  %s6755_s6, 16, %s85_s20, [#allocation12]  }
  0x25   :  { %s5083_s26 = scalar_lea.vmem %s28_s22, 6144  ;;  %p5088_p2 = scmp.lt.s32.totalorder %s28_s22, %s28_s22 }
  0x26   :  { %p5084_p1 = scmp.ne.s32.totalorder %s28_s22, %s5083_s26  ;;  %p5089_p3 = scmp.lt.s32.totalorder %s5083_s26, %s5083_s26 }
  0x28   :  { %p5090_p4 = por %p5089_p3, %p5088_p2 }
  0x2a   :  { %p5091_p5 = pnand %p5090_p4, %p5084_p1 }
  0x2c   :  { %5094 = shalt.err (!%p5091_p5)
}
  0x2d   :  { %s5211_s4 = smov 512   ;;  %s5212_s27 = smov 32  }
  0x2e   :  { %33 = dma.hbm_to_vmem [thread:$0]  %s6750_s1, 6144, %s28_s22, [#allocation3], %s5211_s4, %s5211_s4, %s5212_s27  }
  0x2f   :  { %s5213_s30 = smov [#allocation7]   ;;  %s5214_s11 = smov [#allocation10]  }
  0x30   :  { %s49_s10 = sshll.u32 %s5213_s30, 4  ;;  %s71_s12 = sshll.u32 %s5214_s11, 4  ;;  %s50_s10 = int_to_ptr.vmem [resolvable:$true] %s49_s10  ;;  %s72_s12 = int_to_ptr.vmem [resolvable:$true] %s71_s12 }
  0x31   :  { %s5103_s6 = scalar_lea.vmem %s50_s10, 49152  ;;  %p5108_p7 = scmp.lt.s32.totalorder %s50_s10, %s50_s10 }
  0x32   :  { %p5104_p6 = scmp.ne.s32.totalorder %s50_s10, %s5103_s6  ;;  %p5109_p8 = scmp.lt.s32.totalorder %s5103_s6, %s5103_s6 }
  0x34   :  { %p5110_p9 = por %p5109_p8, %p5108_p7 }
  0x36   :  { %p5111_p10 = pnand %p5110_p9, %p5104_p6 }
  0x38   :  { %5114 = shalt.err (!%p5111_p10)
}
  0x39   :  { %55 = dma.hbm_to_vmem [thread:$0]  %s6752_s3, 49152, %s50_s10, [#allocation6], %s5211_s4, %s5211_s4, %s5212_s27  }
  0x3a   :  { %s5123_s15 = scalar_lea.vmem %s72_s12, 28672  ;;  %p5128_p12 = scmp.lt.s32.totalorder %s72_s12, %s72_s12 }
  0x3b   :  { %p5124_p11 = scmp.ne.s32.totalorder %s72_s12, %s5123_s15  ;;  %p5129_p13 = scmp.lt.s32.totalorder %s5123_s15, %s5123_s15 }
  0x3d   :  { %p5130_p0 = por %p5129_p13, %p5128_p12 }
  0x3f   :  { %p5131_p1 = pnand %p5130_p0, %p5124_p11 }
  0x41   :  { %5134 = shalt.err (!%p5131_p1)
}
  0x42   :  { %s5215_s1 = smov 128   ;;  %s5216_s16 = smov 8  }
  0x43   :  { %77 = dma.hbm_to_vmem [thread:$0]  %s6754_s5, 28672, %s72_s12, [#allocation9], %s5215_s1, %s5215_s1, %s5216_s16  }
  0x44   :  { %s5217_s19 = smov [#allocation13]   ;;  %s5218_s21 = smov [#allocation14]  }
  0x45   :  { %s93_s20 = sshll.u32 %s5217_s19, 4  ;;  %s106_s22 = sshll.u32 %s5218_s21, 4  ;;  %s94_s20 = int_to_ptr.vmem [resolvable:$true] %s93_s20  ;;  %s107_s22 = int_to_ptr.vmem [resolvable:$true] %s106_s22 }
  0x46   :  { %s5143_s3 = scalar_lea.vmem %s94_s20, 2048  ;;  %p5148_p3 = scmp.lt.s32.totalorder %s94_s20, %s94_s20 }
  0x47   :  { %p5144_p2 = scmp.ne.s32.totalorder %s94_s20, %s5143_s3  ;;  %p5149_p4 = scmp.lt.s32.totalorder %s5143_s3, %s5143_s3 }
  0x49   :  { %p5150_p5 = por %p5149_p4, %p5148_p3 }
  0x4b   :  { %p5151_p6 = pnand %p5150_p5, %p5144_p2 }
  0x4d   :  { %5154 = shalt.err (!%p5151_p6)
}
  0x4e   :  { %99 = dma.hbm_to_vmem [thread:$0]  %s6756_s7, 2048, %s94_s20, [#allocation12], %s5215_s1, %s5215_s1, %s5216_s16  }
  0x4f   :  { %s5163_s24 = scalar_lea.vmem %s107_s22, 16  ;;  %s5167_s5 = scalar_lea.vmem %s107_s22, 32 }
  0x50   :  { %p5164_p7 = scmp.ne.s32.totalorder %s107_s22, %s5163_s24  ;;  %p5168_p8 = scmp.lt.s32.totalorder %s107_s22, %s107_s22 }
  0x51   :  { %p5169_p9 = scmp.lt.s32.totalorder %s5167_s5, %s5163_s24 }
  0x53   :  { %p5170_p10 = por %p5169_p9, %p5168_p8 }
  0x55   :  { %p5171_p11 = pnand %p5170_p10, %p5164_p7 }
  0x57   :  { %5174 = shalt.err (!%p5171_p11)
}
  0x58   :  { %109 = dma.hbm_to_vmem [thread:$0]  %s6757_s8, 16, %s107_s22, [#allocation15]  }
  0x59   :  { %5195 = dma.done.wait [#allocation3], 6144  }
  0x5a   :  { %5196 = vsyncadd [#allocation3], 4294961152 }
  0x5b   :  { %5197 = dma.done.wait [#allocation6], 49216  }
  0x5c   :  { %5198 = vsyncadd [#allocation6], 4294918080 }
  0x5d   :  { %5199 = dma.done.wait [#allocation9], 28736  }
  0x5e   :  { %5200 = vsyncadd [#allocation9], 4294938560 }
  0x5f   :  { %5201 = dma.done.wait [#allocation12], 2064  }
  0x60   :  { %5202 = vsyncadd [#allocation12], 4294965232 }
  0x61   :  { %5203 = dma.done.wait [#allocation15], 16  }
  0x62   :  { %5204 = vsyncadd [#allocation15], 4294967280  ;;  %v6759_v0 = vmov 0.0   ;;  %v150_v1 = vlaneseq  ;;  %vm236_vm0 = vcmask 1043456   ;;  %v208_v2 = vld [vmem:[#allocation2 + $0x68] sm:$0xf] }
  0x63   :  { %313 = vmatprep.mubr.f32.mxu0 %v6759_v0  ;;  %426 = vmatprep.mubr.f32.mxu1 %v6759_v0  ;;  %v210_v3 = vld [vmem:[#allocation2 + $0x78] sm:$0xf]  ;;  %v207_v4 = vld [vmem:[#allocation2 + $0x60] sm:$0xf]  ;;  %v209_v5 = vld [vmem:[#allocation2 + $0x70] sm:$0xf] }
  0x64   :  { %4632 = vmatprep.subr.msk.mxu0 %vm236_vm0, %v208_v2  ;;  %4642 = vmatprep.subr.msk.mxu1 %vm236_vm0, %v210_v3  ;;  %v204_v6 = vld [vmem:[#allocation2 + $0x48] sm:$0xff]  ;;  %v206_v7 = vld [vmem:[#allocation2 + $0x58] sm:$0xff]  ;;  %v5301_v8 = vshrl.u32 %v150_v1, 7  ;;  %v203_v9 = vld [vmem:[#allocation2 + $0x40] sm:$0xff]  ;;  %vm211_vm2 = vcmask 228352   ;;  %vm1630_vm4 = vcmask 1041408  }
  0x65   :  { %4633 = vmatpush1.msk.msra.mxu0 %vm236_vm0, %v207_v4  ;;  %4643 = vmatpush1.msk.msra.mxu1 %vm236_vm0, %v209_v5  ;;  %v205_v10 = vld [vmem:[#allocation2 + $0x50] sm:$0xff]  ;;  %v200_v11 = vld [vmem:[#allocation2 + $0x28] sm:$0xff]  ;;  %v202_v12 = vld [vmem:[#allocation2 + $0x38] sm:$0xff]  ;;  %vm2206_vm5 = vcmask 1041409   ;;  %vm2208_vm6 = vcmask 1042434   ;;  %vm2210_vm7 = vcmask 1043459  }
  0x66   :  { %6778 = vst [vmem:[#allocation23_spill] sm:$0xff] %v5301_v8  ;;  %275 = vmatprep.subr.mxu0 %v204_v6  ;;  %388 = vmatprep.subr.mxu1 %v206_v7  ;;  %v199_v13 = vld [vmem:[#allocation2 + $0x20] sm:$0xff]  ;;  %v201_v14 = vld [vmem:[#allocation2 + $0x30] sm:$0xff]  ;;  %v196_v15 = vld [vmem:[#allocation2 + $0x8] sm:$0xff]  ;;  %vm152_vm1 = vcmp.lt.s32.totalorder %v5301_v8, 1  ;;  %vm169_vm3 = vcmp.lt.s32.totalorder %v5301_v8, 7 }
  0x67   :  { %276 = vmatpush1.msra.mxu0 %v203_v9  ;;  %389 = vmatpush1.msra.mxu1 %v205_v10  ;;  %v198_v16 = vld [vmem:[#allocation2 + $0x18] sm:$0xff]  ;;  %v195_v17 = vld [vmem:[#allocation2] sm:$0xff]  ;;  %v197_v18 = vld [vmem:[#allocation2 + $0x10] sm:$0xff]  ;;  %vm2212_vm8 = vcmask 1044484   ;;  %vm2214_vm10 = vcmask 1045509   ;;  %vm2216_vm11 = vcmask 1046534  }
  0x68   :  { %277 = vmatprep.subr.mxu0 %v200_v11  ;;  %390 = vmatprep.subr.mxu1 %v202_v12  ;;  %v5308_v19 = vld [vmem:[%s6749_s0] sm:$0xff]  ;;  %v5313_v20 = vld [vmem:[%s6749_s0 + $0x38] sm:$0xff]  ;;  %v192_v23 = vld [vmem:[#allocation2 + $0xe8] sm:$0xf]  ;;  %vm2218_vm12 = vcmask 1047559   ;;  %vm5221_vm14 = vmmov 0  }
  0x69   :  { %278 = vmatpush1.msra.mxu0 %v199_v13  ;;  %391 = vmatpush1.msra.mxu1 %v201_v14  ;;  %v142_v21 = vrot.slane %v5308_v19, 7  ;;  %v149_v22 = vrot.slane %v5313_v20, 7  ;;  %v194_v24 = vld [vmem:[#allocation2 + $0xf8] sm:$0xf]  ;;  %v5321_v25 = vld [vmem:[%s6749_s0 + $0x8] sm:$0xff]  ;;  %v5331_v30 = vld [vmem:[%s6749_s0 + $0x10] sm:$0xff] }
  0x6a   :  { %279 = vmatprep.subr.mxu0 %v196_v15  ;;  %392 = vmatprep.subr.mxu1 %v198_v16  ;;  %v191_v27 = vld [vmem:[#allocation2 + $0xe0] sm:$0xf]  ;;  %v193_v28 = vld [vmem:[#allocation2 + $0xf0] sm:$0xf]  ;;  %v143_v29 = vrot.slane %v5321_v25, 7  ;;  %v144_v32 = vrot.slane %v5331_v30, 7 }
  0x6b   :  { %280 = vmatpush1.msra.mxu0 %v195_v17  ;;  %393 = vmatpush1.msra.mxu1 %v197_v18  ;;  %v160_v26 = vsel %vm152_vm1, %v149_v22, %v142_v21  ;;  %v5345_v33 = vld [vmem:[%s6749_s0 + $0x18] sm:$0xff]  ;;  %v188_v34 = vld [vmem:[#allocation2 + $0xc8] sm:$0xff]  ;;  %v161_v36 = vrot.slane %v5308_v19, 1  ;;  %v168_v37 = vrot.slane %v5313_v20, 1  ;;  %v187_v38 = vld [vmem:[#allocation2 + $0xc0] sm:$0xff]  ;;  %v162_v16 = vrot.slane %v5321_v25, 1 }
  0x6c   :  { %4634 = vmatmul.mubr.msk.f32.vlgmr.msra.gmra.mxu0 %vm211_vm2, %v160_v26  ;;  %4644 = vmatmul.mubr.msk.f32.vlgmr.msra.gmra.mxu1 %vm211_vm2, %v160_v26  ;;  %v159_v31 = vsel %vm152_vm1, %v142_v21, %v143_v29  ;;  %v190_v35 = vld [vmem:[#allocation2 + $0xd8] sm:$0xff]  ;;  %v189_v39 = vld [vmem:[#allocation2 + $0xd0] sm:$0xff]  ;;  %v158_v40 = vsel %vm152_vm1, %v143_v29, %v144_v32  ;;  %v145_v41 = vrot.slane %v5345_v33, 7  ;;  %v5370_v43 = vld [vmem:[%s6749_s0 + $0x20] sm:$0xff]  ;;  %v163_v18 = vrot.slane %v5331_v30, 1 }
  0x6d   :  { %4652 = vmatprep.subr.msk.mxu0 %vm236_vm0, %v192_v23  ;;  %4662 = vmatprep.subr.msk.mxu1 %vm236_vm0, %v194_v24  ;;  %v5365_v42 = vsel %vm169_vm3, %v168_v37, %v161_v36  ;;  %v184_v44 = vld [vmem:[#allocation2 + $0xa8] sm:$0xff]  ;;  %v186_v45 = vld [vmem:[#allocation2 + $0xb8] sm:$0xff]  ;;  %v183_v46 = vld [vmem:[#allocation2 + $0xa0] sm:$0xff]  ;;  %v146_v49 = vrot.slane %v5370_v43, 7  ;;  %v176_v17 = vsel %vm169_vm3, %v161_v36, %v162_v16  ;;  %v165_v23 = vrot.slane %v5370_v43, 1 }
  0x6e   :  { %4653 = vmatpush1.msk.msra.mxu0 %vm236_vm0, %v191_v27  ;;  %4663 = vmatpush1.msk.msra.mxu1 %vm236_vm0, %v193_v28  ;;  %v185_v47 = vld [vmem:[#allocation2 + $0xb0] sm:$0xff]  ;;  %v157_v48 = vsel %vm152_vm1, %v144_v32, %v145_v41  ;;  %v5382_v50 = vld [vmem:[%s6749_s0 + $0x28] sm:$0xff]  ;;  %v182_v52 = vld [vmem:[#allocation2 + $0x98] sm:$0xff]  ;;  %v175_v21 = vsel %vm169_vm3, %v162_v16, %v163_v18 }
  0x6f   :  { %319 = vmatprep.mubr.f32.mxu0 %v6759_v0  ;;  %432 = vmatprep.mubr.f32.mxu1 %v6759_v0  ;;  %v180_v51 = vld [vmem:[#allocation2 + $0x88] sm:$0xff]  ;;  %v179_v53 = vld [vmem:[#allocation2 + $0x80] sm:$0xff]  ;;  %v181_v54 = vld [vmem:[#allocation2 + $0x90] sm:$0xff]  ;;  %v156_v55 = vsel %vm152_vm1, %v145_v41, %v146_v49  ;;  %v147_v56 = vrot.slane %v5382_v50, 7 }
  0x70   :  { %4635 = vmatmul.mubr.msk.f32.gmra.mxu0 %vm211_vm2, %v159_v31  ;;  %4645 = vmatmul.mubr.msk.f32.gmra.mxu1 %vm211_vm2, %v159_v31  ;;  %v5394_v57 = vld [vmem:[%s6749_s0 + $0x30] sm:$0xff]  ;;  %v751_v58 = vld [vmem:[#allocation2 + $0x168] sm:$0xf]  ;;  %v753_v59 = vld [vmem:[#allocation2 + $0x178] sm:$0xf]  ;;  %s5222_s0 = smov [#allocation16]  }
  0x71   :  { %325 = vmatprep.mubr.f32.mxu0 %v6759_v0  ;;  %438 = vmatprep.mubr.f32.mxu1 %v6759_v0  ;;  %v155_v60 = vsel %vm152_vm1, %v146_v49, %v147_v56  ;;  %v148_v61 = vrot.slane %v5394_v57, 7  ;;  %v750_v1 = vld [vmem:[#allocation2 + $0x160] sm:$0xf]  ;;  %v752_v2 = vld [vmem:[#allocation2 + $0x170] sm:$0xf]  ;;  %v747_v3 = vld [vmem:[#allocation2 + $0x148] sm:$0xff] }
  0x72   :  { %537 = vmatprep.subr.mxu0 %v188_v34  ;;  %650 = vmatprep.subr.mxu1 %v190_v35  ;;  %v749_v4 = vld [vmem:[#allocation2 + $0x158] sm:$0xff]  ;;  %v746_v5 = vld [vmem:[#allocation2 + $0x140] sm:$0xff]  ;;  %v748_v6 = vld [vmem:[#allocation2 + $0x150] sm:$0xff]  ;;  %v167_v27 = vrot.slane %v5394_v57, 1  ;;  %s4619_s17 = sshll.u32 %s5222_s0, 4  ;;  %s4620_s17 = int_to_ptr.vmem [resolvable:$true] %s4619_s17 }
  0x73   :  { %538 = vmatpush1.msra.mxu0 %v187_v38  ;;  %651 = vmatpush1.msra.mxu1 %v189_v39  ;;  %v154_v62 = vsel %vm152_vm1, %v147_v56, %v148_v61  ;;  %v153_v63 = vsel %vm152_vm1, %v148_v61, %v149_v22  ;;  %v743_v7 = vld [vmem:[#allocation2 + $0x128] sm:$0xff]  ;;  %v745_v9 = vld [vmem:[#allocation2 + $0x138] sm:$0xff]  ;;  %v742_v10 = vld [vmem:[#allocation2 + $0x120] sm:$0xff]  ;;  %v164_v22 = vrot.slane %v5345_v33, 1  ;;  %s5175_s18 = scalar_lea.vmem %s4620_s17, 32  ;;  %p5180_p13 = scmp.lt.s32.totalorder %s4620_s17, %s4620_s17 }
  0x74   :  { %4636 = vmatmul.mubr.msk.f32.gmra.mxu0 %vm211_vm2, %v158_v40  ;;  %4646 = vmatmul.mubr.msk.f32.gmra.mxu1 %vm211_vm2, %v158_v40  ;;  %v744_v11 = vld [vmem:[#allocation2 + $0x130] sm:$0xff]  ;;  %v739_v12 = vld [vmem:[#allocation2 + $0x108] sm:$0xff]  ;;  %v741_v13 = vld [vmem:[#allocation2 + $0x118] sm:$0xff]  ;;  %v170_v29 = vsel %vm169_vm3, %v167_v27, %v168_v37  ;;  %p5176_p12 = scmp.ne.s32.totalorder %s4620_s17, %s5175_s18  ;;  %p5181_p0 = scmp.lt.s32.totalorder %s5175_s18, %s5175_s18 }
  0x75   :  { %331 = vmatprep.mubr.f32.mxu0 %v6759_v0  ;;  %444 = vmatprep.mubr.f32.mxu1 %v6759_v0  ;;  %v738_v14 = vld [vmem:[#allocation2 + $0x100] sm:$0xff]  ;;  %v740_v15 = vld [vmem:[#allocation2 + $0x110] sm:$0xff]  ;;  %v173_v24 = vsel %vm169_vm3, %v164_v22, %v165_v23 }
  0x76   :  { %539 = vmatprep.subr.mxu0 %v184_v44  ;;  %652 = vmatprep.subr.mxu1 %v186_v45  ;;  %v2509_v31 = vld [vmem:[#allocation7 + $0x1f8] sm:$0xff]  ;;  %v2508_v32 = vld [vmem:[#allocation7 + $0x1f0] sm:$0xff]  ;;  %v2502_v35 = vld [vmem:[#allocation7 + $0x1c0] sm:$0xff]  ;;  %p5182_p1 = por %p5181_p0, %p5180_p13 }
  0x77   :  { %540 = vmatpush1.msra.mxu0 %v183_v46  ;;  %653 = vmatpush1.msra.mxu1 %v185_v47  ;;  %v2505_v34 = vld [vmem:[#allocation7 + $0x1d8] sm:$0xff]  ;;  %v2504_v36 = vld [vmem:[#allocation7 + $0x1d0] sm:$0xff]  ;;  %v2499_v37 = vld [vmem:[#allocation7 + $0x1a8] sm:$0xff] }
  0x78   :  { %4637 = vmatmul.mubr.msk.f32.gmra.mxu0 %vm211_vm2, %v157_v48  ;;  %4647 = vmatmul.mubr.msk.f32.gmra.mxu1 %vm211_vm2, %v157_v48  ;;  %v2501_v38 = vld [vmem:[#allocation7 + $0x1b8] sm:$0xff]  ;;  %v2498_v39 = vld [vmem:[#allocation7 + $0x1a0] sm:$0xff]  ;;  %v2500_v40 = vld [vmem:[#allocation7 + $0x1b0] sm:$0xff]  ;;  %p5183_p2 = pnand %p5182_p1, %p5176_p12 }
  0x79   :  { %337 = vmatprep.mubr.f32.mxu0 %v6759_v0  ;;  %450 = vmatprep.mubr.f32.mxu1 %v6759_v0  ;;  %v2495_v41 = vld [vmem:[#allocation7 + $0x188] sm:$0xff]  ;;  %v2496_v44 = vld [vmem:[#allocation7 + $0x190] sm:$0xff]  ;;  %v2493_v46 = vld [vmem:[#allocation7 + $0x178] sm:$0xff] }
  0x7a   :  { %541 = vmatprep.subr.mxu0 %v180_v51  ;;  %654 = vmatprep.subr.mxu1 %v182_v52  ;;  %v2491_v45 = vld [vmem:[#allocation7 + $0x168] sm:$0xff]  ;;  %v2490_v47 = vld [vmem:[#allocation7 + $0x160] sm:$0xff]  ;;  %v2492_v48 = vld [vmem:[#allocation7 + $0x170] sm:$0xff] }
  0x7b   :  { %542 = vmatpush1.msra.mxu0 %v179_v53  ;;  %655 = vmatpush1.msra.mxu1 %v181_v54  ;;  %v2487_v51 = vld [vmem:[#allocation7 + $0x148] sm:$0xff]  ;;  %v2489_v52 = vld [vmem:[#allocation7 + $0x158] sm:$0xff]  ;;  %v2486_v53 = vld [vmem:[#allocation7 + $0x140] sm:$0xff] }
  0x7c   :  { %4638 = vmatmul.mubr.msk.f32.gmra.mxu0 %vm211_vm2, %v156_v55  ;;  %4648 = vmatmul.mubr.msk.f32.gmra.mxu1 %vm211_vm2, %v156_v55  ;;  %v2488_v54 = vld [vmem:[#allocation7 + $0x150] sm:$0xff]  ;;  %v2481_v16 = vld [vmem:[#allocation7 + $0x118] sm:$0xff] }
  0x7d   :  { %343 = vmatprep.mubr.f32.mxu0 %v6759_v0  ;;  %456 = vmatprep.mubr.f32.mxu1 %v6759_v0 }
  0x7e   :  { %4672 = vmatprep.subr.msk.mxu0 %vm236_vm0, %v751_v58  ;;  %4682 = vmatprep.subr.msk.mxu1 %vm236_vm0, %v753_v59  ;;  %v2485_v58 = vld [vmem:[#allocation7 + $0x138] sm:$0xff] }
  0x80   :  { %4639 = vmatmul.mubr.msk.f32.gmra.mxu0 %vm211_vm2, %v155_v60  ;;  %4649 = vmatmul.mubr.msk.f32.gmra.mxu1 %vm211_vm2, %v155_v60 }
  0x81   :  { %349 = vmatprep.mubr.f32.mxu0 %v6759_v0  ;;  %462 = vmatprep.mubr.f32.mxu1 %v6759_v0 }
  0x84   :  { %4640 = vmatmul.mubr.msk.f32.gmra.mxu0 %vm211_vm2, %v154_v62  ;;  %4650 = vmatmul.mubr.msk.f32.gmra.mxu1 %vm211_vm2, %v154_v62 }
  0x85   :  { %355 = vmatprep.mubr.f32.mxu0 %v6759_v0  ;;  %468 = vmatprep.mubr.f32.mxu1 %v6759_v0 }
  0x88   :  { %4641 = vmatmul.mubr.msk.f32.gmra.mxu0 %vm211_vm2, %v153_v63  ;;  %4651 = vmatmul.mubr.msk.f32.gmra.mxu1 %vm211_vm2, %v153_v63 }
  0x89   :  { %575 = vmatprep.mubr.f32.mxu0 %v6759_v0  ;;  %688 = vmatprep.mubr.f32.mxu1 %v6759_v0 }
  0x8c   :  { %4654 = vmatmul.mubr.msk.f32.vlgmr.msra.gmra.mxu0 %vm211_vm2, %v5308_v19  ;;  %4664 = vmatmul.mubr.msk.f32.vlgmr.msra.gmra.mxu1 %vm211_vm2, %v5308_v19  ;;  %v174_v19 = vsel %vm169_vm3, %v163_v18, %v164_v22  ;;  %v2480_v22 = vld [vmem:[#allocation7 + $0x110] sm:$0xff] }
  0x8d   :  { %4673 = vmatpush1.msk.msra.mxu0 %vm236_vm0, %v750_v1  ;;  %4683 = vmatpush1.msk.msra.mxu1 %vm236_vm0, %v752_v2 }
  0x8e   :  { %581 = vmatprep.mubr.f32.mxu0 %v6759_v0  ;;  %694 = vmatprep.mubr.f32.mxu1 %v6759_v0 }
  0x8f   :  { %816 = vmatprep.subr.mxu0 %v747_v3  ;;  %929 = vmatprep.subr.mxu1 %v749_v4 }
  0x90   :  { %4655 = vmatmul.mubr.msk.f32.gmra.mxu0 %vm211_vm2, %v5321_v25  ;;  %4665 = vmatmul.mubr.msk.f32.gmra.mxu1 %vm211_vm2, %v5321_v25  ;;  %v166_v25 = vrot.slane %v5382_v50, 1 }
  0x91   :  { %587 = vmatprep.mubr.f32.mxu0 %v6759_v0  ;;  %700 = vmatprep.mubr.f32.mxu1 %v6759_v0 }
  0x92   :  { %817 = vmatpush1.msra.mxu0 %v746_v5  ;;  %930 = vmatpush1.msra.mxu1 %v748_v6  ;;  %v172_v26 = vsel %vm169_vm3, %v165_v23, %v166_v25  ;;  %v171_v28 = vsel %vm169_vm3, %v166_v25, %v167_v27  ;;  %v2477_v23 = vld [vmem:[#allocation7 + $0xf8] sm:$0xff] }
  0x93   :  { %818 = vmatprep.subr.mxu0 %v743_v7  ;;  %931 = vmatprep.subr.mxu1 %v745_v9 }
  0x94   :  { %4656 = vmatmul.mubr.msk.f32.gmra.mxu0 %vm211_vm2, %v5331_v30  ;;  %4666 = vmatmul.mubr.msk.f32.gmra.mxu1 %vm211_vm2, %v5331_v30  ;;  %v2507_v30 = vld [vmem:[#allocation7 + $0x1e8] sm:$0xff] }
  0x95   :  { %593 = vmatprep.mubr.f32.mxu0 %v6759_v0  ;;  %706 = vmatprep.mubr.f32.mxu1 %v6759_v0 }
  0x96   :  { %819 = vmatpush1.msra.mxu0 %v742_v10  ;;  %932 = vmatpush1.msra.mxu1 %v744_v11  ;;  %v2482_v11 = vld [vmem:[#allocation7 + $0x120] sm:$0xff] }
  0x97   :  { %820 = vmatprep.subr.mxu0 %v739_v12  ;;  %933 = vmatprep.subr.mxu1 %v741_v13  ;;  %v2484_v12 = vld [vmem:[#allocation7 + $0x130] sm:$0xff] }
  0x98   :  { %4657 = vmatmul.mubr.msk.f32.gmra.mxu0 %vm211_vm2, %v5345_v33  ;;  %4667 = vmatmul.mubr.msk.f32.gmra.mxu1 %vm211_vm2, %v5345_v33  ;;  %v2503_v33 = vld [vmem:[#allocation7 + $0x1c8] sm:$0xff] }
  0x99   :  { %599 = vmatprep.mubr.f32.mxu0 %v6759_v0  ;;  %712 = vmatprep.mubr.f32.mxu1 %v6759_v0 }
  0x9a   :  { %821 = vmatpush1.msra.mxu0 %v738_v14  ;;  %934 = vmatpush1.msra.mxu1 %v740_v15  ;;  %v2479_v15 = vld [vmem:[#allocation7 + $0x108] sm:$0xff] }
  0x9b   :  { %2574 = vmatprep.subr.mxu0 %v2507_v30  ;;  %2663 = vmatprep.subr.mxu1 %v2509_v31 }
  0x9c   :  { %4658 = vmatmul.mubr.msk.f32.gmra.mxu0 %vm211_vm2, %v5370_v43  ;;  %4668 = vmatmul.mubr.msk.f32.gmra.mxu1 %vm211_vm2, %v5370_v43  ;;  %v2494_v43 = vld [vmem:[#allocation7 + $0x180] sm:$0xff] }
  0x9d   :  { %605 = vmatprep.mubr.f32.mxu0 %v6759_v0  ;;  %718 = vmatprep.mubr.f32.mxu1 %v6759_v0 }
  0xa0   :  { %4659 = vmatmul.mubr.msk.f32.gmra.mxu0 %vm211_vm2, %v5382_v50  ;;  %4669 = vmatmul.mubr.msk.f32.gmra.mxu1 %vm211_vm2, %v5382_v50 }
  0xa1   :  { %611 = vmatprep.mubr.f32.mxu0 %v6759_v0  ;;  %724 = vmatprep.mubr.f32.mxu1 %v6759_v0 }
  0xa4   :  { %4660 = vmatmul.mubr.msk.f32.gmra.mxu0 %vm211_vm2, %v5394_v57  ;;  %4670 = vmatmul.mubr.msk.f32.gmra.mxu1 %vm211_vm2, %v5394_v57  ;;  %v2483_v57 = vld [vmem:[#allocation7 + $0x128] sm:$0xff] }
  0xa5   :  { %617 = vmatprep.mubr.f32.mxu0 %v6759_v0  ;;  %730 = vmatprep.mubr.f32.mxu1 %v6759_v0 }
  0xa8   :  { %4661 = vmatmul.mubr.msk.f32.gmra.mxu0 %vm211_vm2, %v5313_v20  ;;  %4671 = vmatmul.mubr.msk.f32.gmra.mxu1 %vm211_vm2, %v5313_v20  ;;  %v2506_v20 = vld [vmem:[#allocation7 + $0x1e0] sm:$0xff] }
  0xa9   :  { %854 = vmatprep.mubr.f32.mxu0 %v6759_v0  ;;  %967 = vmatprep.mubr.f32.mxu1 %v6759_v0 }
  0xac   :  { %4674 = vmatmul.mubr.msk.f32.vlgmr.msra.gmra.mxu0 %vm211_vm2, %v176_v17  ;;  %4684 = vmatmul.mubr.msk.f32.vlgmr.msra.gmra.mxu1 %vm211_vm2, %v176_v17 }
  0xad   :  { %860 = vmatprep.mubr.f32.mxu0 %v6759_v0  ;;  %973 = vmatprep.mubr.f32.mxu1 %v6759_v0 }
  0xae   :  { %2575 = vmatpush1.msra.mxu0 %v2506_v20  ;;  %2664 = vmatpush1.msra.mxu1 %v2508_v32 }
  0xaf   :  { %2576 = vmatprep.subr.mxu0 %v2503_v33  ;;  %2665 = vmatprep.subr.mxu1 %v2505_v34 }
  0xb0   :  { %4675 = vmatmul.mubr.msk.f32.gmra.mxu0 %vm211_vm2, %v175_v21  ;;  %4685 = vmatmul.mubr.msk.f32.gmra.mxu1 %vm211_vm2, %v175_v21  ;;  %v2478_v21 = vld [vmem:[#allocation7 + $0x100] sm:$0xff] }
  0xb1   :  { %866 = vmatprep.mubr.f32.mxu0 %v6759_v0  ;;  %979 = vmatprep.mubr.f32.mxu1 %v6759_v0 }
  0xb2   :  { %2577 = vmatpush1.msra.mxu0 %v2502_v35  ;;  %2666 = vmatpush1.msra.mxu1 %v2504_v36 }
  0xb3   :  { %2578 = vmatprep.subr.mxu0 %v2499_v37  ;;  %2667 = vmatprep.subr.mxu1 %v2501_v38 }
  0xb4   :  { %4676 = vmatmul.mubr.msk.f32.gmra.mxu0 %vm211_vm2, %v174_v19  ;;  %4686 = vmatmul.mubr.msk.f32.gmra.mxu1 %vm211_vm2, %v174_v19  ;;  %v2475_v19 = vld [vmem:[#allocation7 + $0xe8] sm:$0xff] }
  0xb5   :  { %872 = vmatprep.mubr.f32.mxu0 %v6759_v0  ;;  %985 = vmatprep.mubr.f32.mxu1 %v6759_v0 }
  0xb6   :  { %2579 = vmatpush1.msra.mxu0 %v2498_v39  ;;  %2668 = vmatpush1.msra.mxu1 %v2500_v40  ;;  %v2474_v39 = vld [vmem:[#allocation7 + $0xe0] sm:$0xff]  ;;  %v2476_v40 = vld [vmem:[#allocation7 + $0xf0] sm:$0xff] }
  0xb7   :  { %2580 = vmatprep.subr.mxu0 %v2495_v41  ;;  %v2471_v41 = vld [vmem:[#allocation7 + $0xc8] sm:$0xff] }
  0xb8   :  { %4677 = vmatmul.mubr.msk.f32.gmra.mxu0 %vm211_vm2, %v173_v24  ;;  %4687 = vmatmul.mubr.msk.f32.gmra.mxu1 %vm211_vm2, %v173_v24 }
  0xb9   :  { %878 = vmatprep.mubr.f32.mxu0 %v6759_v0  ;;  %991 = vmatprep.mubr.f32.mxu1 %v6759_v0 }
  0xba   :  { %2581 = vmatpush1.msra.mxu0 %v2494_v43 }
  0xbb   :  { %2582 = vmatprep.subr.mxu0 %v2491_v45 }
  0xbc   :  { %4678 = vmatmul.mubr.msk.f32.gmra.mxu0 %vm211_vm2, %v172_v26  ;;  %4688 = vmatmul.mubr.msk.f32.gmra.mxu1 %vm211_vm2, %v172_v26 }
  0xbd   :  { %884 = vmatprep.mubr.f32.mxu0 %v6759_v0  ;;  %997 = vmatprep.mubr.f32.mxu1 %v6759_v0 }
  0xbe   :  { %2583 = vmatpush1.msra.mxu0 %v2490_v47  ;;  %v2470_v47 = vld [vmem:[#allocation7 + $0xc0] sm:$0xff] }
  0xbf   :  { %2584 = vmatprep.subr.mxu0 %v2487_v51  ;;  %v2467_v51 = vld [vmem:[#allocation7 + $0xa8] sm:$0xff] }
  0xc0   :  { %4679 = vmatmul.mubr.msk.f32.gmra.mxu0 %vm211_vm2, %v171_v28  ;;  %4689 = vmatmul.mubr.msk.f32.gmra.mxu1 %vm211_vm2, %v171_v28 }
  0xc1   :  { %890 = vmatprep.mubr.f32.mxu0 %v6759_v0  ;;  %1003 = vmatprep.mubr.f32.mxu1 %v6759_v0 }
  0xc2   :  { %2585 = vmatpush1.msra.mxu0 %v2486_v53 }
  0xc3   :  { %2586 = vmatprep.subr.mxu0 %v2483_v57 }
  0xc4   :  { %4680 = vmatmul.mubr.msk.f32.gmra.mxu0 %vm211_vm2, %v170_v29  ;;  %4690 = vmatmul.mubr.msk.f32.gmra.mxu1 %vm211_vm2, %v170_v29 }
  0xc5   :  { %896 = vmatprep.mubr.f32.mxu0 %v6759_v0  ;;  %1009 = vmatprep.mubr.f32.mxu1 %v6759_v0  ;;  %v1048_v0 = vld [vmem:[#allocation5] sm:$0xf] }
  0xc6   :  { %2587 = vmatpush1.msra.mxu0 %v2482_v11 }
  0xc7   :  { %2588 = vmatprep.subr.mxu0 %v2479_v15 }
  0xc8   :  { %4681 = vmatmul.mubr.msk.f32.gmra.mxu0 %vm211_vm2, %v5365_v42  ;;  %4691 = vmatmul.mubr.msk.f32.gmra.mxu1 %vm211_vm2, %v5365_v42  ;;  %v2497_v42 = vld [vmem:[#allocation7 + $0x198] sm:$0xff] }
  0xc9   :  { %2669 = vmatprep.subr.mxu1 %v2497_v42  ;;  %2589 = vmatpush1.msra.mxu0 %v2478_v21  ;;  %v2473_v42 = vld [vmem:[#allocation7 + $0xd8] sm:$0xff] }
  0xca   :  { %2670 = vmatpush1.msra.mxu1 %v2496_v44  ;;  %2590 = vmatprep.subr.mxu0 %v2475_v19 }
  0xcb   :  { %2671 = vmatprep.subr.mxu1 %v2493_v46  ;;  %2591 = vmatpush1.msra.mxu0 %v2474_v39  ;;  %v5220_v39 = vmov 1983009808  }
  0xcc   :  { %2672 = vmatpush1.msra.mxu1 %v2492_v48  ;;  %2592 = vmatprep.subr.mxu0 %v2471_v41  ;;  %v2472_v48 = vld [vmem:[#allocation7 + $0xd0] sm:$0xff] }
  0xcd   :  { %2673 = vmatprep.subr.mxu1 %v2489_v52  ;;  %2593 = vmatpush1.msra.mxu0 %v2470_v47  ;;  %v2469_v52 = vld [vmem:[#allocation7 + $0xb8] sm:$0xff]  ;;  %v6761_v47 = vsub.s32 0, %v5301_v8 }
  0xce   :  { %2674 = vmatpush1.msra.mxu1 %v2488_v54  ;;  %2594 = vmatprep.subr.mxu0 %v2467_v51 }
  0xcf   :  { %2675 = vmatprep.subr.mxu1 %v2485_v58 }
  0xd0   :  { %2676 = vmatpush1.msra.mxu1 %v2484_v12 }
  0xd1   :  { %2677 = vmatprep.subr.mxu1 %v2481_v16 }
  0xd2   :  { %2678 = vmatpush1.msra.mxu1 %v2480_v22 }
  0xd3   :  { %2679 = vmatprep.subr.mxu1 %v2477_v23 }
  0xd4   :  { %2680 = vmatpush1.msra.mxu1 %v2476_v40  ;;  %v1169_v40 = vunpack.c.l.s4 %v5220_v39 }
  0xd5   :  { %2681 = vmatprep.subr.mxu1 %v2473_v42 }
  0xd6   :  { %2682 = vmatpush1.msra.mxu1 %v2472_v48  ;;  %v6762_v48 = vsub.s32 2, %v5301_v8 }
  0xd7   :  { %2683 = vmatprep.subr.mxu1 %v2469_v52 }
 0x12c   :  { %v5529_v49 = vpop.f32.mrf.mxu0  ;;  %v5531_v50 = vpop.f32.mrf.mxu1 }
 0x12e   :  { %v5533_v55 = vpop.f32.mrf.mxu0  ;;  %v5535_v56 = vpop.f32.mrf.mxu1 }
 0x130   :  { %v5537_v59 = vpop.f32.mrf.mxu0  ;;  %v5539_v60 = vpop.f32.mrf.mxu1 }
 0x132   :  { %v5541_v61 = vpop.f32.mrf.mxu0  ;;  %v5543_v62 = vpop.f32.mrf.mxu1 }
 0x134   :  { %v5545_v63 = vpop.f32.mrf.mxu0  ;;  %v5547_v1 = vpop.f32.mrf.mxu1 }
 0x136   :  { %v5549_v2 = vpop.f32.mrf.mxu0  ;;  %v5551_v3 = vpop.f32.mrf.mxu1 }
 0x138   :  { %v5553_v4 = vpop.f32.mrf.mxu0  ;;  %v5555_v5 = vpop.f32.mrf.mxu1 }
 0x13a   :  { %v5557_v6 = vpop.f32.mrf.mxu0  ;;  %v5559_v7 = vpop.f32.mrf.mxu1 }
 0x13c   :  { %v5561_v9 = vpop.f32.mrf.mxu0  ;;  %v5563_v10 = vpop.f32.mrf.mxu1 }
 0x13e   :  { %v5565_v13 = vpop.f32.mrf.mxu0  ;;  %v5567_v14 = vpop.f32.mrf.mxu1 }
 0x140   :  { %v5569_v17 = vpop.f32.mrf.mxu0  ;;  %v5571_v18 = vpop.f32.mrf.mxu1 }
 0x142   :  { %v5573_v24 = vpop.f32.mrf.mxu0  ;;  %v5575_v25 = vpop.f32.mrf.mxu1 }
 0x144   :  { %v5577_v26 = vpop.f32.mrf.mxu0  ;;  %v5579_v27 = vpop.f32.mrf.mxu1 }
 0x145   :  { %6779 = vst [vmem:[#allocation24_spill] sm:$0xff] %v5577_v26  ;;  %6780 = vst [vmem:[#allocation25_spill] sm:$0xff] %v5579_v27  ;;  %v2466_v27 = vld [vmem:[#allocation7 + $0xa0] sm:$0xff]  ;;  %v2465_v26 = vld [vmem:[#allocation7 + $0x98] sm:$0xff] }
 0x146   :  { %v5581_v28 = vpop.f32.mrf.mxu0  ;;  %v5583_v29 = vpop.f32.mrf.mxu1  ;;  %2595 = vmatpush1.msra.mxu0 %v2466_v27 }
 0x147   :  { %6781 = vst [vmem:[#allocation26_spill] sm:$0xff] %v5581_v28  ;;  %6782 = vst [vmem:[#allocation27_spill] sm:$0xff] %v5583_v29  ;;  %v5653_v29 = vrot.slane %v1048_v0, %v6761_v47  ;;  %v5657_v28 = vrot.slane %v1048_v0, %v6762_v48  ;;  %v2463_v48 = vld [vmem:[#allocation7 + $0x88] sm:$0xff] }
 0x148   :  { %v5585_v30 = vpop.f32.mrf.mxu0  ;;  %v5587_v31 = vpop.f32.mrf.mxu1  ;;  %2596 = vmatprep.subr.mxu0 %v2463_v48 }
 0x149   :  { %6783 = vst [vmem:[#allocation28_spill] sm:$0xff] %v5585_v30  ;;  %6784 = vst [vmem:[#allocation29_spill] sm:$0xff] %v5587_v31  ;;  %v1170_v31 = vunpack.c.0.s8 %v1169_v40  ;;  %v6793_v40 = vsub.s32 1, %v5301_v8 }
 0x14a   :  { %v5589_v20 = vpop.f32.mrf.mxu0  ;;  %v5591_v32 = vpop.f32.mrf.mxu1 }
 0x14b   :  { %6785 = vst [vmem:[#allocation30_spill] sm:$0xff] %v5589_v20  ;;  %6786 = vst [vmem:[#allocation31_spill] sm:$0xff] %v5591_v32  ;;  %v5665_v20 = vrot.slane %v1048_v0, %v6793_v40  ;;  %v5672_v47 = vsub.s32 %v1170_v31, %v5301_v8 }
 0x14c   :  { %v5593_v33 = vpop.f32.mrf.mxu0  ;;  %v5595_v34 = vpop.f32.mrf.mxu1 }
 0x14d   :  { %6795 = vst [vmem:[#allocation38_spill] sm:$0xff] %v5672_v47 }
 0x14e   :  { %v5597_v35 = vpop.f32.mrf.mxu0  ;;  %v5599_v36 = vpop.f32.mrf.mxu1 }
 0x14f   :  { %v580_v40 = vadd.f32 %v5597_v35, %v5533_v55  ;;  %v693_v31 = vadd.f32 %v5599_v36, %v5535_v56  ;;  %v2461_v55 = vld [vmem:[#allocation7 + $0x78] sm:$0xff] }
 0x150   :  { %v5601_v37 = vpop.f32.mrf.mxu0  ;;  %v5603_v38 = vpop.f32.mrf.mxu1 }
 0x151   :  { %v584_v27 = vadd.f32 %v5601_v37, %v5537_v59 }
 0x152   :  { %v5605_v43 = vpop.f32.mrf.mxu0  ;;  %v5607_v44 = vpop.f32.mrf.mxu1 }
 0x153   :  { %v699_v56 = vadd.f32 %v5607_v44, %v5543_v62 }
 0x154   :  { %v5609_v45 = vpop.f32.mrf.mxu0  ;;  %v5611_v46 = vpop.f32.mrf.mxu1 }
 0x155   :  { %v590_v59 = vadd.f32 %v5609_v45, %v5545_v63 }
 0x156   :  { %v5613_v53 = vpop.f32.mrf.mxu0  ;;  %v5615_v54 = vpop.f32.mrf.mxu1 }
 0x157   :  { %v5704_v35 = vadd.f32 %v5615_v54, %v5551_v3 }
 0x158   :  { %v595_v57 = vpop.f32.mrf.mxu0  ;;  %v5617_v58 = vpop.f32.mrf.mxu1 }
 0x159   :  { %v5711_v63 = vadd.f32 %v5617_v58, %v5555_v5 }
 0x15a   :  { %v5619_v11 = vpop.f32.mrf.mxu0  ;;  %v5621_v12 = vpop.f32.mrf.mxu1 }
 0x15c   :  { %v5623_v15 = vpop.f32.mrf.mxu0  ;;  %v5625_v16 = vpop.f32.mrf.mxu1 }
 0x15d   :  { %v5723_v3 = vadd.f32 %v5623_v15, %v5561_v9 }
 0x15e   :  { %v5627_v21 = vpop.f32.mrf.mxu0  ;;  %v5629_v22 = vpop.f32.mrf.mxu1 }
 0x15f   :  { %v5731_v5 = vadd.f32 %v5627_v21, %v5565_v13  ;;  %v5737_v9 = vadd.f32 %v5629_v22, %v5567_v14 }
 0x160   :  { %v5631_v19 = vpop.f32.mrf.mxu0  ;;  %v5633_v23 = vpop.f32.mrf.mxu1 }
 0x161   :  { %v5745_v13 = vadd.f32 %v5633_v23, %v5571_v18 }
 0x162   :  { %v5635_v41 = vpop.f32.mrf.mxu0  ;;  %v5637_v42 = vpop.f32.mrf.mxu1 }
 0x164   :  { %v5641_v51 = vpop.f32.mrf.mxu0  ;;  %v5643_v52 = vpop.f32.mrf.mxu1 }
 0x165   :  { %6787 = vst [vmem:[#allocation32_spill] sm:$0xff] %v5641_v51  ;;  %6788 = vst [vmem:[#allocation33_spill] sm:$0xff] %v5643_v52  ;;  %v2468_v52 = vld [vmem:[#allocation7 + $0xb0] sm:$0xff] }
 0x166   :  { %v5647_v30 = vpop.f32.mrf.mxu0  ;;  %v5649_v39 = vpop.f32.mrf.mxu1  ;;  %2684 = vmatpush1.msra.mxu1 %v2468_v52  ;;  %v697_v52 = vadd.f32 %v5603_v38, %v5539_v60  ;;  %v703_v60 = vadd.f32 %v5611_v46, %v5547_v1  ;;  %v5715_v1 = vadd.f32 %v5619_v11, %v5557_v6  ;;  %v5719_v38 = vadd.f32 %v5621_v12, %v5559_v7  ;;  %v6796_v12 = vld [vmem:[#allocation24_spill] sm:$0xff] }
 0x167   :  { %6789 = vst [vmem:[#allocation34_spill] sm:$0xff] %v5647_v30  ;;  %6790 = vst [vmem:[#allocation35_spill] sm:$0xff] %v5649_v39  ;;  %v6794_v39 = vsub.s32 3, %v5301_v8  ;;  %2685 = vmatprep.subr.mxu1 %v2465_v26  ;;  %v586_v26 = vadd.f32 %v5605_v43, %v5541_v61  ;;  %v5707_v61 = vadd.f32 %v595_v57, %v5553_v4 }
 0x168   :  { %v5659_v51 = vpop.f32.mrf.mxu0  ;;  %v5661_v32 = vpop.f32.mrf.mxu1  ;;  %v5727_v4 = vadd.f32 %v5625_v16, %v5563_v10  ;;  %v5741_v10 = vadd.f32 %v5631_v19, %v5569_v17  ;;  %v5749_v46 = vadd.f32 %v5635_v41, %v5573_v24  ;;  %v5755_v17 = vadd.f32 %v5637_v42, %v5575_v25 }
 0x169   :  { %6791 = vst [vmem:[#allocation36_spill] sm:$0xff] %v5659_v51  ;;  %6792 = vst [vmem:[#allocation37_spill] sm:$0xff] %v5661_v32  ;;  %v5669_v30 = vrot.slane %v1048_v0, %v6794_v39  ;;  %v578_v51 = vadd.f32 %v5593_v33, %v5529_v49  ;;  %v691_v32 = vadd.f32 %v5595_v34, %v5531_v50  ;;  %v2462_v0 = vld [vmem:[#allocation7 + $0x80] sm:$0xff]  ;;  %v2464_v39 = vld [vmem:[#allocation7 + $0x90] sm:$0xff] }
 0x16a   :  { %v5686_v49 = vpop.f32.mrf.mxu0  ;;  %v5688_v33 = vpop.f32.mrf.mxu1  ;;  %2597 = vmatpush1.msra.mxu0 %v2462_v0  ;;  %2686 = vmatpush1.msra.mxu1 %v2464_v39  ;;  %v2459_v50 = vld [vmem:[#allocation7 + $0x68] sm:$0xff]  ;;  %v5700_v34 = vadd.f32 %v5613_v53, %v5549_v2 }
 0x16b   :  { %2598 = vmatprep.subr.mxu0 %v2459_v50  ;;  %2687 = vmatprep.subr.mxu1 %v2461_v55 }
 0x16c   :  { %v856_v62 = vpop.f32.mrf.mxu0  ;;  %v969_v36 = vpop.f32.mrf.mxu1  ;;  %v6797_v15 = vld [vmem:[#allocation32_spill] sm:$0xff] }
 0x16d   :  { %v1016_v37 = vadd.f32 %v856_v62, %v578_v51  ;;  %v1018_v2 = vadd.f32 %v969_v36, %v691_v32  ;;  %v5759_v18 = vadd.f32 %v6797_v15, %v6796_v12  ;;  %v6798_v51 = vld [vmem:[#allocation25_spill] sm:$0xff]  ;;  %v6800_v36 = vld [vmem:[#allocation26_spill] sm:$0xff] }
 0x16e   :  { %v858_v6 = vpop.f32.mrf.mxu0  ;;  %v971_v43 = vpop.f32.mrf.mxu1 }
 0x16f   :  { %v1070_v32 = vadd.f32 %v5653_v29, %v1016_v37  ;;  %v1072_v44 = vadd.f32 %v5657_v28, %v1018_v2  ;;  %v1017_v7 = vadd.f32 %v858_v6, %v580_v40  ;;  %v1019_v45 = vadd.f32 %v971_v43, %v693_v31  ;;  %v6799_v40 = vld [vmem:[#allocation33_spill] sm:$0xff]  ;;  %v6801_v37 = vld [vmem:[#allocation34_spill] sm:$0xff] }
 0x170   :  { %v862_v53 = vpop.f32.mrf.mxu0  ;;  %v975_v54 = vpop.f32.mrf.mxu1  ;;  %v5763_v0 = vadd.f32 %v6799_v40, %v6798_v51  ;;  %v5770_v2 = vadd.f32 %v6801_v37, %v6800_v36  ;;  %v6805_v12 = vld [vmem:[#allocation36_spill] sm:$0xff]  ;;  %v6809_v51 = vld [vmem:[#allocation30_spill] sm:$0xff] }
 0x171   :  { %v1102_v57 = vmax.f32 %v1070_v32, 0.0  ;;  %v1104_v58 = vmax.f32 %v1072_v44, 0.0  ;;  %v1071_v11 = vadd.f32 %v5665_v20, %v1017_v7  ;;  %v1073_v14 = vadd.f32 %v5669_v30, %v1019_v45  ;;  %v6802_v45 = vld [vmem:[#allocation27_spill] sm:$0xff]  ;;  %v2453_v37 = vld [vmem:[#allocation7 + $0x38] sm:$0xff] }
 0x172   :  { %v1020_v16 = vadd.f32 %v862_v53, %v584_v27  ;;  %v1022_v21 = vadd.f32 %v975_v54, %v697_v52  ;;  %v864_v24 = vpop.f32.mrf.mxu0  ;;  %v977_v22 = vpop.f32.mrf.mxu1  ;;  %v6803_v53 = vld [vmem:[#allocation35_spill] sm:$0xff]  ;;  %v5793_v40 = vadd.f32 %v5686_v49, %v6809_v51 }
 0x173   :  { %v1134_v19 = vmax.f32 %v1102_v57, %v1104_v58  ;;  %v1103_v23 = vmax.f32 %v1071_v11, 0.0  ;;  %v1105_v41 = vmax.f32 %v1073_v14, 0.0  ;;  %v1021_v48 = vadd.f32 %v864_v24, %v586_v26  ;;  %v2458_v58 = vld [vmem:[#allocation7 + $0x60] sm:$0xff]  ;;  %v2460_v11 = vld [vmem:[#allocation7 + $0x70] sm:$0xff]  ;;  %v2451_v36 = vld [vmem:[#allocation7 + $0x28] sm:$0xff] }
 0x174   :  { %v1074_v25 = vadd.f32 %v5653_v29, %v1020_v16  ;;  %v1076_v42 = vadd.f32 %v5657_v28, %v1022_v21  ;;  %v1023_v39 = vadd.f32 %v977_v22, %v699_v56  ;;  %v868_v31 = vpop.f32.mrf.mxu0  ;;  %v981_v50 = vpop.f32.mrf.mxu1  ;;  %v5776_v54 = vadd.f32 %v6803_v53, %v6802_v45  ;;  %v6804_v14 = vld [vmem:[#allocation28_spill] sm:$0xff]  ;;  %2599 = vmatpush1.msra.mxu0 %v2458_v58  ;;  %v2455_v22 = vld [vmem:[#allocation7 + $0x48] sm:$0xff] }
 0x175   :  { %v1135_v27 = vmax.f32 %v1103_v23, %v1105_v41  ;;  %v1075_v52 = vadd.f32 %v5665_v20, %v1021_v48  ;;  %v1024_v55 = vadd.f32 %v868_v31, %v590_v59  ;;  %v1026_v62 = vadd.f32 %v981_v50, %v703_v60  ;;  %2688 = vmatpush1.msra.mxu1 %v2460_v11  ;;  %v6806_v23 = vld [vmem:[#allocation29_spill] sm:$0xff]  ;;  %v2456_v31 = vld [vmem:[#allocation7 + $0x50] sm:$0xff]  ;;  %v2447_v53 = vld [vmem:[#allocation7 + $0x8] sm:$0xff] }
 0x176   :  { %v1106_v26 = vmax.f32 %v1074_v25, 0.0  ;;  %v1108_v6 = vmax.f32 %v1076_v42, 0.0  ;;  %v1077_v43 = vadd.f32 %v5669_v30, %v1023_v39  ;;  %v5783_v15 = vadd.f32 %v6805_v12, %v6804_v14  ;;  %v6807_v41 = vld [vmem:[#allocation37_spill] sm:$0xff]  ;;  %6810 = vst [vmem:[#allocation32_spill] sm:$0xff] %v5793_v40  ;;  %2600 = vmatprep.subr.mxu0 %v2455_v22 }
 0x177   :  { %v1166_v32 = vcombine.low %v1134_v19, %v1135_v27  ;;  %v1167_v44 = vcombine.high %v1134_v19, %v1135_v27  ;;  %v1107_v7 = vmax.f32 %v1075_v52, 0.0  ;;  %v1078_v56 = vadd.f32 %v5653_v29, %v1024_v55  ;;  %v2457_v19 = vld [vmem:[#allocation7 + $0x58] sm:$0xff]  ;;  %v2454_v39 = vld [vmem:[#allocation7 + $0x40] sm:$0xff] }
 0x178   :  { %v5778_v57 = vmax.f32 %v1106_v26, %v1108_v6  ;;  %v1109_v59 = vmax.f32 %v1077_v43, 0.0  ;;  %v1080_v60 = vadd.f32 %v5657_v28, %v1026_v62  ;;  %v5789_v48 = vadd.f32 %v6807_v41, %v6806_v23  ;;  %2689 = vmatprep.subr.mxu1 %v2457_v19  ;;  %v870_v62 = vpop.f32.mrf.mxu0  ;;  %2601 = vmatpush1.msra.mxu0 %v2454_v39  ;;  %v2450_v43 = vld [vmem:[#allocation7 + $0x20] sm:$0xff]  ;;  %v2571_v23 = vld [vmem:[#allocation7 + $0x3e8] sm:$0xff]  ;;  %v2573_v41 = vld [vmem:[#allocation7 + $0x3f8] sm:$0xff] }
 0x179   :  { %v1174_v16 = vrot.slane %v1166_v32, %v5672_v47  ;;  %v1181_v21 = vrot.slane %v1167_v44, %v5672_v47  ;;  %v1110_v24 = vmax.f32 %v1078_v56, 0.0  ;;  %2690 = vmatpush1.msra.mxu1 %v2456_v31  ;;  %2602 = vmatprep.subr.mxu0 %v2451_v36  ;;  %v2452_v32 = vld [vmem:[#allocation7 + $0x30] sm:$0xff]  ;;  %v5813_v14 = vadd.f32 %v870_v62, %v5700_v34  ;;  %v2446_v12 = vld [vmem:[#allocation7] sm:$0xff]  ;;  %v2567_v36 = vld [vmem:[#allocation7 + $0x3c8] sm:$0xff] }
 0x17a   :  { %6808 = vst [vmem:[#allocation24_spill] sm:$0xff] %v5789_v48  ;;  %v5795_v25 = vmax.f32 %v1107_v7, %v1109_v59  ;;  %v1112_v42 = vmax.f32 %v1080_v60, 0.0  ;;  %2691 = vmatprep.subr.mxu1 %v2453_v37  ;;  %v2449_v59 = vld [vmem:[#allocation7 + $0x18] sm:$0xff]  ;;  %2603 = vmatpush1.msra.mxu0 %v2450_v43  ;;  %v2570_v31 = vld [vmem:[#allocation7 + $0x3e0] sm:$0xff] }
 0x17b   :  { %v1182_v50 = vcombine.high %v1174_v16, %v1174_v16  ;;  %v1183_v27 = vcombine.high %v1181_v21, %v1181_v21  ;;  %v1316_v52 = vrot.slane %v1174_v16, %v5672_v47  ;;  %v1332_v55 = vrot.slane %v1181_v21, %v5672_v47  ;;  %2692 = vmatpush1.msra.mxu1 %v2452_v32  ;;  %v2448_v16 = vld [vmem:[#allocation7 + $0x10] sm:$0xff]  ;;  %v2569_v37 = vld [vmem:[#allocation7 + $0x3d8] sm:$0xff] }
 0x17c   :  { %v1184_v49 = vcombine.low %v5778_v57, %v5795_v25  ;;  %v1185_v26 = vcombine.high %v5778_v57, %v5795_v25  ;;  %v5803_v6 = vmax.f32 %v1110_v24, %v1112_v42  ;;  %2604 = vmatprep.subr.mxu0 %v2447_v53  ;;  %2693 = vmatprep.subr.mxu1 %v2449_v59 }
 0x17d   :  { %v1317_v44 = vcombine.high %v1316_v52, %v1316_v52  ;;  %v1324_v7 = vrot.slane %v1182_v50, %v5672_v47  ;;  %v1333_v56 = vcombine.high %v1332_v55, %v1332_v55  ;;  %v1340_v45 = vrot.slane %v1183_v27, %v5672_v47  ;;  %2605 = vmatpush1.msra.mxu0 %v2446_v12  ;;  %v2572_v50 = vld [vmem:[#allocation7 + $0x3f0] sm:$0xff] }
 0x17e   :  { %v1631_v60 = vsel %vm1630_vm4, %v1316_v52, -inf  ;;  %v1659_v58 = vsel %vm1630_vm4, %v1332_v55, -inf  ;;  %v5810_v11 = vrot.slane %v1184_v49, %v5672_v47  ;;  %2694 = vmatpush1.msra.mxu1 %v2448_v16  ;;  %2606 = vmatprep.subr.mxu0 %v2571_v23  ;;  %v2563_v16 = vld [vmem:[#allocation7 + $0x3a8] sm:$0xff] }
 0x17f   :  { %v1325_v21 = vcombine.high %v1324_v7, %v1324_v7  ;;  %v1341_v24 = vcombine.high %v1340_v45, %v1340_v45  ;;  %v1632_v22 = vrot.slane %v1631_v60, 4  ;;  %v1638_v19 = vsel %vm1630_vm4, %v1317_v44, -inf  ;;  %2695 = vmatprep.subr.mxu1 %v2573_v41  ;;  %2607 = vmatpush2.msra.mxu0 %v2570_v31  ;;  %v2564_v41 = vld [vmem:[#allocation7 + $0x3b0] sm:$0xff] }
 0x180   :  { %v1639_v51 = vrot.slane %v1638_v19, 4  ;;  %v1645_v42 = vsel %vm1630_vm4, %v1324_v7, -inf  ;;  %v1660_v39 = vrot.slane %v1659_v58, 4  ;;  %v1666_v34 = vsel %vm1630_vm4, %v1333_v56, -inf  ;;  %2696 = vmatpush2.msra.mxu1 %v2572_v50  ;;  %v2566_v7 = vld [vmem:[#allocation7 + $0x3c0] sm:$0xff]  ;;  %v2568_v56 = vld [vmem:[#allocation7 + $0x3d0] sm:$0xff]  ;;  %2608 = vmatprep.subr.mxu0 %v2567_v36 }
 0x181   :  { %v1633_v27 = vmax.f32 %v1631_v60, %v1632_v22  ;;  %v1646_v52 = vrot.slane %v1645_v42, 4  ;;  %v1652_v55 = vsel %vm1630_vm4, %v1325_v21, -inf  ;;  %v1667_v62 = vrot.slane %v1666_v34, 4  ;;  %2697 = vmatprep.subr.mxu1 %v2569_v37  ;;  %v2565_v21 = vld [vmem:[#allocation7 + $0x3b8] sm:$0xff]  ;;  %2609 = vmatpush2.msra.mxu0 %v2566_v7  ;;  %v983_v37 = vpop.f32.mrf.mxu1 }
 0x182   :  { %v1640_v49 = vmax.f32 %v1638_v19, %v1639_v51  ;;  %v1653_v43 = vrot.slane %v1652_v55, 4  ;;  %v1661_v32 = vmax.f32 %v1659_v58, %v1660_v39  ;;  %v1673_v44 = vsel %vm1630_vm4, %v1340_v45, -inf  ;;  %2698 = vmatpush2.msra.mxu1 %v2568_v56  ;;  %v2562_v45 = vld [vmem:[#allocation7 + $0x3a0] sm:$0xff]  ;;  %2610 = vmatprep.subr.mxu0 %v2563_v16  ;;  %v2561_v50 = vld [vmem:[#allocation7 + $0x398] sm:$0xff] }
 0x183   :  { %v1634_v53 = vrot.slane %v1633_v27, 2  ;;  %v1647_v59 = vmax.f32 %v1645_v42, %v1646_v52  ;;  %v1668_v60 = vmax.f32 %v1666_v34, %v1667_v62  ;;  %v1674_v12 = vrot.slane %v1673_v44, 4  ;;  %2699 = vmatprep.subr.mxu1 %v2565_v21  ;;  %v2559_v34 = vld [vmem:[#allocation7 + $0x388] sm:$0xff]  ;;  %2611 = vmatpush2.msra.mxu0 %v2562_v45  ;;  %v2557_v16 = vld [vmem:[#allocation7 + $0x378] sm:$0xff]  ;;  %v5872_v8 = vpop.f32.mrf.mxu1 }
 0x184   :  { %v1641_v22 = vrot.slane %v1640_v49, 2  ;;  %v1654_v19 = vmax.f32 %v1652_v55, %v1653_v43  ;;  %v1662_v23 = vrot.slane %v1661_v32, 2  ;;  %v1680_v58 = vsel %vm1630_vm4, %v1341_v24, -inf  ;;  %2700 = vmatpush2.msra.mxu1 %v2564_v41  ;;  %v2558_v24 = vld [vmem:[#allocation7 + $0x380] sm:$0xff]  ;;  %v2560_v43 = vld [vmem:[#allocation7 + $0x390] sm:$0xff]  ;;  %2612 = vmatprep.subr.mxu0 %v2559_v34 }
 0x185   :  { %v1635_v51 = vmax.f32 %v1633_v27, %v1634_v53  ;;  %v1648_v39 = vrot.slane %v1647_v59, 2  ;;  %v1669_v31 = vrot.slane %v1668_v60, 2  ;;  %v1675_v42 = vmax.f32 %v1673_v44, %v1674_v12  ;;  %v874_v44 = vpop.f32.mrf.mxu0  ;;  %2701 = vmatprep.subr.mxu1 %v2561_v50  ;;  %v2555_v12 = vld [vmem:[#allocation7 + $0x368] sm:$0xff]  ;;  %2613 = vmatpush2.msra.mxu0 %v2558_v24 }
 0x186   :  { %v5821_v52 = vmax.f32 %v1640_v49, %v1641_v22  ;;  %v1655_v62 = vrot.slane %v1654_v19, 2  ;;  %v1663_v36 = vmax.f32 %v1661_v32, %v1662_v23  ;;  %v1681_v55 = vrot.slane %v1680_v58, 4  ;;  %v6811_v49 = vld [vmem:[#allocation31_spill] sm:$0xff]  ;;  %2702 = vmatpush2.msra.mxu1 %v2560_v43  ;;  %2614 = vmatprep.subr.mxu0 %v2555_v12 }
 0x187   :  { %v1636_v7 = vrot.slane %v1635_v51, 1  ;;  %v1649_v56 = vmax.f32 %v1647_v59, %v1648_v39  ;;  %v5823_v27 = vmax.f32 %v1668_v60, %v1669_v31  ;;  %v1676_v53 = vrot.slane %v1675_v42, 2  ;;  %v2554_v59 = vld [vmem:[#allocation7 + $0x360] sm:$0xff]  ;;  %v2556_v60 = vld [vmem:[#allocation7 + $0x370] sm:$0xff]  ;;  %2703 = vmatprep.subr.mxu1 %v2557_v16  ;;  %v2553_v31 = vld [vmem:[#allocation7 + $0x358] sm:$0xff] }
 0x188   :  { %v5827_v21 = vadd.f32 %v5688_v33, %v6811_v49  ;;  %v1664_v32 = vrot.slane %v1663_v36, 1  ;;  %v1682_v22 = vmax.f32 %v1680_v58, %v1681_v55  ;;  %v1199_v23 = vrot.slane %v1185_v26, %v5672_v47  ;;  %v2551_v58 = vld [vmem:[#allocation7 + $0x348] sm:$0xff]  ;;  %2615 = vmatpush2.msra.mxu0 %v2554_v59  ;;  %2704 = vmatpush2.msra.mxu1 %v2556_v60  ;;  %v2542_v60 = vld [vmem:[#allocation7 + $0x300] sm:$0xff] }
 0x189   :  { %v1650_v45 = vrot.slane %v1649_v56, 1  ;;  %v5833_v41 = vmax.f32 %v1654_v19, %v1655_v62  ;;  %v5837_v39 = vadd.f32 %v5665_v20, %v5813_v14  ;;  %v5840_v33 = vadd.f32 %v983_v37, %v5704_v35  ;;  %v2550_v19 = vld [vmem:[#allocation7 + $0x340] sm:$0xff]  ;;  %v2552_v14 = vld [vmem:[#allocation7 + $0x350] sm:$0xff]  ;;  %2616 = vmatprep.subr.mxu0 %v2551_v58  ;;  %2705 = vmatprep.subr.mxu1 %v2553_v31  ;;  %v2547_v37 = vld [vmem:[#allocation7 + $0x328] sm:$0xff] }
 0x18a   :  { %6812 = vst [vmem:[#allocation25_spill] sm:$0xff] %v5827_v21  ;;  %v5843_v25 = vmax.f32 %v1675_v42, %v1676_v53  ;;  %v1683_v26 = vrot.slane %v1682_v22, 2  ;;  %v5846_v34 = vadd.f32 %v874_v44, %v5707_v61  ;;  %v1637_v50 = vmax.f32 %v1635_v51, %v1636_v7  ;;  %v2549_v42 = vld [vmem:[#allocation7 + $0x338] sm:$0xff]  ;;  %2617 = vmatpush2.msra.mxu0 %v2550_v19  ;;  %v2546_v44 = vld [vmem:[#allocation7 + $0x320] sm:$0xff]  ;;  %v2548_v51 = vld [vmem:[#allocation7 + $0x330] sm:$0xff] }
 0x18b   :  { %v1651_v62 = vmax.f32 %v1649_v56, %v1650_v45  ;;  %v1200_v55 = vcombine.high %v5810_v11, %v5810_v11  ;;  %v1665_v24 = vmax.f32 %v1663_v36, %v1664_v32  ;;  %v1201_v61 = vcombine.high %v1199_v23, %v1199_v23  ;;  %2706 = vmatpush2.msra.mxu1 %v2552_v14  ;;  %v2543_v49 = vld [vmem:[#allocation7 + $0x308] sm:$0xff]  ;;  %v2545_v36 = vld [vmem:[#allocation7 + $0x318] sm:$0xff]  ;;  %v2544_v45 = vld [vmem:[#allocation7 + $0x310] sm:$0xff] }
 0x18c   :  { %v5851_v43 = vmax.f32 %v1682_v22, %v1683_v26  ;;  %v1348_v53 = vrot.slane %v5810_v11, %v5672_v47  ;;  %v1364_v16 = vrot.slane %v1199_v23, %v5672_v47  ;;  %2618 = vmatprep.subr.mxu0 %v2547_v37  ;;  %2707 = vmatprep.subr.mxu1 %v2549_v42  ;;  %v2539_v19 = vld [vmem:[#allocation7 + $0x2e8] sm:$0xff]  ;;  %v2541_v14 = vld [vmem:[#allocation7 + $0x2f8] sm:$0xff]  ;;  %v2538_v37 = vld [vmem:[#allocation7 + $0x2e0] sm:$0xff] }
 0x18d   :  { %v2207_v56 = vsel %vm2206_vm5, %v1651_v62, %v1637_v50  ;;  %v1356_v12 = vrot.slane %v1200_v55, %v5672_v47  ;;  %v1372_v59 = vrot.slane %v1201_v61, %v5672_v47  ;;  %2619 = vmatpush2.msra.mxu0 %v2546_v44  ;;  %2708 = vmatpush2.msra.mxu1 %v2548_v51  ;;  %v2540_v42 = vld [vmem:[#allocation7 + $0x2f0] sm:$0xff]  ;;  %v2535_v44 = vld [vmem:[#allocation7 + $0x2c8] sm:$0xff]  ;;  %v2537_v51 = vld [vmem:[#allocation7 + $0x2d8] sm:$0xff] }
 0x18e   :  { %v5861_v22 = vsel %vm2208_vm6, %v1665_v24, %v2207_v56  ;;  %v1349_v11 = vcombine.high %v1348_v53, %v1348_v53  ;;  %v1365_v31 = vcombine.high %v1364_v16, %v1364_v16  ;;  %v1687_v26 = vsel %vm1630_vm4, %v1348_v53, -inf  ;;  %2620 = vmatprep.subr.mxu0 %v2543_v49  ;;  %2709 = vmatprep.subr.mxu1 %v2545_v36  ;;  %v2534_v49 = vld [vmem:[#allocation7 + $0x2c0] sm:$0xff]  ;;  %v2536_v36 = vld [vmem:[#allocation7 + $0x2d0] sm:$0xff] }
 0x18f   :  { %6813 = vst [vmem:[#allocation33_spill] sm:$0xff] %v5861_v22  ;;  %v1357_v58 = vcombine.high %v1356_v12, %v1356_v12  ;;  %v1701_v23 = vsel %vm1630_vm4, %v1356_v12, -inf  ;;  %v1373_v62 = vcombine.high %v1372_v59, %v1372_v59  ;;  %v1688_v55 = vrot.slane %v1687_v26, 4  ;;  %2621 = vmatpush2.msra.mxu0 %v2542_v60  ;;  %2710 = vmatpush2.msra.mxu1 %v2544_v45  ;;  %v2533_v60 = vld [vmem:[#allocation7 + $0x2b8] sm:$0xff] }
 0x190   :  { %v1694_v24 = vsel %vm1630_vm4, %v1349_v11, -inf  ;;  %v1702_v56 = vrot.slane %v1701_v23, 4  ;;  %v1715_v12 = vsel %vm1630_vm4, %v1364_v16, -inf  ;;  %v1722_v7 = vsel %vm1630_vm4, %v1365_v31, -inf  ;;  %2622 = vmatprep.subr.mxu0 %v2539_v19  ;;  %2711 = vmatprep.subr.mxu1 %v2541_v14  ;;  %v2531_v16 = vld [vmem:[#allocation7 + $0x2a8] sm:$0xff]  ;;  %v2530_v31 = vld [vmem:[#allocation7 + $0x2a0] sm:$0xff] }
 0x191   :  { %v1695_v61 = vrot.slane %v1694_v24, 4  ;;  %v1708_v53 = vsel %vm1630_vm4, %v1357_v58, -inf  ;;  %v1689_v32 = vmax.f32 %v1687_v26, %v1688_v55  ;;  %v1716_v35 = vrot.slane %v1715_v12, 4  ;;  %2623 = vmatpush2.msra.mxu0 %v2538_v37  ;;  %2712 = vmatpush2.msra.mxu1 %v2540_v42  ;;  %v2532_v19 = vld [vmem:[#allocation7 + $0x2b0] sm:$0xff]  ;;  %v2529_v37 = vld [vmem:[#allocation7 + $0x298] sm:$0xff] }
 0x192   :  { %v1709_v50 = vrot.slane %v1708_v53, 4  ;;  %v1703_v57 = vmax.f32 %v1701_v23, %v1702_v56  ;;  %v1723_v22 = vrot.slane %v1722_v7, 4  ;;  %v1729_v58 = vsel %vm1630_vm4, %v1372_v59, -inf  ;;  %2624 = vmatprep.subr.mxu0 %v2535_v44  ;;  %2713 = vmatprep.subr.mxu1 %v2537_v51  ;;  %v2527_v59 = vld [vmem:[#allocation7 + $0x288] sm:$0xff]  ;;  %v2525_v51 = vld [vmem:[#allocation7 + $0x278] sm:$0xff] }
 0x193   :  { %v1696_v11 = vmax.f32 %v1694_v24, %v1695_v61  ;;  %v1690_v45 = vrot.slane %v1689_v32, 2  ;;  %v1717_v55 = vmax.f32 %v1715_v12, %v1716_v35  ;;  %v1730_v21 = vrot.slane %v1729_v58, 4  ;;  %2625 = vmatpush2.msra.mxu0 %v2534_v49  ;;  %2714 = vmatpush2.msra.mxu1 %v2536_v36  ;;  %v876_v35 = vpop.f32.mrf.mxu0 }
 0x194   :  { %v1710_v26 = vmax.f32 %v1708_v53, %v1709_v50  ;;  %v1704_v24 = vrot.slane %v1703_v57, 2  ;;  %v1724_v23 = vmax.f32 %v1722_v7, %v1723_v22  ;;  %v1736_v61 = vsel %vm1630_vm4, %v1373_v62, -inf  ;;  %2626 = vmatprep.subr.mxu0 %v2531_v16  ;;  %2715 = vmatprep.subr.mxu1 %v2533_v60  ;;  %v2526_v50 = vld [vmem:[#allocation7 + $0x280] sm:$0xff]  ;;  %v2528_v53 = vld [vmem:[#allocation7 + $0x290] sm:$0xff] }
 0x195   :  { %v1697_v14 = vrot.slane %v1696_v11, 2  ;;  %v1691_v42 = vmax.f32 %v1689_v32, %v1690_v45  ;;  %v1718_v40 = vrot.slane %v1717_v55, 2  ;;  %v5875_v48 = vmax.f32 %v1729_v58, %v1730_v21  ;;  %v989_v32 = vpop.f32.mrf.mxu1  ;;  %2627 = vmatpush2.msra.mxu0 %v2530_v31  ;;  %2716 = vmatpush2.msra.mxu1 %v2532_v19  ;;  %v2523_v21 = vld [vmem:[#allocation7 + $0x268] sm:$0xff] }
 0x196   :  { %v1711_v56 = vrot.slane %v1710_v26, 2  ;;  %v6814_v12 = vrot.slane %v5821_v52, 1  ;;  %v5884_v62 = vmax.f32 %v1703_v57, %v1704_v24  ;;  %v1725_v44 = vrot.slane %v1724_v23, 2  ;;  %2628 = vmatprep.subr.mxu0 %v2527_v59  ;;  %2717 = vmatprep.subr.mxu1 %v2529_v37  ;;  %v2522_v57 = vld [vmem:[#allocation7 + $0x260] sm:$0xff]  ;;  %v2519_v24 = vld [vmem:[#allocation7 + $0x248] sm:$0xff] }
 0x197   :  { %v5882_v22 = vmax.f32 %v1696_v11, %v1697_v14  ;;  %v6815_v49 = vrot.slane %v5833_v41, 1  ;;  %v6816_v58 = vrot.slane %v5823_v27, 1  ;;  %v1692_v11 = vrot.slane %v1691_v42, 1  ;;  %2629 = vmatpush2.msra.mxu0 %v2526_v50  ;;  %2718 = vmatpush2.msra.mxu1 %v2528_v53  ;;  %v2524_v14 = vld [vmem:[#allocation7 + $0x270] sm:$0xff] }
 0x198   :  { %v5880_v7 = vmax.f32 %v5821_v52, %v6814_v12  ;;  %v1737_v16 = vrot.slane %v1736_v61, 4  ;;  %v6817_v60 = vrot.slane %v5843_v25, 1  ;;  %v6819_v31 = vrot.slane %v5851_v43, 1  ;;  %2630 = vmatprep.subr.mxu0 %v2523_v21  ;;  %2719 = vmatprep.subr.mxu1 %v2525_v51  ;;  %v2520_v53 = vld [vmem:[#allocation7 + $0x250] sm:$0xff] }
 0x199   :  { %v5889_v36 = vmax.f32 %v5833_v41, %v6815_v49  ;;  %v5894_v52 = vmax.f32 %v5823_v27, %v6816_v58  ;;  %v5906_v19 = vmax.f32 %v1710_v26, %v1711_v56  ;;  %v1111_v27 = vmax.f32 %v5837_v39, 0.0  ;;  %v880_v49 = vpop.f32.mrf.mxu0  ;;  %v2518_v26 = vld [vmem:[#allocation7 + $0x240] sm:$0xff]  ;;  %2631 = vmatpush2.msra.mxu0 %v2522_v57  ;;  %2720 = vmatpush2.msra.mxu1 %v2524_v14  ;;  %v2513_v57 = vld [vmem:[#allocation7 + $0x218] sm:$0xff] }
 0x19a   :  { %v5899_v45 = vmax.f32 %v5843_v25, %v6817_v60  ;;  %v5904_v41 = vmax.f32 %v5851_v43, %v6819_v31  ;;  %v1699_v59 = vrot.slane %v5882_v22, 1  ;;  %v5910_v37 = vmax.f32 %v1717_v55, %v1718_v40  ;;  %v2521_v43 = vld [vmem:[#allocation7 + $0x258] sm:$0xff]  ;;  %v993_v55 = vpop.f32.mrf.mxu1  ;;  %2632 = vmatprep.subr.mxu0 %v2519_v24  ;;  %v2510_v24 = vld [vmem:[#allocation7 + $0x200] sm:$0xff] }
 0x19b   :  { %v1732_v25 = vrot.slane %v5875_v48, 2  ;;  %v1081_v12 = vadd.f32 %v5669_v30, %v5840_v33  ;;  %v1706_v39 = vrot.slane %v5884_v62, 1  ;;  %v5916_v56 = vmax.f32 %v1724_v23, %v1725_v44  ;;  %v2515_v23 = vld [vmem:[#allocation7 + $0x228] sm:$0xff]  ;;  %v2517_v44 = vld [vmem:[#allocation7 + $0x238] sm:$0xff]  ;;  %2721 = vmatprep.subr.mxu1 %v2521_v43  ;;  %2633 = vmatpush2.msra.mxu0 %v2518_v26  ;;  %v882_v26 = vpop.f32.mrf.mxu0 }
 0x19c   :  { %6818 = vst [vmem:[#allocation26_spill] sm:$0xff] %v5899_v45  ;;  %6820 = vst [vmem:[#allocation34_spill] sm:$0xff] %v5904_v41  ;;  %v1082_v50 = vadd.f32 %v5653_v29, %v5846_v34  ;;  %v1030_v40 = vadd.f32 %v5872_v8, %v5711_v63  ;;  %v5922_v58 = vmax.f32 %v1691_v42, %v1692_v11  ;;  %v2514_v63 = vld [vmem:[#allocation7 + $0x220] sm:$0xff]  ;;  %v2516_v42 = vld [vmem:[#allocation7 + $0x230] sm:$0xff]  ;;  %2722 = vmatpush2.msra.mxu1 %v2520_v53 }
 0x19d   :  { %v5924_v33 = vmax.f32 %v1736_v61, %v1737_v16  ;;  %v1113_v21 = vmax.f32 %v1081_v12, 0.0  ;;  %v1029_v51 = vadd.f32 %v876_v35, %v5715_v1  ;;  %v1031_v31 = vadd.f32 %v989_v32, %v5719_v38  ;;  %v2511_v16 = vld [vmem:[#allocation7 + $0x208] sm:$0xff]  ;;  %2634 = vmatprep.subr.mxu0 %v2515_v23  ;;  %2723 = vmatprep.subr.mxu1 %v2517_v44  ;;  %v2512_v12 = vld [vmem:[#allocation7 + $0x210] sm:$0xff] }
 0x19e   :  { %6821 = vst [vmem:[#allocation27_spill] sm:$0xff] %v5922_v58  ;;  %v1114_v60 = vmax.f32 %v1082_v50, 0.0  ;;  %v1084_v34 = vadd.f32 %v5657_v28, %v1030_v40  ;;  %v1032_v8 = vadd.f32 %v880_v49, %v5723_v3  ;;  %v1720_v61 = vrot.slane %v5910_v37, 1  ;;  %v995_v50 = vpop.f32.mrf.mxu1  ;;  %2635 = vmatpush2.msra.mxu0 %v2514_v63  ;;  %2724 = vmatpush2.msra.mxu1 %v2516_v42 }
 0x19f   :  { %v1139_v11 = vmax.f32 %v1111_v27, %v1113_v21  ;;  %v1083_v1 = vadd.f32 %v5665_v20, %v1029_v51  ;;  %v1034_v35 = vadd.f32 %v993_v55, %v5727_v4  ;;  %v5934_v14 = vmax.f32 %v5875_v48, %v1732_v25  ;;  %v2379_v48 = vld [vmem:[#allocation7 + $0x5e8] sm:$0xff]  ;;  %v2381_v25 = vld [vmem:[#allocation7 + $0x5f8] sm:$0xff]  ;;  %2636 = vmatprep.subr.mxu0 %v2511_v16 }
 0x1a0   :  { %v1116_v38 = vmax.f32 %v1084_v34, 0.0  ;;  %v1085_v3 = vadd.f32 %v5669_v30, %v1031_v31  ;;  %v1086_v32 = vadd.f32 %v5653_v29, %v1032_v8  ;;  %v5942_v40 = vmax.f32 %v5882_v22, %v1699_v59  ;;  %2725 = vmatprep.subr.mxu1 %v2513_v57  ;;  %2637 = vmatpush2.msra.mxu0 %v2510_v24 }
 0x1a1   :  { %6822 = vst [vmem:[#allocation35_spill] sm:$0xff] %v5934_v14  ;;  %v1202_v27 = vcombine.low %v5803_v6, %v1139_v11  ;;  %v1203_v49 = vcombine.high %v5803_v6, %v1139_v11  ;;  %v1115_v4 = vmax.f32 %v1083_v1, 0.0  ;;  %v1088_v43 = vadd.f32 %v5657_v28, %v1034_v35  ;;  %2726 = vmatpush2.msra.mxu1 %v2512_v12 }
 0x1a2   :  { %6823 = vst [vmem:[#allocation28_spill] sm:$0xff] %v5942_v40  ;;  %v5944_v55 = vmax.f32 %v1114_v60, %v1116_v38  ;;  %v1117_v53 = vmax.f32 %v1085_v3, 0.0  ;;  %v1118_v21 = vmax.f32 %v1086_v32, 0.0  ;;  %v5947_v6 = vmax.f32 %v5884_v62, %v1706_v39  ;;  %2752 = vmatprep.subr.mxu0 %v2379_v48  ;;  %2841 = vmatprep.subr.mxu1 %v2381_v25 }
 0x1a3   :  { %v1210_v51 = vrot.slane %v1202_v27, %v5672_v47  ;;  %v1217_v23 = vrot.slane %v1203_v49, %v5672_v47  ;;  %v1120_v44 = vmax.f32 %v1088_v43, 0.0  ;;  %v1033_v22 = vadd.f32 %v882_v26, %v5731_v5 }
 0x1a4   :  { %6824 = vst [vmem:[#allocation36_spill] sm:$0xff] %v5947_v6  ;;  %v5951_v34 = vmax.f32 %v1115_v4, %v1117_v53  ;;  %v1035_v59 = vadd.f32 %v995_v50, %v5737_v9  ;;  %v5958_v8 = vmax.f32 %v5910_v37, %v1720_v61 }
 0x1a5   :  { %v1218_v60 = vcombine.high %v1210_v51, %v1210_v51  ;;  %v1219_v31 = vcombine.high %v1217_v23, %v1217_v23  ;;  %v1380_v62 = vrot.slane %v1210_v51, %v5672_v47  ;;  %v1396_v39 = vrot.slane %v1217_v23, %v5672_v47 }
 0x1a6   :  { %6825 = vst [vmem:[#allocation29_spill] sm:$0xff] %v5958_v8  ;;  %v1220_v63 = vcombine.low %v5944_v55, %v5951_v34  ;;  %v1221_v42 = vcombine.high %v5944_v55, %v5951_v34  ;;  %v5964_v5 = vmax.f32 %v1118_v21, %v1120_v44  ;;  %v5971_v37 = vadd.f32 %v5665_v20, %v1033_v22 }
 0x1a7   :  { %v1381_v9 = vcombine.high %v1380_v62, %v1380_v62  ;;  %v1388_v11 = vrot.slane %v1218_v60, %v5672_v47  ;;  %v1397_v1 = vcombine.high %v1396_v39, %v1396_v39  ;;  %v1404_v35 = vrot.slane %v1219_v31, %v5672_v47 }
 0x1a8   :  { %v1743_v16 = vsel %vm1630_vm4, %v1380_v62, -inf  ;;  %v1771_v57 = vsel %vm1630_vm4, %v1396_v39, -inf  ;;  %v5974_v61 = vadd.f32 %v5669_v30, %v1035_v59 }
 0x1a9   :  { %v1389_v38 = vcombine.high %v1388_v11, %v1388_v11  ;;  %v1405_v3 = vcombine.high %v1404_v35, %v1404_v35  ;;  %v1744_v32 = vrot.slane %v1743_v16, 4  ;;  %v1750_v24 = vsel %vm1630_vm4, %v1381_v9, -inf }
 0x1aa   :  { %v1751_v12 = vrot.slane %v1750_v24, 4  ;;  %v1757_v27 = vsel %vm1630_vm4, %v1388_v11, -inf  ;;  %v1772_v49 = vrot.slane %v1771_v57, 4  ;;  %v1778_v4 = vsel %vm1630_vm4, %v1397_v1, -inf }
 0x1ab   :  { %v1745_v43 = vmax.f32 %v1743_v16, %v1744_v32  ;;  %v1758_v26 = vrot.slane %v1757_v27, 4  ;;  %v1764_v50 = vsel %vm1630_vm4, %v1389_v38, -inf  ;;  %v1779_v48 = vrot.slane %v1778_v4, 4  ;;  %v886_v32 = vpop.f32.mrf.mxu0 }
 0x1ac   :  { %v1752_v25 = vmax.f32 %v1750_v24, %v1751_v12  ;;  %v1765_v55 = vrot.slane %v1764_v50, 4  ;;  %v1773_v53 = vmax.f32 %v1771_v57, %v1772_v49  ;;  %v1785_v21 = vsel %vm1630_vm4, %v1404_v35, -inf  ;;  %v999_v49 = vpop.f32.mrf.mxu1 }
 0x1ad   :  { %v1746_v51 = vrot.slane %v1745_v43, 2  ;;  %v1759_v23 = vmax.f32 %v1757_v27, %v1758_v26  ;;  %v1780_v44 = vmax.f32 %v1778_v4, %v1779_v48  ;;  %v1786_v34 = vrot.slane %v1785_v21, 4 }
 0x1ae   :  { %v1753_v22 = vrot.slane %v1752_v25, 2  ;;  %v1766_v59 = vmax.f32 %v1764_v50, %v1765_v55  ;;  %v1774_v60 = vrot.slane %v1773_v53, 2  ;;  %v1792_v31 = vsel %vm1630_vm4, %v1405_v3, -inf }
 0x1af   :  { %v1747_v62 = vmax.f32 %v1745_v43, %v1746_v51  ;;  %v1760_v39 = vrot.slane %v1759_v23, 2  ;;  %v1781_v9 = vrot.slane %v1780_v44, 2  ;;  %v1787_v11 = vmax.f32 %v1785_v21, %v1786_v34 }
 0x1b0   :  { %v1754_v1 = vmax.f32 %v1752_v25, %v1753_v22  ;;  %v1767_v16 = vrot.slane %v1766_v59, 2  ;;  %v1793_v38 = vrot.slane %v1792_v31, 4  ;;  %v1228_v57 = vrot.slane %v1220_v63, %v5672_v47 }
 0x1b1   :  { %v1748_v35 = vrot.slane %v1747_v62, 1  ;;  %v1761_v24 = vmax.f32 %v1759_v23, %v1760_v39  ;;  %v1775_v12 = vmax.f32 %v1773_v53, %v1774_v60  ;;  %v1788_v27 = vrot.slane %v1787_v11, 2 }
 0x1b2   :  { %v1782_v26 = vmax.f32 %v1780_v44, %v1781_v9  ;;  %v1794_v50 = vmax.f32 %v1792_v31, %v1793_v38  ;;  %v1235_v3 = vrot.slane %v1221_v42, %v5672_v47  ;;  %v1768_v48 = vmax.f32 %v1766_v59, %v1767_v16 }
 0x1b3   :  { %v1762_v43 = vrot.slane %v1761_v24, 1  ;;  %v1119_v25 = vmax.f32 %v5971_v37, 0.0  ;;  %v5987_v55 = vadd.f32 %v886_v32, %v5741_v10  ;;  %v1789_v63 = vmax.f32 %v1787_v11, %v1788_v27 }
 0x1b4   :  { %v1795_v21 = vrot.slane %v1794_v50, 2  ;;  %v1121_v51 = vmax.f32 %v5974_v61, 0.0  ;;  %v5991_v53 = vadd.f32 %v999_v49, %v5745_v13  ;;  %v1749_v23 = vmax.f32 %v1747_v62, %v1748_v35 }
 0x1b5   :  { %v1755_v34 = vrot.slane %v1754_v1, 1  ;;  %v1776_v44 = vrot.slane %v1775_v12, 1  ;;  %v1236_v22 = vcombine.high %v1228_v57, %v1228_v57  ;;  %v1783_v60 = vrot.slane %v1782_v26, 1 }
 0x1b6   :  { %v1796_v42 = vmax.f32 %v1794_v50, %v1795_v21  ;;  %v1237_v31 = vcombine.high %v1235_v3, %v1235_v3  ;;  %v1412_v59 = vrot.slane %v1228_v57, %v5672_v47  ;;  %v1763_v37 = vmax.f32 %v1761_v24, %v1762_v43 }
 0x1b7   :  { %v1769_v39 = vrot.slane %v1768_v48, 1  ;;  %v1420_v10 = vrot.slane %v1236_v22, %v5672_v47  ;;  %v1428_v9 = vrot.slane %v1235_v3, %v5672_v47  ;;  %v1790_v11 = vrot.slane %v1789_v63, 1 }
 0x1b8   :  { %v1413_v61 = vcombine.high %v1412_v59, %v1412_v59  ;;  %v1436_v13 = vrot.slane %v1237_v31, %v5672_v47  ;;  %v1799_v62 = vsel %vm1630_vm4, %v1412_v59, -inf  ;;  %v1797_v27 = vrot.slane %v1796_v42, 1 }
 0x1b9   :  { %v1421_v16 = vcombine.high %v1420_v10, %v1420_v10  ;;  %v1429_v38 = vcombine.high %v1428_v9, %v1428_v9  ;;  %v1800_v32 = vrot.slane %v1799_v62, 4  ;;  %v1813_v35 = vsel %vm1630_vm4, %v1420_v10, -inf }
 0x1ba   :  { %v1437_v49 = vcombine.high %v1436_v13, %v1436_v13  ;;  %v1806_v57 = vsel %vm1630_vm4, %v1413_v61, -inf  ;;  %v1814_v24 = vrot.slane %v1813_v35, 4  ;;  %v1827_v21 = vsel %vm1630_vm4, %v1428_v9, -inf }
 0x1bb   :  { %v1801_v50 = vmax.f32 %v1799_v62, %v1800_v32  ;;  %v1807_v43 = vrot.slane %v1806_v57, 4  ;;  %v1820_v3 = vsel %vm1630_vm4, %v1421_v16, -inf  ;;  %v1828_v4 = vrot.slane %v1827_v21, 4 }
 0x1bc   :  { %v1815_v22 = vmax.f32 %v1813_v35, %v1814_v24  ;;  %v1821_v31 = vrot.slane %v1820_v3, 4  ;;  %v1834_v59 = vsel %vm1630_vm4, %v1429_v38, -inf  ;;  %v1841_v10 = vsel %vm1630_vm4, %v1436_v13, -inf }
 0x1bd   :  { %v1802_v8 = vrot.slane %v1801_v50, 2  ;;  %v1808_v6 = vmax.f32 %v1806_v57, %v1807_v43  ;;  %v1835_v58 = vrot.slane %v1834_v59, 4  ;;  %v1829_v61 = vmax.f32 %v1827_v21, %v1828_v4 }
 0x1be   :  { %v1816_v40 = vrot.slane %v1815_v22, 2  ;;  %v1822_v45 = vmax.f32 %v1820_v3, %v1821_v31  ;;  %v1842_v41 = vrot.slane %v1841_v10, 4  ;;  %v6004_v62 = vmax.f32 %v1754_v1, %v1755_v34  ;;  %v888_v34 = vpop.f32.mrf.mxu0 }
 0x1bf   :  { %v1803_v32 = vmax.f32 %v1801_v50, %v1802_v8  ;;  %v1809_v16 = vrot.slane %v1808_v6, 2  ;;  %v6006_v14 = vmax.f32 %v1834_v59, %v1835_v58  ;;  %v6008_v9 = vmax.f32 %v1768_v48, %v1769_v39 }
 0x1c0   :  { %v6010_v35 = vmax.f32 %v1775_v12, %v1776_v44  ;;  %v6012_v38 = vmax.f32 %v1782_v26, %v1783_v60  ;;  %v6014_v57 = vmax.f32 %v1789_v63, %v1790_v11  ;;  %v6016_v24 = vmax.f32 %v1796_v42, %v1797_v27  ;;  %v1001_v26 = vpop.f32.mrf.mxu1 }
 0x1c1   :  { %v6019_v13 = vsel %vm2206_vm5, %v1763_v37, %v1749_v23  ;;  %v6021_v4 = vmax.f32 %v1815_v22, %v1816_v40  ;;  %v6024_v8 = vsel %vm1630_vm4, %v1437_v49, -inf  ;;  %v1823_v58 = vrot.slane %v1822_v45, 2 }
 0x1c2   :  { %v1830_v1 = vrot.slane %v1829_v61, 2  ;;  %v6026_v48 = vmax.f32 %v1841_v10, %v1842_v41  ;;  %v1143_v12 = vmax.f32 %v1119_v25, %v1121_v51  ;;  %v1804_v44 = vrot.slane %v1803_v32, 1 }
 0x1c3   :  { %v6028_v63 = vmax.f32 %v1808_v6, %v1809_v16  ;;  %v1090_v23 = vadd.f32 %v5653_v29, %v5987_v55  ;;  %v1092_v41 = vadd.f32 %v5657_v28, %v5991_v53  ;;  %v1037_v6 = vadd.f32 %v888_v34, %v5749_v46 }
 0x1c4   :  { %v1238_v42 = vcombine.low %v5964_v5, %v1143_v12  ;;  %v1239_v37 = vcombine.high %v5964_v5, %v1143_v12  ;;  %v1039_v39 = vadd.f32 %v1001_v26, %v5755_v17  ;;  %v6041_v11 = vmax.f32 %v1822_v45, %v1823_v58  ;;  %v892_v45 = vpop.f32.mrf.mxu0 }
 0x1c5   :  { %v1122_v51 = vmax.f32 %v1090_v23, 0.0  ;;  %v1124_v49 = vmax.f32 %v1092_v41, 0.0  ;;  %v6045_v50 = vmax.f32 %v1803_v32, %v1804_v44  ;;  %v6047_v5 = vmax.f32 %v1829_v61, %v1830_v1 }
 0x1c6   :  { %v1246_v55 = vrot.slane %v1238_v42, %v5672_v47  ;;  %v1253_v27 = vrot.slane %v1239_v37, %v5672_v47  ;;  %v1091_v53 = vadd.f32 %v5665_v20, %v1037_v6  ;;  %v1093_v43 = vadd.f32 %v5669_v30, %v1039_v39 }
 0x1c7   :  { %6826 = vst [vmem:[#allocation37_spill] sm:$0xff] %v6045_v50  ;;  %v1811_v22 = vrot.slane %v6028_v63, 1  ;;  %v6054_v31 = vmax.f32 %v1122_v51, %v1124_v49  ;;  %v1040_v26 = vadd.f32 %v892_v45, %v5759_v18 }
 0x1c8   :  { %v1254_v3 = vcombine.high %v1246_v55, %v1246_v55  ;;  %v1255_v21 = vcombine.high %v1253_v27, %v1253_v27  ;;  %v1444_v46 = vrot.slane %v1246_v55, %v5672_v47  ;;  %v1460_v17 = vrot.slane %v1253_v27, %v5672_v47 }
 0x1c9   :  { %v1123_v59 = vmax.f32 %v1091_v53, 0.0  ;;  %v1125_v10 = vmax.f32 %v1093_v43, 0.0 }
 0x1ca   :  { %v1445_v32 = vcombine.high %v1444_v46, %v1444_v46  ;;  %v1452_v61 = vrot.slane %v1254_v3, %v5672_v47  ;;  %v1461_v16 = vcombine.high %v1460_v17, %v1460_v17  ;;  %v1468_v58 = vrot.slane %v1255_v21, %v5672_v47 }
 0x1cb   :  { %v1855_v1 = vsel %vm1630_vm4, %v1444_v46, -inf  ;;  %v1883_v12 = vsel %vm1630_vm4, %v1460_v17, -inf  ;;  %v6060_v34 = vmax.f32 %v1123_v59, %v1125_v10 }
 0x1cc   :  { %v1453_v44 = vcombine.high %v1452_v61, %v1452_v61  ;;  %v1469_v23 = vcombine.high %v1468_v58, %v1468_v58  ;;  %v1856_v42 = vrot.slane %v1855_v1, 4  ;;  %v1862_v37 = vsel %vm1630_vm4, %v1445_v32, -inf }
 0x1cd   :  { %v1863_v41 = vrot.slane %v1862_v37, 4  ;;  %v1869_v51 = vsel %vm1630_vm4, %v1452_v61, -inf  ;;  %v1884_v6 = vrot.slane %v1883_v12, 4  ;;  %v1890_v39 = vsel %vm1630_vm4, %v1461_v16, -inf }
 0x1ce   :  { %v1857_v55 = vmax.f32 %v1855_v1, %v1856_v42  ;;  %v1870_v27 = vrot.slane %v1869_v51, 4  ;;  %v1876_v49 = vsel %vm1630_vm4, %v1453_v44, -inf  ;;  %v1891_v53 = vrot.slane %v1890_v39, 4  ;;  %v1005_v44 = vpop.f32.mrf.mxu1 }
 0x1cf   :  { %v1864_v43 = vmax.f32 %v1862_v37, %v1863_v41  ;;  %v1877_v3 = vrot.slane %v1876_v49, 4  ;;  %v1885_v21 = vmax.f32 %v1883_v12, %v1884_v6  ;;  %v1897_v18 = vsel %vm1630_vm4, %v1468_v58, -inf }
 0x1d0   :  { %v1858_v46 = vrot.slane %v1857_v55, 2  ;;  %v1871_v17 = vmax.f32 %v1869_v51, %v1870_v27  ;;  %v1892_v45 = vmax.f32 %v1890_v39, %v1891_v53  ;;  %v1898_v59 = vrot.slane %v1897_v18, 4  ;;  %v894_v53 = vpop.f32.mrf.mxu0 }
 0x1d1   :  { %v1865_v10 = vrot.slane %v1864_v43, 2  ;;  %v1878_v32 = vmax.f32 %v1876_v49, %v1877_v3  ;;  %v1886_v61 = vrot.slane %v1885_v21, 2  ;;  %v1904_v25 = vsel %vm1630_vm4, %v1469_v23, -inf }
 0x1d2   :  { %v1859_v16 = vmax.f32 %v1857_v55, %v1858_v46  ;;  %v1872_v1 = vrot.slane %v1871_v17, 2  ;;  %v1893_v42 = vrot.slane %v1892_v45, 2  ;;  %v1899_v40 = vmax.f32 %v1897_v18, %v1898_v59 }
 0x1d3   :  { %v1866_v60 = vmax.f32 %v1864_v43, %v1865_v10  ;;  %v1879_v37 = vrot.slane %v1878_v32, 2  ;;  %v1887_v41 = vmax.f32 %v1885_v21, %v1886_v61  ;;  %v1905_v12 = vrot.slane %v1904_v25, 4  ;;  %v898_v43 = vpop.f32.mrf.mxu0 }
 0x1d4   :  { %v1873_v6 = vmax.f32 %v1871_v17, %v1872_v1  ;;  %v1894_v58 = vmax.f32 %v1892_v45, %v1893_v42  ;;  %v1900_v50 = vrot.slane %v1899_v40, 2  ;;  %v1094_v51 = vadd.f32 %v5653_v29, %v1040_v26 }
 0x1d5   :  { %v6827_v39 = vrot.slane %v6006_v14, 2  ;;  %v1860_v23 = vrot.slane %v1859_v16, 1  ;;  %v1906_v55 = vmax.f32 %v1904_v25, %v1905_v12  ;;  %v1042_v49 = vadd.f32 %v1005_v44, %v5763_v0 }
 0x1d6   :  { %v1867_v3 = vrot.slane %v1866_v60, 1  ;;  %v6077_v21 = vmax.f32 %v1878_v32, %v1879_v37  ;;  %v1888_v18 = vrot.slane %v1887_v41, 1  ;;  %v6080_v46 = vmax.f32 %v6028_v63, %v1811_v22  ;;  %v1007_v37 = vpop.f32.mrf.mxu1 }
 0x1d7   :  { %v6073_v27 = vmax.f32 %v6006_v14, %v6827_v39  ;;  %v1874_v26 = vrot.slane %v1873_v6, 1  ;;  %v1895_v17 = vrot.slane %v1894_v58, 1  ;;  %v1907_v45 = vrot.slane %v1906_v55, 2 }
 0x1d8   :  { %v6082_v59 = vmax.f32 %v1899_v40, %v1900_v50  ;;  %v1256_v14 = vcombine.low %v6054_v31, %v6060_v34  ;;  %v1126_v25 = vmax.f32 %v1094_v51, 0.0  ;;  %v1041_v0 = vadd.f32 %v894_v53, %v5770_v2 }
 0x1d9   :  { %v6087_v10 = vmax.f32 %v1859_v16, %v1860_v23  ;;  %v1908_v61 = vmax.f32 %v1906_v55, %v1907_v45  ;;  %v1257_v32 = vcombine.high %v6054_v31, %v6060_v34  ;;  %v1096_v63 = vadd.f32 %v5657_v28, %v1042_v49 }
 0x1da   :  { %v6092_v22 = vmax.f32 %v1866_v60, %v1867_v3  ;;  %v1881_v1 = vrot.slane %v6077_v21, 1  ;;  %v6095_v40 = vmax.f32 %v1887_v41, %v1888_v18  ;;  %v1264_v50 = vrot.slane %v1256_v14, %v5672_v47 }
 0x1db   :  { %v1875_v42 = vmax.f32 %v1873_v6, %v1874_v26  ;;  %v6098_v44 = vmax.f32 %v1894_v58, %v1895_v17  ;;  %v1271_v2 = vrot.slane %v1257_v32, %v5672_v47  ;;  %v1128_v16 = vmax.f32 %v1096_v63, 0.0 }
 0x1dc   :  { %6828 = vst [vmem:[#allocation30_spill] sm:$0xff] %v6092_v22  ;;  %6829 = vst [vmem:[#allocation31_spill] sm:$0xff] %v6095_v40  ;;  %v1902_v12 = vrot.slane %v6082_v59, 1  ;;  %v1272_v31 = vcombine.high %v1264_v50, %v1264_v50  ;;  %v1476_v34 = vrot.slane %v1264_v50, %v5672_v47  ;;  %v6104_v60 = vadd.f32 %v5665_v20, %v1041_v0 }
 0x1dd   :  { %6830 = vst [vmem:[#allocation39_spill] sm:$0xff] %v6098_v44  ;;  %v1909_v51 = vrot.slane %v1908_v61, 1  ;;  %v1273_v41 = vcombine.high %v1271_v2, %v1271_v2  ;;  %v1492_v39 = vrot.slane %v1271_v2, %v5672_v47  ;;  %v6107_v23 = vmax.f32 %v1126_v25, %v1128_v16 }
 0x1de   :  { %v1477_v6 = vcombine.high %v1476_v34, %v1476_v34  ;;  %v1484_v58 = vrot.slane %v1272_v31, %v5672_v47  ;;  %v1911_v55 = vsel %vm1630_vm4, %v1476_v34, -inf  ;;  %v1043_v49 = vadd.f32 %v1007_v37, %v5776_v54 }
 0x1df   :  { %v1493_v53 = vcombine.high %v1492_v39, %v1492_v39  ;;  %v1500_v3 = vrot.slane %v1273_v41, %v5672_v47  ;;  %v1912_v18 = vrot.slane %v1911_v55, 4  ;;  %v1939_v26 = vsel %vm1630_vm4, %v1492_v39, -inf }
 0x1e0   :  { %v1485_v17 = vcombine.high %v1484_v58, %v1484_v58  ;;  %v1918_v45 = vsel %vm1630_vm4, %v1477_v6, -inf  ;;  %v1925_v14 = vsel %vm1630_vm4, %v1484_v58, -inf  ;;  %v1940_v25 = vrot.slane %v1939_v26, 4 }
 0x1e1   :  { %v1501_v0 = vcombine.high %v1500_v3, %v1500_v3  ;;  %v1913_v32 = vmax.f32 %v1911_v55, %v1912_v18  ;;  %v1919_v63 = vrot.slane %v1918_v45, 4  ;;  %v1926_v50 = vrot.slane %v1925_v14, 4  ;;  %v1011_v55 = vpop.f32.mrf.mxu1 }
 0x1e2   :  { %v1932_v2 = vsel %vm1630_vm4, %v1485_v17, -inf  ;;  %v1941_v16 = vmax.f32 %v1939_v26, %v1940_v25  ;;  %v1946_v54 = vsel %vm1630_vm4, %v1493_v53, -inf  ;;  %v1953_v37 = vsel %vm1630_vm4, %v1500_v3, -inf }
 0x1e3   :  { %v1914_v31 = vrot.slane %v1913_v32, 2  ;;  %v1920_v34 = vmax.f32 %v1918_v45, %v1919_v63  ;;  %v1927_v41 = vmax.f32 %v1925_v14, %v1926_v50  ;;  %v1933_v39 = vrot.slane %v1932_v2, 4 }
 0x1e4   :  { %v1942_v6 = vrot.slane %v1941_v16, 2  ;;  %v1947_v40 = vrot.slane %v1946_v54, 4  ;;  %v1954_v58 = vrot.slane %v1953_v37, 4  ;;  %v1960_v44 = vsel %vm1630_vm4, %v1501_v0, -inf }
 0x1e5   :  { %v6120_v18 = vmax.f32 %v1913_v32, %v1914_v31  ;;  %v1921_v22 = vrot.slane %v1920_v34, 2  ;;  %v1928_v17 = vrot.slane %v1927_v41, 2  ;;  %v1934_v26 = vmax.f32 %v1932_v2, %v1933_v39  ;;  %v6842_v31 = vld [vmem:[#allocation25_spill] sm:$0xff] }
 0x1e6   :  { %v6122_v25 = vmax.f32 %v1941_v16, %v1942_v6  ;;  %v1948_v53 = vmax.f32 %v1946_v54, %v1947_v40  ;;  %v1097_v3 = vadd.f32 %v5669_v30, %v1043_v49  ;;  %v1044_v45 = vadd.f32 %v898_v43, %v5783_v15  ;;  %v900_v15 = vpop.f32.mrf.mxu0  ;;  %v1013_v43 = vpop.f32.mrf.mxu1  ;;  %v6839_v16 = vld [vmem:[#allocation24_spill] sm:$0xff] }
 0x1e7   :  { %6831 = vst [vmem:[#allocation40_spill] sm:$0xff] %v6120_v18  ;;  %v6127_v14 = vmax.f32 %v6077_v21, %v1881_v1  ;;  %v6130_v63 = vmax.f32 %v6082_v59, %v1902_v12  ;;  %v6132_v0 = vmax.f32 %v1920_v34, %v1921_v22  ;;  %v1961_v32 = vrot.slane %v1960_v44, 4 }
 0x1e8   :  { %6832 = vst [vmem:[#allocation41_spill] sm:$0xff] %v6122_v25  ;;  %v6134_v50 = vmax.f32 %v1908_v61, %v1909_v51  ;;  %v6138_v2 = vsel %vm2206_vm5, %v1875_v42, %v6087_v10  ;;  %v6140_v40 = vmax.f32 %v1953_v37, %v1954_v58  ;;  %v1127_v49 = vmax.f32 %v6104_v60, 0.0  ;;  %v6841_v60 = vld [vmem:[#allocation32_spill] sm:$0xff] }
 0x1e9   :  { %6833 = vst [vmem:[#allocation42_spill] sm:$0xff] %v6127_v14  ;;  %6834 = vst [vmem:[#allocation43_spill] sm:$0xff] %v6130_v63  ;;  %v6144_v1 = vmax.f32 %v1927_v41, %v1928_v17  ;;  %v1935_v59 = vrot.slane %v1934_v26, 2  ;;  %v1949_v12 = vrot.slane %v1948_v53, 2  ;;  %v1129_v61 = vmax.f32 %v1097_v3, 0.0 }
 0x1ea   :  { %6835 = vst [vmem:[#allocation44_spill] sm:$0xff] %v6134_v50  ;;  %6836 = vst [vmem:[#allocation45_spill] sm:$0xff] %v6138_v2  ;;  %v1098_v51 = vadd.f32 %v5653_v29, %v1044_v45  ;;  %v1046_v10 = vadd.f32 %v1011_v55, %v6839_v16  ;;  %v6150_v54 = vmax.f32 %v1960_v44, %v1961_v32  ;;  %v1713_v58 = vrot.slane %v5906_v19, 1 }
 0x1eb   :  { %6837 = vst [vmem:[#allocation46_spill] sm:$0xff] %v6140_v40  ;;  %6838 = vst [vmem:[#allocation47_spill] sm:$0xff] %v6144_v1  ;;  %v1045_v37 = vadd.f32 %v900_v15, %v6841_v60  ;;  %v1047_v34 = vadd.f32 %v1013_v43, %v6842_v31  ;;  %v1147_v39 = vmax.f32 %v1127_v49, %v1129_v61  ;;  %v1727_v55 = vrot.slane %v5916_v56, 1  ;;  %v6843_v61 = vld [vmem:[#allocation23_spill] sm:$0xff] }
 0x1ec   :  { %6840 = vst [vmem:[#allocation24_spill] sm:$0xff] %v6150_v54  ;;  %v1130_v41 = vmax.f32 %v1098_v51, 0.0  ;;  %v1100_v6 = vadd.f32 %v5657_v28, %v1046_v10  ;;  %v1739_v3 = vrot.slane %v5924_v33, 2  ;;  %v6173_v60 = vmax.f32 %v1948_v53, %v1949_v12 }
 0x1ed   :  { %v1099_v17 = vadd.f32 %v5665_v20, %v1045_v37  ;;  %v1101_v29 = vadd.f32 %v5669_v30, %v1047_v34  ;;  %v1274_v45 = vcombine.low %v6107_v23, %v1147_v39  ;;  %v1275_v32 = vcombine.high %v6107_v23, %v1147_v39 }
 0x1ee   :  { %v1132_v49 = vmax.f32 %v1100_v6, 0.0  ;;  %v6164_v28 = vmax.f32 %v5924_v33, %v1739_v3  ;;  %v6167_v20 = vadd.s32 24, %v6843_v61  ;;  %v6169_v30 = vmax.f32 %v1934_v26, %v1935_v59  ;;  %6844 = vst [vmem:[#allocation32_spill] sm:$0xff] %v6173_v60 }
 0x1ef   :  { %v1131_v15 = vmax.f32 %v1099_v17, 0.0  ;;  %v1133_v43 = vmax.f32 %v1101_v29, 0.0  ;;  %v1282_v51 = vrot.slane %v1274_v45, %v5672_v47  ;;  %v1289_v16 = vrot.slane %v1275_v32, %v5672_v47 }
 0x1f0   :  { %v1148_v10 = vmax.f32 %v1130_v41, %v1132_v49  ;;  %v6176_v23 = vmax.f32 %v5906_v19, %v1713_v58  ;;  %v6179_v31 = vmax.f32 %v5916_v56, %v1727_v55  ;;  %v1741_v17 = vrot.slane %v6164_v28, 1 }
 0x1f1   :  { %v1149_v37 = vmax.f32 %v1131_v15, %v1133_v43  ;;  %v1290_v33 = vcombine.high %v1282_v51, %v1282_v51  ;;  %v1291_v34 = vcombine.high %v1289_v16, %v1289_v16  ;;  %v1508_v39 = vrot.slane %v1282_v51, %v5672_v47 }
 0x1f2   :  { %v1524_v26 = vrot.slane %v1289_v16, %v5672_v47 }
 0x1f3   :  { %v1292_v59 = vcombine.low %v1148_v10, %v1149_v37  ;;  %v1293_v6 = vcombine.high %v1148_v10, %v1149_v37  ;;  %v1509_v12 = vcombine.high %v1508_v39, %v1508_v39  ;;  %v1516_v41 = vrot.slane %v1290_v33, %v5672_v47 }
 0x1f4   :  { %v1525_v19 = vcombine.high %v1524_v26, %v1524_v26  ;;  %v1532_v58 = vrot.slane %v1291_v34, %v5672_v47  ;;  %v1967_v56 = vsel %vm1630_vm4, %v1508_v39, -inf  ;;  %v1995_v29 = vsel %vm1630_vm4, %v1524_v26, -inf }
 0x1f5   :  { %v1300_v55 = vrot.slane %v1292_v59, %v5672_v47  ;;  %v6191_v3 = vrot.slane %v1293_v6, %v5672_v47  ;;  %v1517_v45 = vcombine.high %v1516_v41, %v1516_v41  ;;  %v1968_v49 = vrot.slane %v1967_v56, 4 }
 0x1f6   :  { %v1533_v32 = vcombine.high %v1532_v58, %v1532_v58  ;;  %v1974_v15 = vsel %vm1630_vm4, %v1509_v12, -inf  ;;  %v1981_v51 = vsel %vm1630_vm4, %v1516_v41, -inf  ;;  %v1996_v16 = vrot.slane %v1995_v29, 4 }
 0x1f7   :  { %v1975_v43 = vrot.slane %v1974_v15, 4  ;;  %v2002_v10 = vsel %vm1630_vm4, %v1525_v19, -inf  ;;  %v1969_v37 = vmax.f32 %v1967_v56, %v1968_v49  ;;  %v1982_v33 = vrot.slane %v1981_v51, 4 }
 0x1f8   :  { %v1988_v34 = vsel %vm1630_vm4, %v1517_v45, -inf  ;;  %v2003_v39 = vrot.slane %v2002_v10, 4  ;;  %v1997_v6 = vmax.f32 %v1995_v29, %v1996_v16  ;;  %v2009_v22 = vsel %vm1630_vm4, %v1532_v58, -inf }
 0x1f9   :  { %v1976_v26 = vmax.f32 %v1974_v15, %v1975_v43  ;;  %v1989_v59 = vrot.slane %v1988_v34, 4  ;;  %v1970_v44 = vrot.slane %v1969_v37, 2  ;;  %v1983_v21 = vmax.f32 %v1981_v51, %v1982_v33 }
 0x1fa   :  { %v2004_v42 = vmax.f32 %v2002_v10, %v2003_v39  ;;  %v2010_v12 = vrot.slane %v2009_v22, 4  ;;  %v1998_v41 = vrot.slane %v1997_v6, 2  ;;  %v2016_v63 = vsel %vm1630_vm4, %v1533_v32, -inf }
 0x1fb   :  { %v1977_v53 = vrot.slane %v1976_v26, 2  ;;  %v1990_v25 = vmax.f32 %v1988_v34, %v1989_v59  ;;  %v1971_v19 = vmax.f32 %v1969_v37, %v1970_v44  ;;  %v1984_v56 = vrot.slane %v1983_v21, 2 }
 0x1fc   :  { %v2005_v49 = vrot.slane %v2004_v42, 2  ;;  %v2011_v2 = vmax.f32 %v2009_v22, %v2010_v12  ;;  %v1999_v15 = vmax.f32 %v1997_v6, %v1998_v41  ;;  %v2017_v43 = vrot.slane %v2016_v63, 4 }
 0x1fd   :  { %v1978_v45 = vmax.f32 %v1976_v26, %v1977_v53  ;;  %v1991_v1 = vrot.slane %v1990_v25, 2  ;;  %v1972_v29 = vrot.slane %v1971_v19, 1  ;;  %v1985_v16 = vmax.f32 %v1983_v21, %v1984_v56 }
 0x1fe   :  { %v2006_v58 = vmax.f32 %v2004_v42, %v2005_v49  ;;  %v2012_v18 = vrot.slane %v2011_v2, 2  ;;  %v2000_v33 = vrot.slane %v1999_v15, 1  ;;  %v2018_v39 = vmax.f32 %v2016_v63, %v2017_v43 }
 0x1ff   :  { %v1979_v51 = vrot.slane %v1978_v45, 1  ;;  %v1992_v10 = vmax.f32 %v1990_v25, %v1991_v1  ;;  %v1986_v34 = vrot.slane %v1985_v16, 1  ;;  %v6200_v44 = vmax.f32 %v6164_v28, %v1741_v17 }
 0x200   :  { %v2007_v59 = vrot.slane %v2006_v58, 1  ;;  %v2013_v50 = vmax.f32 %v2011_v2, %v2012_v18  ;;  %v1973_v32 = vmax.f32 %v1971_v19, %v1972_v29  ;;  %v2019_v37 = vrot.slane %v2018_v39, 2 }
 0x201   :  { %v6202_v22 = vmax.f32 %v1978_v45, %v1979_v51  ;;  %v1993_v53 = vrot.slane %v1992_v10, 1  ;;  %v1987_v26 = vmax.f32 %v1985_v16, %v1986_v34  ;;  %v2001_v6 = vmax.f32 %v1999_v15, %v2000_v33 }
 0x202   :  { %v2014_v21 = vrot.slane %v2013_v50, 1  ;;  %v1308_v42 = vcombine.high %v1300_v55, %v1300_v55  ;;  %v6204_v12 = vmax.f32 %v2006_v58, %v2007_v59  ;;  %v2020_v25 = vmax.f32 %v2018_v39, %v2019_v37 }
 0x203   :  { %v1309_v63 = vcombine.high %v6191_v3, %v6191_v3  ;;  %v1540_v18 = vrot.slane %v1300_v55, %v5672_v47  ;;  %v6209_v2 = vmax.f32 %v1992_v10, %v1993_v53  ;;  %v2255_v1 = vsel %vm2206_vm5, %v1987_v26, %v1973_v32 }
 0x204   :  { %v1548_v28 = vrot.slane %v1308_v42, %v5672_v47  ;;  %v1556_v17 = vrot.slane %v6191_v3, %v5672_v47  ;;  %v6215_v41 = vmax.f32 %v2013_v50, %v2014_v21  ;;  %v2021_v19 = vrot.slane %v2020_v25, 1 }
 0x205   :  { %v1541_v56 = vcombine.high %v1540_v18, %v1540_v18  ;;  %v1564_v49 = vrot.slane %v1309_v63, %v5672_v47  ;;  %v2023_v43 = vsel %vm1630_vm4, %v1540_v18, -inf  ;;  %v6221_v29 = vsel %vm2208_vm6, %v2001_v6, %v2255_v1 }
 0x206   :  { %v1549_v45 = vcombine.high %v1548_v28, %v1548_v28  ;;  %v1557_v15 = vcombine.high %v1556_v17, %v1556_v17  ;;  %v2037_v55 = vsel %vm1630_vm4, %v1548_v28, -inf  ;;  %v2024_v58 = vrot.slane %v2023_v43, 4 }
 0x207   :  { %v1565_v16 = vcombine.high %v1564_v49, %v1564_v49  ;;  %v2030_v51 = vsel %vm1630_vm4, %v1541_v56, -inf  ;;  %v2038_v50 = vrot.slane %v2037_v55, 4  ;;  %v2051_v33 = vsel %vm1630_vm4, %v1556_v17, -inf }
 0x208   :  { %v2031_v3 = vrot.slane %v2030_v51, 4  ;;  %v2044_v10 = vsel %vm1630_vm4, %v1549_v45, -inf  ;;  %v2025_v39 = vmax.f32 %v2023_v43, %v2024_v58  ;;  %v2052_v59 = vrot.slane %v2051_v33, 4 }
 0x209   :  { %v2045_v34 = vrot.slane %v2044_v10, 4  ;;  %v2058_v32 = vsel %vm1630_vm4, %v1557_v15, -inf  ;;  %v2039_v37 = vmax.f32 %v2037_v55, %v2038_v50  ;;  %v2065_v6 = vsel %vm1630_vm4, %v1564_v49, -inf }
 0x20a   :  { %v2032_v53 = vmax.f32 %v2030_v51, %v2031_v3  ;;  %v2059_v26 = vrot.slane %v2058_v32, 4  ;;  %v2026_v21 = vrot.slane %v2025_v39, 2  ;;  %v2053_v63 = vmax.f32 %v2051_v33, %v2052_v59 }
 0x20b   :  { %v2046_v42 = vmax.f32 %v2044_v10, %v2045_v34  ;;  %v2066_v18 = vrot.slane %v2065_v6, 4  ;;  %v2040_v28 = vrot.slane %v2039_v37, 2  ;;  %v2072_v17 = vsel %vm1630_vm4, %v1565_v16, -inf }
 0x20c   :  { %v2033_v1 = vrot.slane %v2032_v53, 2  ;;  %v2060_v56 = vmax.f32 %v2058_v32, %v2059_v26  ;;  %v2027_v45 = vmax.f32 %v2025_v39, %v2026_v21  ;;  %v2054_v58 = vrot.slane %v2053_v63, 2 }
 0x20d   :  { %v2047_v43 = vrot.slane %v2046_v42, 2  ;;  %v2067_v15 = vmax.f32 %v2065_v6, %v2066_v18  ;;  %v2041_v55 = vmax.f32 %v2039_v37, %v2040_v28  ;;  %v2073_v50 = vrot.slane %v2072_v17, 4 }
 0x20e   :  { %v2034_v51 = vmax.f32 %v2032_v53, %v2033_v1  ;;  %v2061_v3 = vrot.slane %v2060_v56, 2  ;;  %v2028_v49 = vrot.slane %v2027_v45, 1  ;;  %v2055_v10 = vmax.f32 %v2053_v63, %v2054_v58  ;;  %v6854_v58 = vld [vmem:[#allocation27_spill] sm:$0xff] }
 0x20f   :  { %v2048_v47 = vmax.f32 %v2046_v42, %v2047_v43  ;;  %v2068_v33 = vrot.slane %v2067_v15, 2  ;;  %v2042_v59 = vrot.slane %v2041_v55, 1  ;;  %v2074_v14 = vmax.f32 %v2072_v17, %v2073_v50  ;;  %v2961_v42 = vld [vmem:[#allocation7 + $0x8f0] sm:$0xff] }
 0x210   :  { %v2035_v34 = vrot.slane %v2034_v51, 1  ;;  %v2062_v40 = vmax.f32 %v2060_v56, %v2061_v3  ;;  %v2022_v32 = vmax.f32 %v2020_v25, %v2021_v19  ;;  %v2029_v26 = vmax.f32 %v2027_v45, %v2028_v49 }
 0x211   :  { %v2056_v16 = vrot.slane %v2055_v10, 1  ;;  %v2049_v54 = vrot.slane %v2048_v47, 1  ;;  %v2069_v21 = vmax.f32 %v2067_v15, %v2068_v33  ;;  %v2075_v6 = vrot.slane %v2074_v14, 2  ;;  %v6856_v33 = vld [vmem:[#allocation29_spill] sm:$0xff] }
 0x212   :  { %v2036_v39 = vmax.f32 %v2034_v51, %v2035_v34  ;;  %v2063_v60 = vrot.slane %v2062_v40, 1  ;;  %v2043_v53 = vmax.f32 %v2041_v55, %v2042_v59  ;;  %v6845_v1 = vand.u32 15, %v6167_v20 }
 0x213   :  { %v2057_v37 = vmax.f32 %v2055_v10, %v2056_v16  ;;  %v2050_v18 = vmax.f32 %v2048_v47, %v2049_v54  ;;  %v2076_v28 = vmax.f32 %v2074_v14, %v2075_v6  ;;  %v2220_v25 = vsel %vm2206_vm5, %v5889_v36, %v5880_v7  ;;  %v6848_v54 = vld [vmem:[#allocation35_spill] sm:$0xff]  ;;  %v6851_v7 = vld [vmem:[#allocation33_spill] sm:$0xff]  ;;  %v6852_v36 = vld [vmem:[#allocation26_spill] sm:$0xff] }
 0x214   :  { %vm6231_vm9 = vcmp.lt.s32.totalorder %v6845_v1, 14  ;;  %v2064_v63 = vmax.f32 %v2062_v40, %v2063_v60  ;;  %v2221_v19 = vsel %vm2208_vm6, %v5894_v52, %v2220_v25  ;;  %v2262_v47 = vsel %vm2206_vm5, %v6209_v2, %v6202_v22  ;;  %v6850_v40 = vld [vmem:[#allocation34_spill] sm:$0xff]  ;;  %v6853_v52 = vld [vmem:[#allocation28_spill] sm:$0xff] }
 0x215   :  { %v6849_v20 = vrot.slane %v6848_v54, 1  ;;  %v2077_v17 = vrot.slane %v2076_v28, 1  ;;  %v2222_v14 = vsel %vm2210_vm7, %v6850_v40, %v2221_v19  ;;  %v2263_v60 = vsel %vm2208_vm6, %v6204_v12, %v2262_v47  ;;  %v6855_v12 = vld [vmem:[#allocation36_spill] sm:$0xff]  ;;  %v2378_v40 = vld [vmem:[#allocation7 + $0x5e0] sm:$0xff] }
 0x216   :  { %v2211_v45 = vsel %vm2210_vm7, %v6852_v36, %v6851_v7  ;;  %v2223_v43 = vsel %vm2212_vm8, %v6853_v52, %v2222_v14  ;;  %v2264_v22 = vsel %vm2210_vm7, %v2022_v32, %v2263_v60  ;;  %v2070_v2 = vrot.slane %v2069_v21, 1  ;;  %v2380_v14 = vld [vmem:[#allocation7 + $0x5f0] sm:$0xff]  ;;  %v2375_v52 = vld [vmem:[#allocation7 + $0x5c8] sm:$0xff] }
 0x217   :  { %v1735_v56 = vmax.f32 %v6848_v54, %v6849_v20  ;;  %v2213_v15 = vsel %vm2212_vm8, %v6854_v58, %v2211_v45  ;;  %v2078_v51 = vmax.f32 %v2076_v28, %v2077_v17  ;;  %v2224_v55 = vsel %vm2214_vm10, %v6176_v23, %v2223_v43  ;;  %v2377_v43 = vld [vmem:[#allocation7 + $0x5d8] sm:$0xff]  ;;  %v2376_v58 = vld [vmem:[#allocation7 + $0x5d0] sm:$0xff] }
 0x218   :  { %v2265_v3 = vsel %vm2212_vm8, %v2036_v39, %v2264_v22  ;;  %v2215_v50 = vsel %vm2214_vm10, %v6855_v12, %v2213_v15  ;;  %v2225_v49 = vsel %vm2216_vm11, %v6179_v31, %v2224_v55  ;;  %v2257_v59 = vsel %vm2210_vm7, %v6215_v41, %v6221_v29  ;;  %v2373_v12 = vld [vmem:[#allocation7 + $0x5b8] sm:$0xff] }
 0x219   :  { %v2266_v10 = vsel %vm2214_vm10, %v2050_v18, %v2265_v3  ;;  %v2217_v34 = vsel %vm2216_vm11, %v6856_v33, %v2215_v50  ;;  %v6273_v23 = vsel %vm2218_vm12, %v6200_v44, %v2225_v49  ;;  %v2258_v31 = vsel %vm2212_vm8, %v2029_v26, %v2257_v59  ;;  %v2371_v3 = vld [vmem:[#allocation7 + $0x5a8] sm:$0xff]  ;;  %v2370_v33 = vld [vmem:[#allocation7 + $0x5a0] sm:$0xff]  ;;  %v6862_v59 = vld [vmem:[#allocation32_spill] sm:$0xff] }
 0x21a   :  { %v2267_v32 = vsel %vm2216_vm11, %v2064_v63, %v2266_v10  ;;  %v6277_v16 = vsel %vm2218_vm12, %v1735_v56, %v2217_v34  ;;  %v2286_v6 = vrot.slane %v6273_v23, 7  ;;  %v2071_v18 = vmax.f32 %v2069_v21, %v2070_v2  ;;  %v2374_v2 = vld [vmem:[#allocation7 + $0x5c0] sm:$0xff]  ;;  %v2372_v34 = vld [vmem:[#allocation7 + $0x5b0] sm:$0xff] }
 0x21b   :  { %v6281_v39 = vsel %vm2218_vm12, %v2078_v51, %v2267_v32  ;;  %v2259_v1 = vsel %vm2214_vm10, %v2043_v53, %v2258_v31  ;;  %v1825_v29 = vrot.slane %v6041_v11, 1  ;;  %v1839_v63 = vrot.slane %v6073_v27, 1 }
 0x21c   :  { %v6288_v44 = vsel %vm6231_vm9, %v6281_v39, 0.0  ;;  %v2260_v41 = vsel %vm2216_vm11, %v2057_v37, %v2259_v1  ;;  %v6857_v21 = vrot.slane %v6024_v8, 4  ;;  %v2079_v25 = vadd.s32 8, %v6843_v61 }
 0x21d   :  { %v2292_v26 = vrot.slane %v6288_v44, 7  ;;  %v6295_v28 = vsel %vm2218_vm12, %v2071_v18, %v2260_v41  ;;  %v6858_v19 = vrot.slane %v6132_v0, 1  ;;  %v2285_v54 = vrot.slane %v6277_v16, 7  ;;  %v2367_v41 = vld [vmem:[#allocation7 + $0x588] sm:$0xff] }
 0x21e   :  { %v1850_v53 = vmax.f32 %v6024_v8, %v6857_v21  ;;  %v6309_v37 = vsel %vm6231_vm9, %v6295_v28, 0.0  ;;  %v2234_v20 = vsel %vm2206_vm5, %v6008_v9, %v6004_v62  ;;  %v1826_v56 = vmax.f32 %v6041_v11, %v1825_v29  ;;  %v2369_v29 = vld [vmem:[#allocation7 + $0x598] sm:$0xff] }
 0x21f   :  { %v6304_v47 = vmax.f32 %v6132_v0, %v6858_v19  ;;  %v2300_v8 = vsel %vm152_vm1, %v2292_v26, %v2286_v6  ;;  %v2291_v0 = vrot.slane %v6309_v37, 7  ;;  %v1840_v60 = vmax.f32 %v6073_v27, %v1839_v63  ;;  %v6867_v19 = vld [vmem:[#allocation42_spill] sm:$0xff] }
 0x220   :  { %v1851_v17 = vrot.slane %v1850_v53, 2  ;;  %2638 = vmatprep.mubr.f32.mxu0 %v2300_v8  ;;  %2727 = vmatprep.mubr.f32.mxu1 %v2300_v8  ;;  %v2093_v7 = vand.u32 15, %v2079_v25  ;;  %v2235_v62 = vsel %vm2208_vm6, %v6012_v38, %v2234_v20  ;;  %v1844_v9 = vrot.slane %v6026_v48, 2  ;;  %v6866_v25 = vld [vmem:[#allocation30_spill] sm:$0xff] }
 0x221   :  { %v2299_v11 = vsel %vm152_vm1, %v2291_v0, %v2285_v54  ;;  %v2236_v45 = vsel %vm2210_vm7, %v6016_v24, %v2235_v62  ;;  %v6859_v27 = vrot.slane %v6021_v4, 1  ;;  %v2228_v51 = vsel %vm2208_vm6, %v6010_v35, %v6019_v13  ;;  %v6861_v13 = vld [vmem:[#allocation37_spill] sm:$0xff]  ;;  %v2363_v62 = vld [vmem:[#allocation7 + $0x568] sm:$0xff] }
 0x222   :  { %v1852_v36 = vmax.f32 %v1850_v53, %v1851_v17  ;;  %2639 = vmatmul.mubr.f32.vlgmr.msra.gmra.mxu0 %v2299_v11  ;;  %2728 = vmatmul.mubr.f32.vlgmr.msra.gmra.mxu1 %v2299_v11  ;;  %v2237_v38 = vsel %vm2212_vm8, %v6080_v46, %v2236_v45  ;;  %v1845_v15 = vmax.f32 %v6026_v48, %v1844_v9  ;;  %v1937_v24 = vrot.slane %v6169_v30, 1  ;;  %v2366_v8 = vld [vmem:[#allocation7 + $0x580] sm:$0xff]  ;;  %v2365_v9 = vld [vmem:[#allocation7 + $0x578] sm:$0xff] }
 0x223   :  { %v1819_v22 = vmax.f32 %v6021_v4, %v6859_v27  ;;  %2753 = vmatpush1.msra.mxu0 %v2378_v40  ;;  %2842 = vmatpush1.msra.mxu1 %v2380_v14  ;;  %v2238_v4 = vsel %vm2214_vm10, %v1826_v56, %v2237_v38  ;;  %v6860_v50 = vrot.slane %v6047_v5, 1  ;;  %v2229_v48 = vsel %vm2210_vm7, %v6014_v57, %v2228_v51  ;;  %v6863_v57 = vld [vmem:[#allocation24_spill] sm:$0xff]  ;;  %v2362_v27 = vld [vmem:[#allocation7 + $0x560] sm:$0xff] }
 0x224   :  { %v1853_v55 = vrot.slane %v1852_v36, 1  ;;  %v2239_v49 = vsel %vm2216_vm11, %v1840_v60, %v2238_v4  ;;  %2754 = vmatprep.subr.mxu0 %v2375_v52  ;;  %2843 = vmatprep.subr.mxu1 %v2377_v43  ;;  %v1846_v35 = vrot.slane %v1845_v15, 1  ;;  %v2230_v10 = vsel %vm2212_vm8, %v6861_v13, %v2229_v48  ;;  %v2368_v56 = vld [vmem:[#allocation7 + $0x590] sm:$0xff]  ;;  %v2359_v13 = vld [vmem:[#allocation7 + $0x548] sm:$0xff]  ;;  %v2975_v63 = vld [vmem:[#allocation7 + $0x960] sm:$0xff] }
 0x225   :  { %v1833_v46 = vmax.f32 %v6047_v5, %v6860_v50  ;;  %v1951_v32 = vrot.slane %v6862_v59, 1  ;;  %2755 = vmatpush1.msra.mxu0 %v2374_v2  ;;  %2844 = vmatpush1.msra.mxu1 %v2376_v58  ;;  %v2231_v5 = vsel %vm2214_vm10, %v1819_v22, %v2230_v10  ;;  %v1938_v18 = vmax.f32 %v6169_v30, %v1937_v24  ;;  %v6868_v30 = vld [vmem:[#allocation46_spill] sm:$0xff]  ;;  %v6869_v60 = vld [vmem:[#allocation39_spill] sm:$0xff]  ;;  %v6870_v52 = vld [vmem:[#allocation44_spill] sm:$0xff] }
 0x226   :  { %v1854_v31 = vmax.f32 %v1852_v36, %v1853_v55  ;;  %v1963_v1 = vrot.slane %v6863_v57, 2  ;;  %vm6358_vm13 = vcmp.lt.s32.totalorder %v2093_v7, 14  ;;  %2756 = vmatprep.subr.mxu0 %v2371_v3  ;;  %2845 = vmatprep.subr.mxu1 %v2373_v12  ;;  %v1847_v21 = vmax.f32 %v1845_v15, %v1846_v35  ;;  %v6871_v15 = vld [vmem:[#allocation40_spill] sm:$0xff]  ;;  %v6873_v3 = vld [vmem:[#allocation47_spill] sm:$0xff] }
 0x227   :  { %v2232_v53 = vsel %vm2216_vm11, %v1833_v46, %v2231_v5  ;;  %v2248_v20 = vsel %vm2206_vm5, %v6867_v19, %v6866_v25  ;;  %v1956_v17 = vrot.slane %v6868_v30, 2  ;;  %2757 = vmatpush1.msra.mxu0 %v2370_v33  ;;  %2846 = vmatpush1.msra.mxu1 %v2372_v34  ;;  %v1952_v45 = vmax.f32 %v6862_v59, %v1951_v32  ;;  %v2364_v35 = vld [vmem:[#allocation7 + $0x570] sm:$0xff]  ;;  %v6875_v33 = vld [vmem:[#allocation45_spill] sm:$0xff] }
 0x228   :  { %v6368_v40 = vsel %vm2218_vm12, %v1854_v31, %v2239_v49  ;;  %v1964_v14 = vmax.f32 %v6863_v57, %v1963_v1  ;;  %v2249_v7 = vsel %vm2208_vm6, %v6869_v60, %v2248_v20  ;;  %v6379_v36 = vsel %vm2218_vm12, %v1847_v21, %v2232_v53  ;;  %2758 = vmatprep.subr.mxu0 %v2367_v41  ;;  %v6876_v34 = vld [vmem:[#allocation31_spill] sm:$0xff]  ;;  %v2358_v32 = vld [vmem:[#allocation7 + $0x540] sm:$0xff] }
 0x229   :  { %v6376_v11 = vsel %vm6358_vm13, %v6368_v40, 0.0  ;;  %v2250_v43 = vsel %vm2210_vm7, %v6870_v52, %v2249_v7  ;;  %2847 = vmatprep.subr.mxu1 %v2369_v29  ;;  %v6388_v38 = vsel %vm6358_vm13, %v6379_v36, 0.0  ;;  %2759 = vmatpush1.msra.mxu0 %v2366_v8  ;;  %v6872_v51 = vrot.slane %v6871_v15, 1  ;;  %v6877_v1 = vld [vmem:[#allocation43_spill] sm:$0xff]  ;;  %v6878_v25 = vld [vmem:[#allocation41_spill] sm:$0xff] }
 0x22a   :  { %v2288_v22 = vrot.slane %v6376_v11, 7  ;;  %v1965_v2 = vrot.slane %v1964_v14, 1  ;;  %v2251_v58 = vsel %vm2212_vm8, %v6304_v47, %v2250_v43  ;;  %2848 = vmatpush1.msra.mxu1 %v2368_v56  ;;  %v2287_v55 = vrot.slane %v6388_v38, 7  ;;  %2760 = vmatprep.subr.mxu0 %v2363_v62  ;;  %v2355_v29 = vld [vmem:[#allocation7 + $0x528] sm:$0xff]  ;;  %v2354_v60 = vld [vmem:[#allocation7 + $0x520] sm:$0xff] }
 0x22b   :  { %v1917_v24 = vmax.f32 %v6871_v15, %v6872_v51  ;;  %v2252_v4 = vsel %vm2214_vm10, %v1938_v18, %v2251_v58  ;;  %2849 = vmatprep.subr.mxu1 %v2365_v9  ;;  %v6874_v12 = vrot.slane %v6873_v3, 1  ;;  %v1957_v49 = vmax.f32 %v6868_v30, %v1956_v17  ;;  %2761 = vmatpush1.msra.mxu0 %v2362_v27  ;;  %v2351_v52 = vld [vmem:[#allocation7 + $0x508] sm:$0xff]  ;;  %v2353_v27 = vld [vmem:[#allocation7 + $0x518] sm:$0xff]  ;;  %v2352_v15 = vld [vmem:[#allocation7 + $0x510] sm:$0xff] }
 0x22c   :  { %v2298_v47 = vsel %vm152_vm1, %v2286_v6, %v2288_v22  ;;  %v1966_v46 = vmax.f32 %v1964_v14, %v1965_v2  ;;  %v2253_v48 = vsel %vm2216_vm11, %v1952_v45, %v2252_v4  ;;  %v2297_v10 = vsel %vm152_vm1, %v2285_v54, %v2287_v55  ;;  %v2361_v6 = vld [vmem:[#allocation7 + $0x558] sm:$0xff]  ;;  %v2360_v54 = vld [vmem:[#allocation7 + $0x550] sm:$0xff]  ;;  %2850 = vmatpush1.msra.mxu1 %v2364_v35  ;;  %v2350_v2 = vld [vmem:[#allocation7 + $0x500] sm:$0xff] }
 0x22d   :  { %v1931_v50 = vmax.f32 %v6873_v3, %v6874_v12  ;;  %2644 = vmatprep.mubr.f32.mxu0 %v2298_v47  ;;  %2733 = vmatprep.mubr.f32.mxu1 %v2298_v47  ;;  %v2242_v59 = vsel %vm2208_vm6, %v6876_v34, %v6875_v33  ;;  %v2302_v31 = vrot.slane %v6273_v23, 1  ;;  %v2304_v5 = vrot.slane %v6376_v11, 1  ;;  %v2357_v14 = vld [vmem:[#allocation7 + $0x538] sm:$0xff]  ;;  %v2356_v45 = vld [vmem:[#allocation7 + $0x530] sm:$0xff]  ;;  %v2347_v51 = vld [vmem:[#allocation7 + $0x4e8] sm:$0xff] }
 0x22e   :  { %2645 = vmatmul.mubr.f32.gmra.mxu0 %v2297_v10  ;;  %2734 = vmatmul.mubr.f32.gmra.mxu1 %v2297_v10  ;;  %v6416_v18 = vsel %vm2218_vm12, %v1966_v46, %v2253_v48  ;;  %v1958_v57 = vrot.slane %v1957_v49, 1  ;;  %v2243_v41 = vsel %vm2210_vm7, %v6877_v1, %v2242_v59  ;;  %v2308_v21 = vrot.slane %v6288_v44, 1  ;;  %v2349_v4 = vld [vmem:[#allocation7 + $0x4f8] sm:$0xff]  ;;  %v2346_v3 = vld [vmem:[#allocation7 + $0x4e0] sm:$0xff]  ;;  %v2348_v12 = vld [vmem:[#allocation7 + $0x4f0] sm:$0xff] }
 0x22f   :  { %v2290_v53 = vrot.slane %v6416_v18, 7  ;;  %v6879_v19 = vrot.slane %v6878_v25, 1  ;;  %v2244_v8 = vsel %vm2212_vm8, %v1917_v24, %v2243_v41  ;;  %2762 = vmatprep.subr.mxu0 %v2359_v13  ;;  %v6430_v56 = vsel %vm169_vm3, %v2302_v31, %v2304_v5  ;;  %2851 = vmatprep.subr.mxu1 %v2361_v6  ;;  %v2345_v47 = vld [vmem:[#allocation7 + $0x4d8] sm:$0xff]  ;;  %v2342_v46 = vld [vmem:[#allocation7 + $0x4c0] sm:$0xff]  ;;  %v2339_v48 = vld [vmem:[#allocation7 + $0x4a8] sm:$0xff] }
 0x230   :  { %v1959_v30 = vmax.f32 %v1957_v49, %v1958_v57  ;;  %v2245_v17 = vsel %vm2214_vm10, %v1931_v50, %v2244_v8  ;;  %2763 = vmatpush1.msra.mxu0 %v2358_v32  ;;  %v6437_v7 = vsel %vm169_vm3, %v2308_v21, %v2302_v31  ;;  %2852 = vmatpush1.msra.mxu1 %v2360_v54  ;;  %v2343_v50 = vld [vmem:[#allocation7 + $0x4c8] sm:$0xff]  ;;  %v2341_v49 = vld [vmem:[#allocation7 + $0x4b8] sm:$0xff]  ;;  %v2338_v35 = vld [vmem:[#allocation7 + $0x4a0] sm:$0xff] }
 0x231   :  { %v1945_v20 = vmax.f32 %v6878_v25, %v6879_v19  ;;  %v2296_v62 = vsel %vm152_vm1, %v2288_v22, %v2290_v53  ;;  %2764 = vmatprep.subr.mxu0 %v2355_v29  ;;  %2853 = vmatprep.subr.mxu1 %v2357_v14  ;;  %v2294_v24 = vsel %vm152_vm1, %v2290_v53, %v2292_v26  ;;  %v2344_v26 = vld [vmem:[#allocation7 + $0x4d0] sm:$0xff]  ;;  %v2335_v13 = vld [vmem:[#allocation7 + $0x488] sm:$0xff]  ;;  %v2337_v10 = vld [vmem:[#allocation7 + $0x498] sm:$0xff] }
 0x232   :  { %2650 = vmatprep.mubr.f32.mxu0 %v2296_v62  ;;  %2739 = vmatprep.mubr.f32.mxu1 %v2296_v62  ;;  %v2334_v33 = vld [vmem:[#allocation7 + $0x480] sm:$0xff]  ;;  %v2336_v34 = vld [vmem:[#allocation7 + $0x490] sm:$0xff]  ;;  %v2331_v59 = vld [vmem:[#allocation7 + $0x468] sm:$0xff] }
 0x233   :  { %v2246_v9 = vsel %vm2216_vm11, %v1945_v20, %v2245_v17  ;;  %2765 = vmatpush1.msra.mxu0 %v2354_v60  ;;  %2854 = vmatpush1.msra.mxu1 %v2356_v45  ;;  %v2330_v6 = vld [vmem:[#allocation7 + $0x460] sm:$0xff]  ;;  %v2332_v32 = vld [vmem:[#allocation7 + $0x470] sm:$0xff]  ;;  %v2327_v31 = vld [vmem:[#allocation7 + $0x448] sm:$0xff] }
 0x234   :  { %v6443_v43 = vsel %vm2218_vm12, %v1959_v30, %v2246_v9  ;;  %2766 = vmatprep.subr.mxu0 %v2351_v52  ;;  %2855 = vmatprep.subr.mxu1 %v2353_v27  ;;  %v2329_v57 = vld [vmem:[#allocation7 + $0x458] sm:$0xff]  ;;  %v2326_v1 = vld [vmem:[#allocation7 + $0x440] sm:$0xff]  ;;  %v2328_v41 = vld [vmem:[#allocation7 + $0x450] sm:$0xff] }
 0x235   :  { %v2289_v58 = vrot.slane %v6443_v43, 7  ;;  %2767 = vmatpush1.msra.mxu0 %v2350_v2  ;;  %2856 = vmatpush1.msra.mxu1 %v2352_v15  ;;  %v2323_v54 = vld [vmem:[#allocation7 + $0x428] sm:$0xff]  ;;  %v2325_v29 = vld [vmem:[#allocation7 + $0x438] sm:$0xff]  ;;  %v2322_v53 = vld [vmem:[#allocation7 + $0x420] sm:$0xff] }
 0x236   :  { %2768 = vmatprep.subr.mxu0 %v2347_v51  ;;  %2857 = vmatprep.subr.mxu1 %v2349_v4  ;;  %v2324_v25 = vld [vmem:[#allocation7 + $0x430] sm:$0xff]  ;;  %v2319_v19 = vld [vmem:[#allocation7 + $0x408] sm:$0xff]  ;;  %v2321_v20 = vld [vmem:[#allocation7 + $0x418] sm:$0xff] }
 0x237   :  { %v2295_v22 = vsel %vm152_vm1, %v2287_v55, %v2289_v58  ;;  %v2293_v55 = vsel %vm152_vm1, %v2289_v58, %v2291_v0  ;;  %2769 = vmatpush1.msra.mxu0 %v2346_v3  ;;  %2858 = vmatpush1.msra.mxu1 %v2348_v12  ;;  %v2340_v0 = vld [vmem:[#allocation7 + $0x4b0] sm:$0xff]  ;;  %v2318_v8 = vld [vmem:[#allocation7 + $0x400] sm:$0xff]  ;;  %v2443_v17 = vld [vmem:[#allocation7 + $0x7e8] sm:$0xff] }
 0x238   :  { %2651 = vmatmul.mubr.f32.gmra.mxu0 %v2295_v22  ;;  %2740 = vmatmul.mubr.f32.gmra.mxu1 %v2295_v22  ;;  %v2320_v30 = vld [vmem:[#allocation7 + $0x410] sm:$0xff]  ;;  %v2445_v14 = vld [vmem:[#allocation7 + $0x7f8] sm:$0xff]  ;;  %v2442_v60 = vld [vmem:[#allocation7 + $0x7e0] sm:$0xff] }
 0x239   :  { %2656 = vmatprep.mubr.f32.mxu0 %v2294_v24  ;;  %2745 = vmatprep.mubr.f32.mxu1 %v2294_v24  ;;  %v2444_v62 = vld [vmem:[#allocation7 + $0x7f0] sm:$0xff]  ;;  %v2439_v9 = vld [vmem:[#allocation7 + $0x7c8] sm:$0xff]  ;;  %v2441_v45 = vld [vmem:[#allocation7 + $0x7d8] sm:$0xff] }
 0x23a   :  { %2770 = vmatprep.subr.mxu0 %v2343_v50  ;;  %2859 = vmatprep.subr.mxu1 %v2345_v47  ;;  %v2438_v52 = vld [vmem:[#allocation7 + $0x7c0] sm:$0xff]  ;;  %v2440_v27 = vld [vmem:[#allocation7 + $0x7d0] sm:$0xff]  ;;  %v2435_v2 = vld [vmem:[#allocation7 + $0x7a8] sm:$0xff] }
 0x23b   :  { %2771 = vmatpush1.msra.mxu0 %v2342_v46  ;;  %2860 = vmatpush1.msra.mxu1 %v2344_v26  ;;  %v2437_v58 = vld [vmem:[#allocation7 + $0x7b8] sm:$0xff]  ;;  %v2434_v22 = vld [vmem:[#allocation7 + $0x7a0] sm:$0xff]  ;;  %v2436_v15 = vld [vmem:[#allocation7 + $0x7b0] sm:$0xff] }
 0x23c   :  { %2657 = vmatmul.mubr.f32.gmra.mxu0 %v2293_v55  ;;  %2746 = vmatmul.mubr.f32.gmra.mxu1 %v2293_v55  ;;  %v2431_v51 = vld [vmem:[#allocation7 + $0x788] sm:$0xff]  ;;  %v2433_v24 = vld [vmem:[#allocation7 + $0x798] sm:$0xff]  ;;  %v2430_v4 = vld [vmem:[#allocation7 + $0x780] sm:$0xff] }
 0x23d   :  { %2816 = vmatprep.mubr.f32.mxu0 %v6273_v23  ;;  %2905 = vmatprep.mubr.f32.mxu1 %v6273_v23  ;;  %v2333_v23 = vld [vmem:[#allocation7 + $0x478] sm:$0xff]  ;;  %v2432_v3 = vld [vmem:[#allocation7 + $0x790] sm:$0xff]  ;;  %v2427_v55 = vld [vmem:[#allocation7 + $0x768] sm:$0xff] }
 0x23e   :  { %2772 = vmatprep.subr.mxu0 %v2339_v48  ;;  %2861 = vmatprep.subr.mxu1 %v2341_v49  ;;  %v2429_v12 = vld [vmem:[#allocation7 + $0x778] sm:$0xff]  ;;  %v2426_v50 = vld [vmem:[#allocation7 + $0x760] sm:$0xff]  ;;  %v2428_v47 = vld [vmem:[#allocation7 + $0x770] sm:$0xff] }
 0x23f   :  { %2773 = vmatpush1.msra.mxu0 %v2338_v35  ;;  %2862 = vmatpush1.msra.mxu1 %v2340_v0  ;;  %v2423_v46 = vld [vmem:[#allocation7 + $0x748] sm:$0xff]  ;;  %v2425_v26 = vld [vmem:[#allocation7 + $0x758] sm:$0xff]  ;;  %v2422_v48 = vld [vmem:[#allocation7 + $0x740] sm:$0xff] }
 0x240   :  { %2774 = vmatprep.subr.mxu0 %v2335_v13  ;;  %2863 = vmatprep.subr.mxu1 %v2337_v10  ;;  %v2424_v49 = vld [vmem:[#allocation7 + $0x750] sm:$0xff]  ;;  %v2419_v35 = vld [vmem:[#allocation7 + $0x728] sm:$0xff]  ;;  %v2421_v0 = vld [vmem:[#allocation7 + $0x738] sm:$0xff] }
 0x241   :  { %2775 = vmatpush1.msra.mxu0 %v2334_v33  ;;  %2864 = vmatpush1.msra.mxu1 %v2336_v34  ;;  %v2418_v13 = vld [vmem:[#allocation7 + $0x720] sm:$0xff]  ;;  %v2420_v10 = vld [vmem:[#allocation7 + $0x730] sm:$0xff]  ;;  %v2415_v33 = vld [vmem:[#allocation7 + $0x708] sm:$0xff] }
 0x242   :  { %2776 = vmatprep.subr.mxu0 %v2331_v59  ;;  %2865 = vmatprep.subr.mxu1 %v2333_v23  ;;  %v2417_v34 = vld [vmem:[#allocation7 + $0x718] sm:$0xff]  ;;  %v2414_v59 = vld [vmem:[#allocation7 + $0x700] sm:$0xff]  ;;  %v2416_v23 = vld [vmem:[#allocation7 + $0x710] sm:$0xff] }
 0x243   :  { %2777 = vmatpush1.msra.mxu0 %v2330_v6  ;;  %2866 = vmatpush1.msra.mxu1 %v2332_v32  ;;  %v2411_v6 = vld [vmem:[#allocation7 + $0x6e8] sm:$0xff]  ;;  %v2413_v32 = vld [vmem:[#allocation7 + $0x6f8] sm:$0xff] }
 0x244   :  { %2778 = vmatprep.subr.mxu0 %v2327_v31  ;;  %2867 = vmatprep.subr.mxu1 %v2329_v57  ;;  %v2410_v31 = vld [vmem:[#allocation7 + $0x6e0] sm:$0xff]  ;;  %v2412_v57 = vld [vmem:[#allocation7 + $0x6f0] sm:$0xff] }
 0x245   :  { %2779 = vmatpush1.msra.mxu0 %v2326_v1  ;;  %2868 = vmatpush1.msra.mxu1 %v2328_v41  ;;  %v2407_v1 = vld [vmem:[#allocation7 + $0x6c8] sm:$0xff]  ;;  %v2409_v41 = vld [vmem:[#allocation7 + $0x6d8] sm:$0xff] }
 0x246   :  { %2780 = vmatprep.subr.mxu0 %v2323_v54  ;;  %2869 = vmatprep.subr.mxu1 %v2325_v29  ;;  %v2406_v54 = vld [vmem:[#allocation7 + $0x6c0] sm:$0xff]  ;;  %v2408_v29 = vld [vmem:[#allocation7 + $0x6d0] sm:$0xff] }
 0x247   :  { %2781 = vmatpush1.msra.mxu0 %v2322_v53  ;;  %2870 = vmatpush1.msra.mxu1 %v2324_v25  ;;  %v2403_v53 = vld [vmem:[#allocation7 + $0x6a8] sm:$0xff]  ;;  %v2405_v25 = vld [vmem:[#allocation7 + $0x6b8] sm:$0xff] }
 0x248   :  { %2782 = vmatprep.subr.mxu0 %v2319_v19  ;;  %2871 = vmatprep.subr.mxu1 %v2321_v20  ;;  %v2402_v19 = vld [vmem:[#allocation7 + $0x6a0] sm:$0xff]  ;;  %v2404_v20 = vld [vmem:[#allocation7 + $0x6b0] sm:$0xff] }
 0x249   :  { %2783 = vmatpush1.msra.mxu0 %v2318_v8  ;;  %2872 = vmatpush1.msra.mxu1 %v2320_v30  ;;  %v2399_v8 = vld [vmem:[#allocation7 + $0x688] sm:$0xff]  ;;  %v2401_v30 = vld [vmem:[#allocation7 + $0x698] sm:$0xff] }
 0x24a   :  { %2784 = vmatprep.subr.mxu0 %v2443_v17  ;;  %2873 = vmatprep.subr.mxu1 %v2445_v14  ;;  %v2398_v17 = vld [vmem:[#allocation7 + $0x680] sm:$0xff]  ;;  %v2400_v14 = vld [vmem:[#allocation7 + $0x690] sm:$0xff] }
 0x24b   :  { %2785 = vmatpush2.msra.mxu0 %v2442_v60  ;;  %2874 = vmatpush2.msra.mxu1 %v2444_v62  ;;  %v2395_v60 = vld [vmem:[#allocation7 + $0x668] sm:$0xff]  ;;  %v2397_v62 = vld [vmem:[#allocation7 + $0x678] sm:$0xff] }
 0x24c   :  { %2786 = vmatprep.subr.mxu0 %v2439_v9  ;;  %2875 = vmatprep.subr.mxu1 %v2441_v45  ;;  %v2394_v9 = vld [vmem:[#allocation7 + $0x660] sm:$0xff]  ;;  %v2396_v45 = vld [vmem:[#allocation7 + $0x670] sm:$0xff] }
 0x24d   :  { %2787 = vmatpush2.msra.mxu0 %v2438_v52  ;;  %2876 = vmatpush2.msra.mxu1 %v2440_v27  ;;  %v2391_v52 = vld [vmem:[#allocation7 + $0x648] sm:$0xff]  ;;  %v2393_v27 = vld [vmem:[#allocation7 + $0x658] sm:$0xff] }
 0x24e   :  { %2788 = vmatprep.subr.mxu0 %v2435_v2  ;;  %2877 = vmatprep.subr.mxu1 %v2437_v58  ;;  %v2390_v2 = vld [vmem:[#allocation7 + $0x640] sm:$0xff]  ;;  %v2392_v58 = vld [vmem:[#allocation7 + $0x650] sm:$0xff] }
 0x24f   :  { %2789 = vmatpush2.msra.mxu0 %v2434_v22  ;;  %2878 = vmatpush2.msra.mxu1 %v2436_v15  ;;  %v2387_v22 = vld [vmem:[#allocation7 + $0x628] sm:$0xff]  ;;  %v2389_v15 = vld [vmem:[#allocation7 + $0x638] sm:$0xff] }
 0x250   :  { %2790 = vmatprep.subr.mxu0 %v2431_v51  ;;  %2879 = vmatprep.subr.mxu1 %v2433_v24  ;;  %v2386_v51 = vld [vmem:[#allocation7 + $0x620] sm:$0xff]  ;;  %v2388_v24 = vld [vmem:[#allocation7 + $0x630] sm:$0xff] }
 0x251   :  { %2791 = vmatpush2.msra.mxu0 %v2430_v4  ;;  %2880 = vmatpush2.msra.mxu1 %v2432_v3  ;;  %v2383_v4 = vld [vmem:[#allocation7 + $0x608] sm:$0xff]  ;;  %v2385_v3 = vld [vmem:[#allocation7 + $0x618] sm:$0xff] }
 0x252   :  { %2792 = vmatprep.subr.mxu0 %v2427_v55  ;;  %2881 = vmatprep.subr.mxu1 %v2429_v12  ;;  %v2382_v55 = vld [vmem:[#allocation7 + $0x600] sm:$0xff]  ;;  %v2384_v12 = vld [vmem:[#allocation7 + $0x610] sm:$0xff] }
 0x253   :  { %2793 = vmatpush2.msra.mxu0 %v2426_v50  ;;  %2882 = vmatpush2.msra.mxu1 %v2428_v47  ;;  %v2992_v50 = vld [vmem:[#allocation7 + $0x9e8] sm:$0xff]  ;;  %v2994_v47 = vld [vmem:[#allocation7 + $0x9f8] sm:$0xff] }
 0x254   :  { %2794 = vmatprep.subr.mxu0 %v2423_v46  ;;  %2883 = vmatprep.subr.mxu1 %v2425_v26  ;;  %v2991_v46 = vld [vmem:[#allocation7 + $0x9e0] sm:$0xff]  ;;  %v2993_v26 = vld [vmem:[#allocation7 + $0x9f0] sm:$0xff] }
 0x255   :  { %2795 = vmatpush2.msra.mxu0 %v2422_v48  ;;  %2884 = vmatpush2.msra.mxu1 %v2424_v49  ;;  %v2988_v48 = vld [vmem:[#allocation7 + $0x9c8] sm:$0xff]  ;;  %v2990_v49 = vld [vmem:[#allocation7 + $0x9d8] sm:$0xff] }
 0x256   :  { %2796 = vmatprep.subr.mxu0 %v2419_v35  ;;  %2885 = vmatprep.subr.mxu1 %v2421_v0  ;;  %v2987_v35 = vld [vmem:[#allocation7 + $0x9c0] sm:$0xff]  ;;  %v2989_v0 = vld [vmem:[#allocation7 + $0x9d0] sm:$0xff] }
 0x257   :  { %2797 = vmatpush2.msra.mxu0 %v2418_v13  ;;  %2886 = vmatpush2.msra.mxu1 %v2420_v10  ;;  %v2984_v13 = vld [vmem:[#allocation7 + $0x9a8] sm:$0xff]  ;;  %v2986_v10 = vld [vmem:[#allocation7 + $0x9b8] sm:$0xff] }
 0x258   :  { %2798 = vmatprep.subr.mxu0 %v2415_v33  ;;  %2887 = vmatprep.subr.mxu1 %v2417_v34  ;;  %v2983_v33 = vld [vmem:[#allocation7 + $0x9a0] sm:$0xff]  ;;  %v2980_v34 = vld [vmem:[#allocation7 + $0x988] sm:$0xff] }
 0x259   :  { %2799 = vmatpush2.msra.mxu0 %v2414_v59  ;;  %2888 = vmatpush2.msra.mxu1 %v2416_v23  ;;  %v2982_v59 = vld [vmem:[#allocation7 + $0x998] sm:$0xff]  ;;  %v2979_v23 = vld [vmem:[#allocation7 + $0x980] sm:$0xff] }
 0x25a   :  { %2800 = vmatprep.subr.mxu0 %v2411_v6  ;;  %2889 = vmatprep.subr.mxu1 %v2413_v32  ;;  %v2981_v6 = vld [vmem:[#allocation7 + $0x990] sm:$0xff]  ;;  %v2976_v32 = vld [vmem:[#allocation7 + $0x968] sm:$0xff]  ;;  %v3760_v44 = vld [vmem:[#allocation10 + $0xf8] sm:$0xff] }
 0x25b   :  { %2801 = vmatpush2.msra.mxu0 %v2410_v31  ;;  %2890 = vmatpush2.msra.mxu1 %v2412_v57  ;;  %v2978_v31 = vld [vmem:[#allocation7 + $0x978] sm:$0xff]  ;;  %v2972_v57 = vld [vmem:[#allocation7 + $0x948] sm:$0xff] }
 0x25c   :  { %2802 = vmatprep.subr.mxu0 %v2407_v1  ;;  %2891 = vmatprep.subr.mxu1 %v2409_v41  ;;  %v2974_v1 = vld [vmem:[#allocation7 + $0x958] sm:$0xff]  ;;  %v2971_v41 = vld [vmem:[#allocation7 + $0x940] sm:$0xff] }
 0x25d   :  { %2803 = vmatpush2.msra.mxu0 %v2406_v54  ;;  %2892 = vmatpush2.msra.mxu1 %v2408_v29  ;;  %v2973_v54 = vld [vmem:[#allocation7 + $0x950] sm:$0xff]  ;;  %v2968_v29 = vld [vmem:[#allocation7 + $0x928] sm:$0xff] }
 0x25e   :  { %2804 = vmatprep.subr.mxu0 %v2403_v53  ;;  %2893 = vmatprep.subr.mxu1 %v2405_v25  ;;  %v2970_v53 = vld [vmem:[#allocation7 + $0x938] sm:$0xff]  ;;  %v2967_v25 = vld [vmem:[#allocation7 + $0x920] sm:$0xff] }
 0x25f   :  { %2805 = vmatpush2.msra.mxu0 %v2402_v19  ;;  %2894 = vmatpush2.msra.mxu1 %v2404_v20  ;;  %v2969_v19 = vld [vmem:[#allocation7 + $0x930] sm:$0xff]  ;;  %v2966_v20 = vld [vmem:[#allocation7 + $0x918] sm:$0xff] }
 0x260   :  { %2806 = vmatprep.subr.mxu0 %v2399_v8  ;;  %2895 = vmatprep.subr.mxu1 %v2401_v30  ;;  %v2963_v8 = vld [vmem:[#allocation7 + $0x900] sm:$0xff]  ;;  %v2965_v30 = vld [vmem:[#allocation7 + $0x910] sm:$0xff] }
 0x261   :  { %2807 = vmatpush2.msra.mxu0 %v2398_v17  ;;  %2896 = vmatpush2.msra.mxu1 %v2400_v14  ;;  %v2960_v17 = vld [vmem:[#allocation7 + $0x8e8] sm:$0xff]  ;;  %v2962_v14 = vld [vmem:[#allocation7 + $0x8f8] sm:$0xff] }
 0x262   :  { %2808 = vmatprep.subr.mxu0 %v2395_v60  ;;  %2897 = vmatprep.subr.mxu1 %v2397_v62  ;;  %v2959_v60 = vld [vmem:[#allocation7 + $0x8e0] sm:$0xff]  ;;  %v2958_v62 = vld [vmem:[#allocation7 + $0x8d8] sm:$0xff] }
 0x263   :  { %2809 = vmatpush2.msra.mxu0 %v2394_v9  ;;  %2898 = vmatpush2.msra.mxu1 %v2396_v45  ;;  %v2955_v9 = vld [vmem:[#allocation7 + $0x8c0] sm:$0xff]  ;;  %v2957_v45 = vld [vmem:[#allocation7 + $0x8d0] sm:$0xff] }
 0x264   :  { %2810 = vmatprep.subr.mxu0 %v2391_v52  ;;  %2899 = vmatprep.subr.mxu1 %v2393_v27  ;;  %v2952_v52 = vld [vmem:[#allocation7 + $0x8a8] sm:$0xff]  ;;  %v2954_v27 = vld [vmem:[#allocation7 + $0x8b8] sm:$0xff] }
 0x265   :  { %2811 = vmatpush2.msra.mxu0 %v2390_v2  ;;  %2900 = vmatpush2.msra.mxu1 %v2392_v58  ;;  %v2951_v2 = vld [vmem:[#allocation7 + $0x8a0] sm:$0xff]  ;;  %v2948_v58 = vld [vmem:[#allocation7 + $0x888] sm:$0xff] }
 0x266   :  { %2812 = vmatprep.subr.mxu0 %v2387_v22  ;;  %2901 = vmatprep.subr.mxu1 %v2389_v15  ;;  %v2950_v22 = vld [vmem:[#allocation7 + $0x898] sm:$0xff]  ;;  %v2947_v15 = vld [vmem:[#allocation7 + $0x880] sm:$0xff] }
 0x267   :  { %2813 = vmatpush2.msra.mxu0 %v2386_v51  ;;  %2902 = vmatpush2.msra.mxu1 %v2388_v24  ;;  %v2949_v51 = vld [vmem:[#allocation7 + $0x890] sm:$0xff]  ;;  %v2944_v24 = vld [vmem:[#allocation7 + $0x868] sm:$0xff] }
 0x268   :  { %2814 = vmatprep.subr.mxu0 %v2383_v4  ;;  %2903 = vmatprep.subr.mxu1 %v2385_v3  ;;  %v2946_v4 = vld [vmem:[#allocation7 + $0x878] sm:$0xff]  ;;  %v2943_v3 = vld [vmem:[#allocation7 + $0x860] sm:$0xff] }
 0x269   :  { %2815 = vmatpush2.msra.mxu0 %v2382_v55  ;;  %2904 = vmatpush2.msra.mxu1 %v2384_v12  ;;  %v2945_v55 = vld [vmem:[#allocation7 + $0x870] sm:$0xff]  ;;  %v2940_v12 = vld [vmem:[#allocation7 + $0x848] sm:$0xff] }
 0x26a   :  { %2817 = vmatmul.mubr.f32.vlgmr.msra.gmra.mxu0 %v6277_v16  ;;  %2906 = vmatmul.mubr.f32.vlgmr.msra.gmra.mxu1 %v6277_v16 }
 0x26b   :  { %3059 = vmatprep.subr.mxu0 %v2992_v50  ;;  %3148 = vmatprep.subr.mxu1 %v2994_v47  ;;  %v2942_v50 = vld [vmem:[#allocation7 + $0x858] sm:$0xff]  ;;  %v2939_v47 = vld [vmem:[#allocation7 + $0x840] sm:$0xff] }
 0x26c   :  { %4692 = vmatprep.mubr.msk.f32.mxu0 %vm6358_vm13, %v6368_v40  ;;  %4696 = vmatprep.mubr.msk.f32.mxu1 %vm6358_vm13, %v6368_v40  ;;  %v2985_v40 = vld [vmem:[#allocation7 + $0x9b0] sm:$0xff] }
 0x26d   :  { %3060 = vmatpush1.msra.mxu0 %v2991_v46  ;;  %3149 = vmatpush1.msra.mxu1 %v2993_v26  ;;  %v2941_v46 = vld [vmem:[#allocation7 + $0x850] sm:$0xff]  ;;  %v2936_v26 = vld [vmem:[#allocation7 + $0x828] sm:$0xff] }
 0x26e   :  { %3061 = vmatprep.subr.mxu0 %v2988_v48  ;;  %3150 = vmatprep.subr.mxu1 %v2990_v49  ;;  %v2938_v48 = vld [vmem:[#allocation7 + $0x838] sm:$0xff]  ;;  %v2935_v49 = vld [vmem:[#allocation7 + $0x820] sm:$0xff] }
 0x26f   :  { %3062 = vmatpush1.msra.mxu0 %v2987_v35  ;;  %3151 = vmatpush1.msra.mxu1 %v2989_v0  ;;  %v2937_v35 = vld [vmem:[#allocation7 + $0x830] sm:$0xff]  ;;  %v2932_v0 = vld [vmem:[#allocation7 + $0x808] sm:$0xff] }
 0x270   :  { %4693 = vmatmul.mubr.msk.f32.gmra.mxu0 %vm6358_vm13, %v6379_v36  ;;  %4697 = vmatmul.mubr.msk.f32.gmra.mxu1 %vm6358_vm13, %v6379_v36  ;;  %v2977_v36 = vld [vmem:[#allocation7 + $0x970] sm:$0xff] }
 0x271   :  { %3063 = vmatprep.subr.mxu0 %v2984_v13  ;;  %3152 = vmatprep.subr.mxu1 %v2986_v10  ;;  %v2934_v13 = vld [vmem:[#allocation7 + $0x818] sm:$0xff]  ;;  %v2931_v10 = vld [vmem:[#allocation7 + $0x800] sm:$0xff] }
 0x272   :  { %2828 = vmatprep.mubr.f32.mxu0 %v6416_v18  ;;  %2917 = vmatprep.mubr.f32.mxu1 %v6416_v18 }
 0x273   :  { %3064 = vmatpush1.msra.mxu0 %v2983_v33  ;;  %3153 = vmatpush1.msra.mxu1 %v2985_v40  ;;  %v2933_v33 = vld [vmem:[#allocation7 + $0x810] sm:$0xff]  ;;  %v3056_v40 = vld [vmem:[#allocation7 + $0xbe8] sm:$0xff] }
 0x274   :  { %3065 = vmatprep.subr.mxu0 %v2980_v34  ;;  %3154 = vmatprep.subr.mxu1 %v2982_v59  ;;  %v3058_v34 = vld [vmem:[#allocation7 + $0xbf8] sm:$0xff]  ;;  %v3055_v59 = vld [vmem:[#allocation7 + $0xbe0] sm:$0xff] }
 0x275   :  { %3066 = vmatpush1.msra.mxu0 %v2979_v23  ;;  %3155 = vmatpush1.msra.mxu1 %v2981_v6  ;;  %v3057_v23 = vld [vmem:[#allocation7 + $0xbf0] sm:$0xff]  ;;  %v3052_v6 = vld [vmem:[#allocation7 + $0xbc8] sm:$0xff] }
 0x276   :  { %2829 = vmatmul.mubr.f32.gmra.mxu0 %v6443_v43  ;;  %2918 = vmatmul.mubr.f32.gmra.mxu1 %v6443_v43 }
 0x277   :  { %3067 = vmatprep.subr.mxu0 %v2976_v32  ;;  %3156 = vmatprep.subr.mxu1 %v2978_v31  ;;  %v3054_v32 = vld [vmem:[#allocation7 + $0xbd8] sm:$0xff]  ;;  %v3051_v31 = vld [vmem:[#allocation7 + $0xbc0] sm:$0xff] }
 0x278   :  { %4694 = vmatprep.mubr.msk.f32.mxu0 %vm6231_vm9, %v6281_v39  ;;  %4698 = vmatprep.mubr.msk.f32.mxu1 %vm6231_vm9, %v6281_v39  ;;  %v2964_v39 = vld [vmem:[#allocation7 + $0x908] sm:$0xff] }
 0x279   :  { %3068 = vmatpush1.msra.mxu0 %v2975_v63  ;;  %3157 = vmatpush1.msra.mxu1 %v2977_v36  ;;  %v3053_v63 = vld [vmem:[#allocation7 + $0xbd0] sm:$0xff]  ;;  %v3048_v36 = vld [vmem:[#allocation7 + $0xba8] sm:$0xff] }
 0x27a   :  { %3069 = vmatprep.subr.mxu0 %v2972_v57  ;;  %3158 = vmatprep.subr.mxu1 %v2974_v1  ;;  %v3050_v57 = vld [vmem:[#allocation7 + $0xbb8] sm:$0xff]  ;;  %v3047_v1 = vld [vmem:[#allocation7 + $0xba0] sm:$0xff] }
 0x27b   :  { %3070 = vmatpush1.msra.mxu0 %v2971_v41  ;;  %3159 = vmatpush1.msra.mxu1 %v2973_v54  ;;  %v3049_v41 = vld [vmem:[#allocation7 + $0xbb0] sm:$0xff]  ;;  %v3044_v54 = vld [vmem:[#allocation7 + $0xb88] sm:$0xff] }
 0x27c   :  { %4695 = vmatmul.mubr.msk.f32.gmra.mxu0 %vm6231_vm9, %v6295_v28  ;;  %4699 = vmatmul.mubr.msk.f32.gmra.mxu1 %vm6231_vm9, %v6295_v28  ;;  %v2956_v28 = vld [vmem:[#allocation7 + $0x8c8] sm:$0xff] }
 0x27d   :  { %3071 = vmatprep.subr.mxu0 %v2968_v29  ;;  %3160 = vmatprep.subr.mxu1 %v2970_v53  ;;  %v3046_v29 = vld [vmem:[#allocation7 + $0xb98] sm:$0xff]  ;;  %v3043_v53 = vld [vmem:[#allocation7 + $0xb80] sm:$0xff] }
 0x27e   :  { %3072 = vmatpush1.msra.mxu0 %v2967_v25  ;;  %3123 = vmatprep.mubr.f32.mxu0 %v6430_v56  ;;  %v3045_v25 = vld [vmem:[#allocation7 + $0xb90] sm:$0xff] }
 0x27f   :  { %3161 = vmatpush1.msra.mxu1 %v2969_v19  ;;  %3212 = vmatprep.mubr.f32.mxu1 %v6430_v56  ;;  %v2953_v56 = vld [vmem:[#allocation7 + $0x8b0] sm:$0xff]  ;;  %v3040_v19 = vld [vmem:[#allocation7 + $0xb68] sm:$0xff] }
 0x280   :  { %3073 = vmatprep.subr.mxu0 %v2964_v39  ;;  %3162 = vmatprep.subr.mxu1 %v2966_v20  ;;  %v3042_v39 = vld [vmem:[#allocation7 + $0xb78] sm:$0xff]  ;;  %v3039_v20 = vld [vmem:[#allocation7 + $0xb60] sm:$0xff] }
 0x281   :  { %3074 = vmatpush1.msra.mxu0 %v2963_v8  ;;  %3163 = vmatpush1.msra.mxu1 %v2965_v30  ;;  %v3041_v8 = vld [vmem:[#allocation7 + $0xb70] sm:$0xff]  ;;  %v3036_v30 = vld [vmem:[#allocation7 + $0xb48] sm:$0xff] }
 0x282   :  { %3075 = vmatprep.subr.mxu0 %v2960_v17  ;;  %3164 = vmatprep.subr.mxu1 %v2962_v14  ;;  %v3038_v17 = vld [vmem:[#allocation7 + $0xb58] sm:$0xff]  ;;  %v3035_v14 = vld [vmem:[#allocation7 + $0xb40] sm:$0xff] }
 0x283   :  { %3076 = vmatpush1.msra.mxu0 %v2959_v60  ;;  %3165 = vmatpush1.msra.mxu1 %v2961_v42  ;;  %v3037_v60 = vld [vmem:[#allocation7 + $0xb50] sm:$0xff]  ;;  %v3032_v42 = vld [vmem:[#allocation7 + $0xb28] sm:$0xff] }
 0x284   :  { %3077 = vmatprep.subr.mxu0 %v2956_v28  ;;  %3166 = vmatprep.subr.mxu1 %v2958_v62  ;;  %v3034_v28 = vld [vmem:[#allocation7 + $0xb38] sm:$0xff]  ;;  %v3031_v62 = vld [vmem:[#allocation7 + $0xb20] sm:$0xff] }
 0x285   :  { %3078 = vmatpush1.msra.mxu0 %v2955_v9  ;;  %3167 = vmatpush1.msra.mxu1 %v2957_v45  ;;  %v3033_v9 = vld [vmem:[#allocation7 + $0xb30] sm:$0xff]  ;;  %v3028_v45 = vld [vmem:[#allocation7 + $0xb08] sm:$0xff] }
 0x286   :  { %3079 = vmatprep.subr.mxu0 %v2952_v52  ;;  %3168 = vmatprep.subr.mxu1 %v2954_v27  ;;  %v3030_v52 = vld [vmem:[#allocation7 + $0xb18] sm:$0xff]  ;;  %v3027_v27 = vld [vmem:[#allocation7 + $0xb00] sm:$0xff] }
 0x287   :  { %3080 = vmatpush1.msra.mxu0 %v2951_v2  ;;  %3169 = vmatpush1.msra.mxu1 %v2953_v56  ;;  %v3029_v2 = vld [vmem:[#allocation7 + $0xb10] sm:$0xff]  ;;  %v3024_v56 = vld [vmem:[#allocation7 + $0xae8] sm:$0xff] }
 0x288   :  { %3081 = vmatprep.subr.mxu0 %v2948_v58  ;;  %3170 = vmatprep.subr.mxu1 %v2950_v22  ;;  %v3026_v58 = vld [vmem:[#allocation7 + $0xaf8] sm:$0xff]  ;;  %v3023_v22 = vld [vmem:[#allocation7 + $0xae0] sm:$0xff] }
 0x289   :  { %3082 = vmatpush1.msra.mxu0 %v2947_v15  ;;  %3171 = vmatpush1.msra.mxu1 %v2949_v51  ;;  %v3025_v15 = vld [vmem:[#allocation7 + $0xaf0] sm:$0xff]  ;;  %v3020_v51 = vld [vmem:[#allocation7 + $0xac8] sm:$0xff] }
 0x28a   :  { %3083 = vmatprep.subr.mxu0 %v2944_v24  ;;  %3172 = vmatprep.subr.mxu1 %v2946_v4  ;;  %v3022_v24 = vld [vmem:[#allocation7 + $0xad8] sm:$0xff]  ;;  %v3019_v4 = vld [vmem:[#allocation7 + $0xac0] sm:$0xff] }
 0x28b   :  { %3084 = vmatpush1.msra.mxu0 %v2943_v3  ;;  %3173 = vmatpush1.msra.mxu1 %v2945_v55  ;;  %v3021_v3 = vld [vmem:[#allocation7 + $0xad0] sm:$0xff]  ;;  %v3016_v55 = vld [vmem:[#allocation7 + $0xaa8] sm:$0xff] }
 0x28c   :  { %3085 = vmatprep.subr.mxu0 %v2940_v12  ;;  %3174 = vmatprep.subr.mxu1 %v2942_v50  ;;  %v3018_v12 = vld [vmem:[#allocation7 + $0xab8] sm:$0xff]  ;;  %v3015_v50 = vld [vmem:[#allocation7 + $0xaa0] sm:$0xff] }
 0x28d   :  { %3086 = vmatpush1.msra.mxu0 %v2939_v47  ;;  %3175 = vmatpush1.msra.mxu1 %v2941_v46  ;;  %v3017_v47 = vld [vmem:[#allocation7 + $0xab0] sm:$0xff]  ;;  %v3012_v46 = vld [vmem:[#allocation7 + $0xa88] sm:$0xff] }
 0x28e   :  { %3087 = vmatprep.subr.mxu0 %v2936_v26  ;;  %3176 = vmatprep.subr.mxu1 %v2938_v48  ;;  %v3014_v26 = vld [vmem:[#allocation7 + $0xa98] sm:$0xff]  ;;  %v3011_v48 = vld [vmem:[#allocation7 + $0xa80] sm:$0xff] }
 0x28f   :  { %3088 = vmatpush1.msra.mxu0 %v2935_v49  ;;  %3177 = vmatpush1.msra.mxu1 %v2937_v35  ;;  %v3013_v49 = vld [vmem:[#allocation7 + $0xa90] sm:$0xff]  ;;  %v3008_v35 = vld [vmem:[#allocation7 + $0xa68] sm:$0xff] }
 0x290   :  { %3089 = vmatprep.subr.mxu0 %v2932_v0  ;;  %3178 = vmatprep.subr.mxu1 %v2934_v13  ;;  %v3010_v0 = vld [vmem:[#allocation7 + $0xa78] sm:$0xff]  ;;  %v3007_v13 = vld [vmem:[#allocation7 + $0xa60] sm:$0xff] }
 0x291   :  { %3090 = vmatpush1.msra.mxu0 %v2931_v10  ;;  %3179 = vmatpush1.msra.mxu1 %v2933_v33  ;;  %v3009_v10 = vld [vmem:[#allocation7 + $0xa70] sm:$0xff]  ;;  %v3004_v33 = vld [vmem:[#allocation7 + $0xa48] sm:$0xff] }
 0x292   :  { %3091 = vmatprep.subr.mxu0 %v3056_v40  ;;  %3180 = vmatprep.subr.mxu1 %v3058_v34  ;;  %v3006_v40 = vld [vmem:[#allocation7 + $0xa58] sm:$0xff]  ;;  %v3003_v34 = vld [vmem:[#allocation7 + $0xa40] sm:$0xff] }
 0x293   :  { %3092 = vmatpush2.msra.mxu0 %v3055_v59  ;;  %3181 = vmatpush2.msra.mxu1 %v3057_v23  ;;  %v3005_v59 = vld [vmem:[#allocation7 + $0xa50] sm:$0xff]  ;;  %v3000_v23 = vld [vmem:[#allocation7 + $0xa28] sm:$0xff] }
 0x294   :  { %3093 = vmatprep.subr.mxu0 %v3052_v6  ;;  %3182 = vmatprep.subr.mxu1 %v3054_v32  ;;  %v3002_v6 = vld [vmem:[#allocation7 + $0xa38] sm:$0xff]  ;;  %v2999_v32 = vld [vmem:[#allocation7 + $0xa20] sm:$0xff] }
 0x295   :  { %3094 = vmatpush2.msra.mxu0 %v3051_v31  ;;  %3183 = vmatpush2.msra.mxu1 %v3053_v63  ;;  %v2303_v31 = vrot.slane %v6388_v38, 1  ;;  %v3001_v63 = vld [vmem:[#allocation7 + $0xa30] sm:$0xff] }
 0x296   :  { %3095 = vmatprep.subr.mxu0 %v3048_v36  ;;  %3184 = vmatprep.subr.mxu1 %v3050_v57  ;;  %v2996_v36 = vld [vmem:[#allocation7 + $0xa08] sm:$0xff]  ;;  %v2998_v57 = vld [vmem:[#allocation7 + $0xa18] sm:$0xff] }
 0x297   :  { %3096 = vmatpush2.msra.mxu0 %v3047_v1  ;;  %3185 = vmatpush2.msra.mxu1 %v3049_v41  ;;  %v2995_v1 = vld [vmem:[#allocation7 + $0xa00] sm:$0xff]  ;;  %v2306_v41 = vrot.slane %v6416_v18, 1 }
 0x298   :  { %3097 = vmatprep.subr.mxu0 %v3044_v54  ;;  %3186 = vmatprep.subr.mxu1 %v3046_v29  ;;  %v2997_v54 = vld [vmem:[#allocation7 + $0xa10] sm:$0xff]  ;;  %v2301_v29 = vrot.slane %v6277_v16, 1 }
 0x299   :  { %3098 = vmatpush2.msra.mxu0 %v3043_v53  ;;  %3187 = vmatpush2.msra.mxu1 %v3045_v25  ;;  %v2305_v53 = vrot.slane %v6443_v43, 1  ;;  %v2312_v18 = vsel %vm169_vm3, %v2304_v5, %v2306_v41  ;;  %v2307_v25 = vrot.slane %v6309_v37, 1  ;;  %v2310_v43 = vsel %vm169_vm3, %v2306_v41, %v2308_v21  ;;  %v3744_v5 = vld [vmem:[#allocation10 + $0x78] sm:$0xff] }
 0x29a   :  { %3099 = vmatprep.subr.mxu0 %v3040_v19  ;;  %3188 = vmatprep.subr.mxu1 %v3042_v39  ;;  %v2313_v38 = vsel %vm169_vm3, %v2301_v29, %v2303_v31  ;;  %v3793_v21 = vld [vmem:[#allocation10 + $0x1f8] sm:$0xff]  ;;  %v3759_v19 = vld [vmem:[#allocation10 + $0xf0] sm:$0xff] }
 0x29b   :  { %3100 = vmatpush2.msra.mxu0 %v3039_v20  ;;  %3189 = vmatpush2.msra.mxu1 %v3041_v8  ;;  %v2311_v16 = vsel %vm169_vm3, %v2303_v31, %v2305_v53  ;;  %v2309_v11 = vsel %vm169_vm3, %v2305_v53, %v2307_v25  ;;  %v2315_v37 = vsel %vm169_vm3, %v2307_v25, %v2301_v29  ;;  %v3777_v39 = vld [vmem:[#allocation10 + $0x178] sm:$0xff]  ;;  %v3743_v20 = vld [vmem:[#allocation10 + $0x70] sm:$0xff]  ;;  %v3745_v25 = vld [vmem:[#allocation10 + $0x80] sm:$0xff] }
 0x29c   :  { %3101 = vmatprep.subr.mxu0 %v3036_v30  ;;  %3190 = vmatprep.subr.mxu1 %v3038_v17  ;;  %v3792_v8 = vld [vmem:[#allocation10 + $0x1f0] sm:$0xff]  ;;  %v3758_v30 = vld [vmem:[#allocation10 + $0xe8] sm:$0xff]  ;;  %v3748_v31 = vld [vmem:[#allocation10 + $0x98] sm:$0xff] }
 0x29d   :  { %3102 = vmatpush2.msra.mxu0 %v3035_v14  ;;  %3191 = vmatpush2.msra.mxu1 %v3037_v60  ;;  %v3742_v17 = vld [vmem:[#allocation10 + $0x68] sm:$0xff]  ;;  %v3757_v60 = vld [vmem:[#allocation10 + $0xe0] sm:$0xff]  ;;  %v3765_v41 = vld [vmem:[#allocation10 + $0x118] sm:$0xff] }
 0x29e   :  { %3103 = vmatprep.subr.mxu0 %v3032_v42  ;;  %3192 = vmatprep.subr.mxu1 %v3034_v28  ;;  %v3791_v14 = vld [vmem:[#allocation10 + $0x1e8] sm:$0xff]  ;;  %v3741_v28 = vld [vmem:[#allocation10 + $0x60] sm:$0xff]  ;;  %v3780_v29 = vld [vmem:[#allocation10 + $0x190] sm:$0xff] }
 0x29f   :  { %3104 = vmatpush2.msra.mxu0 %v3031_v62  ;;  %3193 = vmatpush2.msra.mxu1 %v3033_v9  ;;  %v3775_v42 = vld [vmem:[#allocation10 + $0x168] sm:$0xff]  ;;  %v3790_v62 = vld [vmem:[#allocation10 + $0x1e0] sm:$0xff]  ;;  %v3756_v9 = vld [vmem:[#allocation10 + $0xd8] sm:$0xff] }
 0x2a0   :  { %3105 = vmatprep.subr.mxu0 %v3028_v45  ;;  %3194 = vmatprep.subr.mxu1 %v3030_v52  ;;  %v3774_v45 = vld [vmem:[#allocation10 + $0x160] sm:$0xff]  ;;  %v3740_v52 = vld [vmem:[#allocation10 + $0x58] sm:$0xff]  ;;  %v3764_v53 = vld [vmem:[#allocation10 + $0x110] sm:$0xff] }
 0x2a1   :  { %3106 = vmatpush2.msra.mxu0 %v3027_v27  ;;  %3195 = vmatpush2.msra.mxu1 %v3029_v2  ;;  %v3789_v27 = vld [vmem:[#allocation10 + $0x1d8] sm:$0xff]  ;;  %v3755_v2 = vld [vmem:[#allocation10 + $0xd0] sm:$0xff] }
 0x2a2   :  { %3107 = vmatprep.subr.mxu0 %v3024_v56  ;;  %3196 = vmatprep.subr.mxu1 %v3026_v58  ;;  %v3773_v56 = vld [vmem:[#allocation10 + $0x158] sm:$0xff]  ;;  %v3739_v58 = vld [vmem:[#allocation10 + $0x50] sm:$0xff] }
 0x2a3   :  { %3108 = vmatpush2.msra.mxu0 %v3023_v22  ;;  %3197 = vmatpush2.msra.mxu1 %v3025_v15  ;;  %v3788_v22 = vld [vmem:[#allocation10 + $0x1d0] sm:$0xff]  ;;  %v3754_v15 = vld [vmem:[#allocation10 + $0xc8] sm:$0xff] }
 0x2a4   :  { %3109 = vmatprep.subr.mxu0 %v3020_v51  ;;  %3198 = vmatprep.subr.mxu1 %v3022_v24  ;;  %v3772_v51 = vld [vmem:[#allocation10 + $0x150] sm:$0xff]  ;;  %v3738_v24 = vld [vmem:[#allocation10 + $0x48] sm:$0xff] }
 0x2a5   :  { %3110 = vmatpush2.msra.mxu0 %v3019_v4  ;;  %3199 = vmatpush2.msra.mxu1 %v3021_v3  ;;  %v3787_v4 = vld [vmem:[#allocation10 + $0x1c8] sm:$0xff]  ;;  %v3753_v3 = vld [vmem:[#allocation10 + $0xc0] sm:$0xff] }
 0x2a6   :  { %3111 = vmatprep.subr.mxu0 %v3016_v55  ;;  %3200 = vmatprep.subr.mxu1 %v3018_v12  ;;  %v3771_v55 = vld [vmem:[#allocation10 + $0x148] sm:$0xff]  ;;  %v3737_v12 = vld [vmem:[#allocation10 + $0x40] sm:$0xff] }
 0x2a7   :  { %3112 = vmatpush2.msra.mxu0 %v3015_v50  ;;  %3201 = vmatpush2.msra.mxu1 %v3017_v47  ;;  %v3786_v50 = vld [vmem:[#allocation10 + $0x1c0] sm:$0xff]  ;;  %v3752_v47 = vld [vmem:[#allocation10 + $0xb8] sm:$0xff] }
 0x2a8   :  { %3113 = vmatprep.subr.mxu0 %v3012_v46  ;;  %3202 = vmatprep.subr.mxu1 %v3014_v26  ;;  %v3770_v46 = vld [vmem:[#allocation10 + $0x140] sm:$0xff]  ;;  %v3736_v26 = vld [vmem:[#allocation10 + $0x38] sm:$0xff] }
 0x2a9   :  { %3114 = vmatpush2.msra.mxu0 %v3011_v48  ;;  %3203 = vmatpush2.msra.mxu1 %v3013_v49  ;;  %v3785_v48 = vld [vmem:[#allocation10 + $0x1b8] sm:$0xff]  ;;  %v3751_v49 = vld [vmem:[#allocation10 + $0xb0] sm:$0xff] }
 0x2aa   :  { %3115 = vmatprep.subr.mxu0 %v3008_v35  ;;  %3204 = vmatprep.subr.mxu1 %v3010_v0  ;;  %v3769_v35 = vld [vmem:[#allocation10 + $0x138] sm:$0xff]  ;;  %v3735_v0 = vld [vmem:[#allocation10 + $0x30] sm:$0xff] }
 0x2ab   :  { %3116 = vmatpush2.msra.mxu0 %v3007_v13  ;;  %3205 = vmatpush2.msra.mxu1 %v3009_v10  ;;  %v3784_v13 = vld [vmem:[#allocation10 + $0x1b0] sm:$0xff]  ;;  %v3750_v10 = vld [vmem:[#allocation10 + $0xa8] sm:$0xff] }
 0x2ac   :  { %3117 = vmatprep.subr.mxu0 %v3004_v33  ;;  %3206 = vmatprep.subr.mxu1 %v3006_v40  ;;  %v3768_v33 = vld [vmem:[#allocation10 + $0x130] sm:$0xff]  ;;  %v3734_v40 = vld [vmem:[#allocation10 + $0x28] sm:$0xff] }
 0x2ad   :  { %3118 = vmatpush2.msra.mxu0 %v3003_v34  ;;  %3207 = vmatpush2.msra.mxu1 %v3005_v59  ;;  %v3783_v34 = vld [vmem:[#allocation10 + $0x1a8] sm:$0xff]  ;;  %v3749_v59 = vld [vmem:[#allocation10 + $0xa0] sm:$0xff] }
 0x2ae   :  { %3119 = vmatprep.subr.mxu0 %v3000_v23  ;;  %3208 = vmatprep.subr.mxu1 %v3002_v6  ;;  %v3767_v23 = vld [vmem:[#allocation10 + $0x128] sm:$0xff]  ;;  %v3733_v6 = vld [vmem:[#allocation10 + $0x20] sm:$0xff] }
 0x2af   :  { %3120 = vmatpush2.msra.mxu0 %v2999_v32  ;;  %3209 = vmatpush2.msra.mxu1 %v3001_v63  ;;  %v3782_v32 = vld [vmem:[#allocation10 + $0x1a0] sm:$0xff] }
 0x2b0   :  { %3121 = vmatprep.subr.mxu0 %v2996_v36  ;;  %3210 = vmatprep.subr.mxu1 %v2998_v57  ;;  %v3766_v63 = vld [vmem:[#allocation10 + $0x120] sm:$0xff]  ;;  %v3732_v36 = vld [vmem:[#allocation10 + $0x18] sm:$0xff] }
 0x2b1   :  { %3122 = vmatpush2.msra.mxu0 %v2995_v1  ;;  %3211 = vmatpush2.msra.mxu1 %v2997_v54  ;;  %v3781_v57 = vld [vmem:[#allocation10 + $0x198] sm:$0xff]  ;;  %v3747_v1 = vld [vmem:[#allocation10 + $0x90] sm:$0xff] }
 0x2b2   :  { %3124 = vmatmul.mubr.f32.vlgmr.msra.gmra.mxu0 %v2313_v38  ;;  %3213 = vmatmul.mubr.f32.vlgmr.msra.gmra.mxu1 %v2313_v38  ;;  %v3731_v54 = vld [vmem:[#allocation10 + $0x10] sm:$0xff]  ;;  %v3746_v38 = vld [vmem:[#allocation10 + $0x88] sm:$0xff] }
 0x2b3   :  { %3129 = vmatprep.mubr.f32.mxu0 %v2312_v18  ;;  %3218 = vmatprep.mubr.f32.mxu1 %v2312_v18  ;;  %v3730_v18 = vld [vmem:[#allocation10 + $0x8] sm:$0xff] }
 0x2b4   :  { %4737 = vmatprep.subr.mxu1 %v3760_v44  ;;  %4702 = vmatprep.subr.mxu0 %v3793_v21  ;;  %v4094_v44 = vld [vmem:[#allocation10 + $0x3f8] sm:$0xff] }
 0x2b5   :  { %4738 = vmatpush3.msra.mxu1 %v3744_v5  ;;  %4703 = vmatpush3.msra.mxu0 %v3777_v39  ;;  %v3762_v5 = vld [vmem:[#allocation10 + $0x100] sm:$0xff]  ;;  %v3982_v21 = vld [vmem:[#allocation10 + $0x2f8] sm:$0xff] }
 0x2b6   :  { %3130 = vmatmul.mubr.f32.gmra.mxu0 %v2311_v16  ;;  %3219 = vmatmul.mubr.f32.gmra.mxu1 %v2311_v16  ;;  %v3779_v16 = vld [vmem:[#allocation10 + $0x188] sm:$0xff] }
 0x2b7   :  { %3135 = vmatprep.mubr.f32.mxu0 %v2310_v43  ;;  %3224 = vmatprep.mubr.f32.mxu1 %v2310_v43  ;;  %v3763_v43 = vld [vmem:[#allocation10 + $0x108] sm:$0xff] }
 0x2b8   :  { %4739 = vmatprep.subr.mxu1 %v3759_v19  ;;  %4704 = vmatprep.subr.mxu0 %v3792_v8 }
 0x2b9   :  { %4740 = vmatpush3.msra.mxu1 %v3743_v20 }
 0x2ba   :  { %3136 = vmatmul.mubr.f32.gmra.mxu0 %v2309_v11  ;;  %3225 = vmatmul.mubr.f32.gmra.mxu1 %v2309_v11  ;;  %v3729_v11 = vld [vmem:[#allocation10] sm:$0xff] }
 0x2bb   :  { %3141 = vmatprep.mubr.f32.mxu0 %v6437_v7  ;;  %3230 = vmatprep.mubr.f32.mxu1 %v6437_v7  ;;  %v3776_v7 = vld [vmem:[#allocation10 + $0x170] sm:$0xff] }
 0x2bc   :  { %4741 = vmatprep.subr.mxu1 %v3758_v30  ;;  %4705 = vmatpush3.msra.mxu0 %v3776_v7 }
 0x2bd   :  { %4742 = vmatpush3.msra.mxu1 %v3742_v17  ;;  %4706 = vmatprep.subr.mxu0 %v3791_v14 }
 0x2be   :  { %3142 = vmatmul.mubr.f32.gmra.mxu0 %v2315_v37  ;;  %3231 = vmatmul.mubr.f32.gmra.mxu1 %v2315_v37  ;;  %v3778_v37 = vld [vmem:[#allocation10 + $0x180] sm:$0xff] }
 0x2bf   :  { %4743 = vmatprep.subr.mxu1 %v3757_v60  ;;  %4707 = vmatpush3.msra.mxu0 %v3775_v42 }
 0x2c0   :  { %4744 = vmatpush3.msra.mxu1 %v3741_v28  ;;  %4708 = vmatprep.subr.mxu0 %v3790_v62 }
 0x2c1   :  { %4745 = vmatprep.subr.mxu1 %v3756_v9  ;;  %4709 = vmatpush3.msra.mxu0 %v3774_v45 }
 0x2c2   :  { %4746 = vmatpush3.msra.mxu1 %v3740_v52  ;;  %4710 = vmatprep.subr.mxu0 %v3789_v27 }
 0x2c3   :  { %4747 = vmatprep.subr.mxu1 %v3755_v2  ;;  %4711 = vmatpush3.msra.mxu0 %v3773_v56 }
 0x2c4   :  { %4748 = vmatpush3.msra.mxu1 %v3739_v58  ;;  %4712 = vmatprep.subr.mxu0 %v3788_v22 }
 0x2c5   :  { %4749 = vmatprep.subr.mxu1 %v3754_v15  ;;  %4713 = vmatpush3.msra.mxu0 %v3772_v51 }
 0x2c6   :  { %4750 = vmatpush3.msra.mxu1 %v3738_v24  ;;  %4714 = vmatprep.subr.mxu0 %v3787_v4 }
 0x2c7   :  { %4751 = vmatprep.subr.mxu1 %v3753_v3  ;;  %4715 = vmatpush3.msra.mxu0 %v3771_v55 }
 0x2c8   :  { %4752 = vmatpush3.msra.mxu1 %v3737_v12  ;;  %4716 = vmatprep.subr.mxu0 %v3786_v50 }
 0x2c9   :  { %4753 = vmatprep.subr.mxu1 %v3752_v47  ;;  %4717 = vmatpush3.msra.mxu0 %v3770_v46 }
 0x2ca   :  { %4754 = vmatpush3.msra.mxu1 %v3736_v26  ;;  %4718 = vmatprep.subr.mxu0 %v3785_v48  ;;  %v3253_v26 = vld [vmem:[#allocation8] sm:$0xf] }
 0x2cb   :  { %4755 = vmatprep.subr.mxu1 %v3751_v49  ;;  %4719 = vmatpush3.msra.mxu0 %v3769_v35 }
 0x2cc   :  { %4756 = vmatpush3.msra.mxu1 %v3735_v0  ;;  %4720 = vmatprep.subr.mxu0 %v3784_v13  ;;  %v6880_v0 = vsub.s32 0, %v6843_v61 }
 0x2cd   :  { %4757 = vmatprep.subr.mxu1 %v3750_v10  ;;  %4721 = vmatpush3.msra.mxu0 %v3768_v33 }
 0x2ce   :  { %4758 = vmatpush3.msra.mxu1 %v3734_v40  ;;  %4722 = vmatprep.subr.mxu0 %v3783_v34  ;;  %v6523_v13 = vrot.slane %v3253_v26, %v6880_v0  ;;  %v6881_v40 = vsub.s32 2, %v6843_v61 }
 0x2cf   :  { %4759 = vmatprep.subr.mxu1 %v3749_v59  ;;  %4723 = vmatpush3.msra.mxu0 %v3767_v23 }
 0x2d0   :  { %4760 = vmatpush3.msra.mxu1 %v3733_v6  ;;  %4724 = vmatprep.subr.mxu0 %v3782_v32  ;;  %v6527_v34 = vrot.slane %v3253_v26, %v6881_v40  ;;  %v6882_v32 = vsub.s32 1, %v6843_v61 }
 0x2d1   :  { %4761 = vmatprep.subr.mxu1 %v3748_v31  ;;  %4725 = vmatpush3.msra.mxu0 %v3766_v63 }
 0x2d2   :  { %4762 = vmatpush3.msra.mxu1 %v3732_v36  ;;  %4726 = vmatprep.subr.mxu0 %v3781_v57  ;;  %v6531_v31 = vrot.slane %v3253_v26, %v6882_v32 }
 0x2d3   :  { %4763 = vmatprep.subr.mxu1 %v3747_v1  ;;  %4727 = vmatpush3.msra.mxu0 %v3765_v41  ;;  %v6883_v41 = vsub.s32 3, %v6843_v61 }
 0x2d4   :  { %4764 = vmatpush3.msra.mxu1 %v3731_v54  ;;  %4728 = vmatprep.subr.mxu0 %v3780_v29 }
 0x2d5   :  { %4765 = vmatprep.subr.mxu1 %v3746_v38  ;;  %4729 = vmatpush3.msra.mxu0 %v3764_v53  ;;  %v6535_v54 = vrot.slane %v3253_v26, %v6883_v41 }
 0x2d6   :  { %4766 = vmatpush3.msra.mxu1 %v3730_v18  ;;  %4730 = vmatprep.subr.mxu0 %v3779_v16 }
 0x2d7   :  { %4767 = vmatprep.subr.mxu1 %v3745_v25  ;;  %4731 = vmatpush3.msra.mxu0 %v3763_v43 }
 0x2d8   :  { %4768 = vmatpush3.msra.mxu1 %v3729_v11  ;;  %4732 = vmatprep.subr.mxu0 %v3778_v37 }
 0x2d9   :  { %4807 = vmatprep.subr.mxu1 %v4094_v44  ;;  %4733 = vmatpush3.msra.mxu0 %v3762_v5 }
 0x2da   :  { %4772 = vmatprep.subr.mxu0 %v3982_v21 }
 0x2e2   :  { %v2640_v19 = vpop.f32.mrf.mxu0  ;;  %v2729_v39 = vpop.f32.mrf.mxu1 }
 0x2e4   :  { %v2642_v20 = vpop.f32.mrf.mxu0  ;;  %v2731_v8 = vpop.f32.mrf.mxu1 }
 0x2ee   :  { %v2646_v30 = vpop.f32.mrf.mxu0  ;;  %v2735_v7 = vpop.f32.mrf.mxu1 }
 0x2f0   :  { %v2648_v17 = vpop.f32.mrf.mxu0  ;;  %v2737_v14 = vpop.f32.mrf.mxu1 }
 0x2f8   :  { %v2652_v60 = vpop.f32.mrf.mxu0  ;;  %v2741_v42 = vpop.f32.mrf.mxu1 }
 0x2fa   :  { %v2654_v28 = vpop.f32.mrf.mxu0  ;;  %v2743_v62 = vpop.f32.mrf.mxu1 }
 0x2fc   :  { %v2658_v9 = vpop.f32.mrf.mxu0  ;;  %v6513_v45 = vpop.f32.mrf.mxu1 }
 0x2fe   :  { %v6515_v52 = vpop.f32.mrf.mxu0  ;;  %v6517_v27 = vpop.f32.mrf.mxu1 }
 0x32a   :  { %v2818_v2 = vpop.f32.mrf.mxu0  ;;  %v2907_v56 = vpop.f32.mrf.mxu1 }
 0x32b   :  { %v2819_v49 = vadd.f32 %v2818_v2, %v2640_v19  ;;  %v2908_v10 = vadd.f32 %v2907_v56, %v2729_v39 }
 0x32c   :  { %v2820_v58 = vpop.f32.mrf.mxu0  ;;  %v2909_v22 = vpop.f32.mrf.mxu1 }
 0x32d   :  { %v2821_v59 = vadd.f32 %v2820_v58, %v2642_v20  ;;  %v2910_v63 = vadd.f32 %v2909_v22, %v2731_v8 }
 0x330   :  { %v2824_v15 = vpop.f32.mrf.mxu0  ;;  %v2913_v51 = vpop.f32.mrf.mxu1 }
 0x331   :  { %v2825_v36 = vadd.f32 %v2824_v15, %v2646_v30  ;;  %v2914_v29 = vadd.f32 %v2913_v51, %v2735_v7 }
 0x332   :  { %v2826_v24 = vpop.f32.mrf.mxu0  ;;  %v2915_v4 = vpop.f32.mrf.mxu1 }
 0x333   :  { %v2827_v38 = vadd.f32 %v2826_v24, %v2648_v17  ;;  %v2916_v25 = vadd.f32 %v2915_v4, %v2737_v14 }
 0x336   :  { %v2830_v3 = vpop.f32.mrf.mxu0  ;;  %v2919_v55 = vpop.f32.mrf.mxu1 }
 0x337   :  { %v2831_v43 = vadd.f32 %v2830_v3, %v2652_v60  ;;  %v2920_v5 = vadd.f32 %v2919_v55, %v2741_v42 }
 0x338   :  { %v2832_v12 = vpop.f32.mrf.mxu0  ;;  %v2921_v50 = vpop.f32.mrf.mxu1 }
 0x339   :  { %v2833_v20 = vadd.f32 %v2832_v12, %v2654_v28  ;;  %v2922_v2 = vadd.f32 %v2921_v50, %v2743_v62 }
 0x33c   :  { %v2836_v47 = vpop.f32.mrf.mxu0  ;;  %v2925_v46 = vpop.f32.mrf.mxu1 }
 0x33d   :  { %v2837_v22 = vadd.f32 %v2836_v47, %v2658_v9 }
 0x33e   :  { %v2838_v48 = vpop.f32.mrf.mxu0  ;;  %v6519_v35 = vpop.f32.mrf.mxu1 }
 0x372   :  { %v3125_v33 = vpop.f32.mrf.mxu0  ;;  %v3214_v6 = vpop.f32.mrf.mxu1 }
 0x373   :  { %v3237_v23 = vadd.f32 %v3125_v33, %v2819_v49  ;;  %v3239_v57 = vadd.f32 %v3214_v6, %v2908_v10  ;;  %v2926_v10 = vadd.f32 %v2925_v46, %v6513_v45 }
 0x374   :  { %v3127_v1 = vpop.f32.mrf.mxu0  ;;  %v3216_v16 = vpop.f32.mrf.mxu1 }
 0x375   :  { %v3275_v53 = vadd.f32 %v6523_v13, %v3237_v23  ;;  %v3238_v18 = vadd.f32 %v3127_v1, %v2821_v59  ;;  %v3277_v11 = vadd.f32 %v6527_v34, %v3239_v57  ;;  %v3240_v37 = vadd.f32 %v3216_v16, %v2910_v63 }
 0x376   :  { %v3131_v44 = vpop.f32.mrf.mxu0  ;;  %v3220_v61 = vpop.f32.mrf.mxu1  ;;  %v2839_v59 = vadd.f32 %v2838_v48, %v6515_v52 }
 0x377   :  { %v3291_v21 = vmax.f32 %v3275_v53, 0.0  ;;  %v3276_v19 = vadd.f32 %v6531_v31, %v3238_v18  ;;  %v3241_v39 = vadd.f32 %v3131_v44, %v2825_v36  ;;  %v3293_v8 = vmax.f32 %v3277_v11, 0.0 }
 0x378   :  { %v3278_v30 = vadd.f32 %v6535_v54, %v3240_v37  ;;  %v3243_v7 = vadd.f32 %v3220_v61, %v2914_v29  ;;  %v3133_v17 = vpop.f32.mrf.mxu0  ;;  %v3222_v58 = vpop.f32.mrf.mxu1  ;;  %v2928_v61 = vadd.f32 %v6519_v35, %v6517_v27 }
 0x379   :  { %v3292_v56 = vmax.f32 %v3276_v19, 0.0  ;;  %v3279_v14 = vadd.f32 %v6523_v13, %v3241_v39  ;;  %v3242_v60 = vadd.f32 %v3133_v17, %v2827_v38  ;;  %v3244_v51 = vadd.f32 %v3222_v58, %v2916_v25  ;;  %v6884_v38 = vld [vmem:[#allocation38_spill] sm:$0xff] }
 0x37a   :  { %v3294_v15 = vmax.f32 %v3278_v30, 0.0  ;;  %v3281_v42 = vadd.f32 %v6527_v34, %v3243_v7  ;;  %v3137_v24 = vpop.f32.mrf.mxu0  ;;  %v3307_v4 = vmax.f32 %v3291_v21, %v3293_v8  ;;  %v3226_v12 = vpop.f32.mrf.mxu1 }
 0x37b   :  { %v3295_v3 = vmax.f32 %v3279_v14, 0.0  ;;  %v3280_v28 = vadd.f32 %v6531_v31, %v3242_v60  ;;  %v3245_v55 = vadd.f32 %v3137_v24, %v2831_v43  ;;  %v3282_v62 = vadd.f32 %v6535_v54, %v3244_v51 }
 0x37c   :  { %v3308_v26 = vmax.f32 %v3292_v56, %v3294_v15  ;;  %v3297_v49 = vmax.f32 %v3281_v42, 0.0  ;;  %v3247_v50 = vadd.f32 %v3226_v12, %v2920_v5  ;;  %v3139_v0 = vpop.f32.mrf.mxu0  ;;  %v3228_v40 = vpop.f32.mrf.mxu1 }
 0x37d   :  { %v3296_v9 = vmax.f32 %v3280_v28, 0.0  ;;  %v3283_v47 = vadd.f32 %v6523_v13, %v3245_v55  ;;  %v3246_v33 = vadd.f32 %v3139_v0, %v2833_v20  ;;  %v3298_v32 = vmax.f32 %v3282_v62, 0.0 }
 0x37e   :  { %v3323_v23 = vcombine.low %v3307_v4, %v3308_v26  ;;  %v3324_v6 = vcombine.high %v3307_v4, %v3308_v26  ;;  %v3143_v63 = vpop.f32.mrf.mxu0  ;;  %v3309_v36 = vmax.f32 %v3295_v3, %v3297_v49  ;;  %v3285_v57 = vadd.f32 %v6527_v34, %v3247_v50  ;;  %v3232_v29 = vpop.f32.mrf.mxu1 }
 0x37f   :  { %v3284_v1 = vadd.f32 %v6531_v31, %v3246_v33  ;;  %v3248_v41 = vadd.f32 %v3228_v40, %v2922_v2  ;;  %v3310_v53 = vmax.f32 %v3296_v9, %v3298_v32  ;;  %v3299_v18 = vmax.f32 %v3283_v47, 0.0 }
 0x380   :  { %v3331_v45 = vrot.slane %v3323_v23, %v6884_v38  ;;  %v3338_v46 = vrot.slane %v3324_v6, %v6884_v38  ;;  %v3301_v16 = vmax.f32 %v3285_v57, 0.0  ;;  %v3249_v48 = vadd.f32 %v3143_v63, %v2837_v22  ;;  %v3145_v51 = vpop.f32.mrf.mxu0  ;;  %v3234_v24 = vpop.f32.mrf.mxu1 }
 0x381   :  { %v3300_v25 = vmax.f32 %v3284_v1, 0.0  ;;  %v3286_v52 = vadd.f32 %v6535_v54, %v3248_v41  ;;  %v3251_v44 = vadd.f32 %v3232_v29, %v2926_v10  ;;  %v3341_v21 = vcombine.low %v3309_v36, %v3310_v53 }
 0x382   :  { %v3339_v43 = vcombine.high %v3331_v45, %v3331_v45  ;;  %v3340_v11 = vcombine.high %v3338_v46, %v3338_v46  ;;  %v3399_v37 = vrot.slane %v3331_v45, %v6884_v38  ;;  %v6555_v5 = vrot.slane %v3338_v46, %v6884_v38 }
 0x383   :  { %v3342_v19 = vcombine.high %v3309_v36, %v3310_v53  ;;  %v3302_v39 = vmax.f32 %v3286_v52, 0.0  ;;  %v3311_v30 = vmax.f32 %v3299_v18, %v3301_v16  ;;  %v3349_v17 = vrot.slane %v3341_v21, %v6884_v38 }
 0x384   :  { %v3400_v20 = vcombine.high %v3399_v37, %v3399_v37  ;;  %v3407_v8 = vrot.slane %v3339_v43, %v6884_v38  ;;  %v3533_v7 = vsel %vm1630_vm4, %v3399_v37, -inf  ;;  %v3287_v58 = vadd.f32 %v6523_v13, %v3249_v48 }
 0x385   :  { %v3356_v2 = vrot.slane %v3342_v19, %v6884_v38  ;;  %v3312_v56 = vmax.f32 %v3300_v25, %v3302_v39  ;;  %v3534_v14 = vrot.slane %v3533_v7, 4  ;;  %v3289_v22 = vadd.f32 %v6527_v34, %v3251_v44 }
 0x386   :  { %v6564_v60 = vsel %vm1630_vm4, %v3407_v8, -inf  ;;  %v3416_v27 = vcombine.high %v6555_v5, %v6555_v5  ;;  %v6571_v35 = vrot.slane %v3340_v11, %v6884_v38  ;;  %v3357_v15 = vcombine.high %v3349_v17, %v3349_v17 }
 0x387   :  { %v6574_v42 = vrot.slane %v3349_v17, %v6884_v38  ;;  %v3535_v4 = vmax.f32 %v3533_v7, %v3534_v14  ;;  %v3358_v3 = vcombine.low %v3311_v30, %v3312_v56  ;;  %v3359_v28 = vcombine.high %v3311_v30, %v3312_v56 }
 0x388   :  { %v3303_v55 = vmax.f32 %v3287_v58, 0.0  ;;  %v3548_v13 = vrot.slane %v6564_v60, 4  ;;  %v6580_v12 = vrot.slane %v3356_v2, %v6884_v38  ;;  %v3305_v26 = vmax.f32 %v3289_v22, 0.0 }
 0x389   :  { %v3432_v34 = vcombine.high %v6574_v42, %v6574_v42  ;;  %v3366_v49 = vrot.slane %v3358_v3, %v6884_v38  ;;  %v3373_v62 = vrot.slane %v3359_v28, %v6884_v38  ;;  %v3250_v50 = vadd.f32 %v3145_v51, %v2839_v59 }
 0x38a   :  { %v3252_v0 = vadd.f32 %v3234_v24, %v2928_v61  ;;  %v6585_v10 = vrot.slane %v3357_v15, %v6884_v38  ;;  %v3313_v9 = vmax.f32 %v3303_v55, %v3305_v26  ;;  %v3540_v47 = vsel %vm1630_vm4, %v3400_v20, -inf }
 0x38b   :  { %v3536_v33 = vrot.slane %v3535_v4, 2  ;;  %v3374_v40 = vcombine.high %v3366_v49, %v3366_v49  ;;  %v3375_v23 = vcombine.high %v3373_v62, %v3373_v62  ;;  %v3455_v6 = vrot.slane %v3366_v49, %v6884_v38 }
 0x38c   :  { %v6590_v32 = vrot.slane %v3373_v62, %v6884_v38  ;;  %v3448_v63 = vcombine.high %v6580_v12, %v6580_v12  ;;  %v3288_v59 = vadd.f32 %v6531_v31, %v3250_v50  ;;  %v3290_v36 = vadd.f32 %v6535_v54, %v3252_v0 }
 0x38d   :  { %v3541_v57 = vrot.slane %v3540_v47, 4  ;;  %v3456_v1 = vcombine.high %v3455_v6, %v3455_v6  ;;  %v3463_v41 = vrot.slane %v3374_v40, %v6884_v38  ;;  %v3537_v29 = vmax.f32 %v3535_v4, %v3536_v33 }
 0x38e   :  { %v3408_v45 = vcombine.high %v3407_v8, %v3407_v8  ;;  %v3631_v46 = vsel %vm1630_vm4, %v3455_v6, -inf  ;;  %v3304_v53 = vmax.f32 %v3288_v59, 0.0  ;;  %v3306_v18 = vmax.f32 %v3290_v36, 0.0 }
 0x38f   :  { %v3542_v16 = vmax.f32 %v3540_v47, %v3541_v57  ;;  %v3472_v25 = vcombine.high %v6590_v32, %v6590_v32  ;;  %v6601_v52 = vrot.slane %v3375_v23, %v6884_v38  ;;  %v3632_v31 = vrot.slane %v3631_v46, 4 }
 0x390   :  { %v3638_v54 = vsel %vm1630_vm4, %v3456_v1, -inf  ;;  %v3645_v48 = vsel %vm1630_vm4, %v3463_v41, -inf  ;;  %v3314_v43 = vmax.f32 %v3304_v53, %v3306_v18  ;;  %v3538_v21 = vrot.slane %v3537_v29, 1 }
 0x391   :  { %v3543_v11 = vrot.slane %v3542_v16, 2  ;;  %v3639_v37 = vrot.slane %v3638_v54, 4  ;;  %v3633_v44 = vmax.f32 %v3631_v46, %v3632_v31  ;;  %v3464_v19 = vcombine.high %v3463_v41, %v3463_v41 }
 0x392   :  { %v3554_v39 = vsel %vm1630_vm4, %v3408_v45, -inf  ;;  %v3376_v61 = vcombine.low %v3313_v9, %v3314_v43  ;;  %v3377_v20 = vcombine.high %v3313_v9, %v3314_v43  ;;  %v3424_v56 = vcombine.high %v6571_v35, %v6571_v35 }
 0x393   :  { %v3544_v8 = vmax.f32 %v3542_v16, %v3543_v11  ;;  %v3640_v30 = vmax.f32 %v3638_v54, %v3639_v37  ;;  %v3634_v7 = vrot.slane %v3633_v44, 2  ;;  %v3555_v17 = vrot.slane %v3554_v39, 4  ;;  %v4078_v37 = vld [vmem:[#allocation10 + $0x378] sm:$0xff] }
 0x394   :  { %v3652_v2 = vsel %vm1630_vm4, %v3464_v19, -inf  ;;  %v3384_v14 = vrot.slane %v3376_v61, %v6884_v38  ;;  %v3391_v58 = vrot.slane %v3377_v20, %v6884_v38  ;;  %v3646_v51 = vrot.slane %v3645_v48, 4 }
 0x395   :  { %v3545_v22 = vrot.slane %v3544_v8, 1  ;;  %v3641_v15 = vrot.slane %v3640_v30, 2  ;;  %v3635_v24 = vmax.f32 %v3633_v44, %v3634_v7  ;;  %v3556_v4 = vmax.f32 %v3554_v39, %v3555_v17 }
 0x396   :  { %v3653_v3 = vrot.slane %v3652_v2, 4  ;;  %v3392_v28 = vcombine.high %v3384_v14, %v3384_v14  ;;  %v6612_v55 = vrot.slane %v3384_v14, %v6884_v38  ;;  %v3539_v26 = vmax.f32 %v3537_v29, %v3538_v21 }
 0x397   :  { %v3480_v49 = vcombine.high %v6601_v52, %v6601_v52  ;;  %v3642_v62 = vmax.f32 %v3640_v30, %v3641_v15  ;;  %v3636_v50 = vrot.slane %v3635_v24, 1  ;;  %v3557_v0 = vrot.slane %v3556_v4, 2 }
 0x398   :  { %v3654_v9 = vmax.f32 %v3652_v2, %v3653_v3  ;;  %v6617_v47 = vrot.slane %v3392_v28, %v6884_v38  ;;  %v6620_v33 = vrot.slane %v3391_v58, %v6884_v38  ;;  %v3546_v40 = vmax.f32 %v3544_v8, %v3545_v22  ;;  %v4077_v8 = vld [vmem:[#allocation10 + $0x370] sm:$0xff]  ;;  %v4092_v58 = vld [vmem:[#allocation10 + $0x3e8] sm:$0xff] }
 0x399   :  { %v3582_v23 = vsel %vm1630_vm4, %v3424_v56, -inf  ;;  %v3643_v6 = vrot.slane %v3642_v62, 1  ;;  %v3637_v59 = vmax.f32 %v3635_v24, %v3636_v50  ;;  %v3558_v36 = vmax.f32 %v3556_v4, %v3557_v0  ;;  %v4076_v24 = vld [vmem:[#allocation10 + $0x368] sm:$0xff]  ;;  %v4075_v0 = vld [vmem:[#allocation10 + $0x360] sm:$0xff] }
 0x39a   :  { %v3655_v57 = vrot.slane %v3654_v9, 2  ;;  %v3583_v1 = vrot.slane %v3582_v23, 4  ;;  %v3680_v41 = vsel %vm1630_vm4, %v3480_v49, -inf  ;;  %v3549_v29 = vmax.f32 %v6564_v60, %v3548_v13  ;;  %v4093_v13 = vld [vmem:[#allocation10 + $0x3f0] sm:$0xff]  ;;  %v3966_v49 = vld [vmem:[#allocation10 + $0x278] sm:$0xff] }
 0x39b   :  { %v3647_v45 = vmax.f32 %v3645_v48, %v3646_v51  ;;  %v3644_v46 = vmax.f32 %v3642_v62, %v3643_v6  ;;  %v3876_v53 = vsel %vm2206_vm5, %v3637_v59, %v3539_v26  ;;  %v3559_v38 = vrot.slane %v3558_v36, 1 }
 0x39c   :  { %v3656_v18 = vmax.f32 %v3654_v9, %v3655_v57  ;;  %v3584_v16 = vmax.f32 %v3582_v23, %v3583_v1  ;;  %v3681_v31 = vrot.slane %v3680_v41, 4  ;;  %v3550_v54 = vrot.slane %v3549_v29, 2  ;;  %v4090_v57 = vld [vmem:[#allocation10 + $0x3d8] sm:$0xff] }
 0x39d   :  { %v3648_v43 = vrot.slane %v3647_v45, 2  ;;  %v3877_v11 = vsel %vm2206_vm5, %v3644_v46, %v3546_v40  ;;  %v3560_v44 = vmax.f32 %v3558_v36, %v3559_v38  ;;  %v3568_v60 = vsel %vm1630_vm4, %v3416_v27, -inf  ;;  %v3981_v36 = vld [vmem:[#allocation10 + $0x2f0] sm:$0xff]  ;;  %v4074_v46 = vld [vmem:[#allocation10 + $0x358] sm:$0xff] }
 0x39e   :  { %v3657_v21 = vrot.slane %v3656_v18, 1  ;;  %3944 = vmatprep.mubr.f32.mxu1 %v3877_v11  ;;  %v3585_v48 = vrot.slane %v3584_v16, 2  ;;  %v3682_v19 = vmax.f32 %v3680_v41, %v3681_v31  ;;  %v3551_v39 = vmax.f32 %v3549_v29, %v3550_v54  ;;  %v3964_v11 = vld [vmem:[#allocation10 + $0x268] sm:$0xff] }
 0x39f   :  { %v3649_v61 = vmax.f32 %v3647_v45, %v3648_v43  ;;  %3945 = vmatmul.mubr.f32.vlgmr.msra.gmra.mxu1 %v3876_v53  ;;  %v3569_v30 = vrot.slane %v3568_v60, 4  ;;  %v3666_v7 = vsel %vm1630_vm4, %v3472_v25, -inf  ;;  %v3575_v17 = vsel %vm1630_vm4, %v6571_v35, -inf  ;;  %v4091_v35 = vld [vmem:[#allocation10 + $0x3e0] sm:$0xff]  ;;  %v3965_v45 = vld [vmem:[#allocation10 + $0x270] sm:$0xff] }
 0x3a0   :  { %v3658_v20 = vmax.f32 %v3656_v18, %v3657_v21  ;;  %4808 = vmatpush3.msra.mxu1 %v4078_v37  ;;  %v3586_v27 = vmax.f32 %v3584_v16, %v3585_v48  ;;  %v3683_v2 = vrot.slane %v3682_v19, 2  ;;  %v3552_v56 = vrot.slane %v3551_v39, 1  ;;  %v4089_v37 = vld [vmem:[#allocation10 + $0x3d0] sm:$0xff] }
 0x3a1   :  { %v3650_v14 = vrot.slane %v3649_v61, 1  ;;  %4809 = vmatprep.subr.mxu1 %v4093_v13  ;;  %v3570_v15 = vmax.f32 %v3568_v60, %v3569_v30  ;;  %v3667_v51 = vrot.slane %v3666_v7, 4  ;;  %v3576_v4 = vrot.slane %v3575_v17, 4  ;;  %v3979_v13 = vld [vmem:[#allocation10 + $0x2e0] sm:$0xff]  ;;  %v4073_v48 = vld [vmem:[#allocation10 + $0x350] sm:$0xff] }
 0x3a2   :  { %v3799_v22 = vsel %vm2206_vm5, %v3658_v20, %v3560_v44  ;;  %v3587_v3 = vrot.slane %v3586_v27, 1  ;;  %v3684_v28 = vmax.f32 %v3682_v19, %v3683_v2  ;;  %v3553_v25 = vmax.f32 %v3551_v39, %v3552_v56  ;;  %4810 = vmatpush3.msra.mxu1 %v4077_v8  ;;  %v3963_v30 = vld [vmem:[#allocation10 + $0x260] sm:$0xff]  ;;  %v4072_v2 = vld [vmem:[#allocation10 + $0x348] sm:$0xff] }
 0x3a3   :  { %3866 = vmatprep.mubr.f32.mxu0 %v3799_v22  ;;  %v3651_v26 = vmax.f32 %v3649_v61, %v3650_v14  ;;  %v3571_v62 = vrot.slane %v3570_v15, 2  ;;  %v3668_v50 = vmax.f32 %v3666_v7, %v3667_v51  ;;  %4811 = vmatprep.subr.mxu1 %v4092_v58  ;;  %v3577_v9 = vmax.f32 %v3575_v17, %v3576_v4  ;;  %v4088_v7 = vld [vmem:[#allocation10 + $0x3c8] sm:$0xff] }
 0x3a4   :  { %v3673_v40 = vsel %vm1630_vm4, %v6601_v52, -inf  ;;  %v3588_v23 = vmax.f32 %v3586_v27, %v3587_v3  ;;  %v3685_v6 = vrot.slane %v3684_v28, 1  ;;  %4812 = vmatpush3.msra.mxu1 %v4076_v24  ;;  %v3440_v38 = vcombine.high %v6585_v10, %v6585_v10  ;;  %v3980_v52 = vld [vmem:[#allocation10 + $0x2e8] sm:$0xff]  ;;  %v3978_v27 = vld [vmem:[#allocation10 + $0x2d8] sm:$0xff] }
 0x3a5   :  { %v3798_v59 = vsel %vm2206_vm5, %v3651_v26, %v3553_v25  ;;  %v3674_v1 = vrot.slane %v3673_v40, 4  ;;  %v3572_v41 = vmax.f32 %v3570_v15, %v3571_v62  ;;  %v3669_v29 = vrot.slane %v3668_v50, 2  ;;  %4813 = vmatprep.subr.mxu1 %v4091_v35  ;;  %v3962_v24 = vld [vmem:[#allocation10 + $0x258] sm:$0xff]  ;;  %v4087_v25 = vld [vmem:[#allocation10 + $0x3c0] sm:$0xff] }
 0x3a6   :  { %3867 = vmatmul.mubr.f32.vlgmr.msra.gmra.mxu0 %v3798_v59  ;;  %v3578_v53 = vrot.slane %v3577_v9, 2  ;;  %v3686_v18 = vmax.f32 %v3684_v28, %v3685_v6  ;;  %4814 = vmatpush3.msra.mxu1 %v4075_v0  ;;  %v3496_v31 = vcombine.high %v6617_v47, %v6617_v47  ;;  %v3610_v44 = vsel %vm1630_vm4, %v3440_v38, -inf  ;;  %v3977_v28 = vld [vmem:[#allocation10 + $0x2d0] sm:$0xff]  ;;  %v4071_v0 = vld [vmem:[#allocation10 + $0x340] sm:$0xff]  ;;  %v3976_v6 = vld [vmem:[#allocation10 + $0x2c8] sm:$0xff] }
 0x3a7   :  { %4773 = vmatpush3.msra.mxu0 %v3966_v49  ;;  %v3675_v16 = vmax.f32 %v3673_v40, %v3674_v1  ;;  %v3573_v54 = vrot.slane %v3572_v41, 1  ;;  %v3670_v43 = vmax.f32 %v3668_v50, %v3669_v29  ;;  %4815 = vmatprep.subr.mxu1 %v4090_v57  ;;  %v3561_v21 = vsel %vm1630_vm4, %v6555_v5, -inf  ;;  %v3961_v50 = vld [vmem:[#allocation10 + $0x250] sm:$0xff]  ;;  %v4086_v59 = vld [vmem:[#allocation10 + $0x3b8] sm:$0xff] }
 0x3a8   :  { %4774 = vmatprep.subr.mxu0 %v3981_v36  ;;  %v4100_v60 = vsel %vm2206_vm5, %v3686_v18, %v3588_v23  ;;  %4816 = vmatpush3.msra.mxu1 %v4074_v46  ;;  %v3611_v39 = vrot.slane %v3610_v44, 4  ;;  %v3708_v61 = vsel %vm1630_vm4, %v3496_v31, -inf  ;;  %v3488_v20 = vcombine.high %v6612_v55, %v6612_v55  ;;  %v4070_v29 = vld [vmem:[#allocation10 + $0x338] sm:$0xff] }
 0x3a9   :  { %4775 = vmatpush3.msra.mxu0 %v3965_v45  ;;  %v3676_v19 = vrot.slane %v3675_v16, 2  ;;  %4167 = vmatprep.mubr.f32.mxu1 %v4100_v60  ;;  %v3671_v8 = vrot.slane %v3670_v43, 1  ;;  %v6654_v17 = vmax.f32 %v3577_v9, %v3578_v53  ;;  %v3709_v5 = vrot.slane %v3708_v61, 4 }
 0x3aa   :  { %4776 = vmatprep.subr.mxu0 %v3980_v52  ;;  %4817 = vmatprep.subr.mxu1 %v4089_v37  ;;  %v3612_v14 = vmax.f32 %v3610_v44, %v3611_v39  ;;  %v3562_v58 = vrot.slane %v3561_v21, 4  ;;  %v3659_v22 = vsel %vm1630_vm4, %v6590_v32, -inf  ;;  %v3574_v15 = vmax.f32 %v3572_v41, %v3573_v54  ;;  %v3975_v52 = vld [vmem:[#allocation10 + $0x2c0] sm:$0xff]  ;;  %v4069_v37 = vld [vmem:[#allocation10 + $0x330] sm:$0xff] }
 0x3ab   :  { %4777 = vmatpush3.msra.mxu0 %v3964_v11  ;;  %v3677_v56 = vmax.f32 %v3675_v16, %v3676_v19  ;;  %v3672_v51 = vmax.f32 %v3670_v43, %v3671_v8  ;;  %4818 = vmatpush3.msra.mxu1 %v4073_v48  ;;  %v3710_v4 = vmax.f32 %v3708_v61, %v3709_v5  ;;  %v3660_v3 = vrot.slane %v3659_v22, 4  ;;  %v4085_v16 = vld [vmem:[#allocation10 + $0x3b0] sm:$0xff]  ;;  %v3959_v11 = vld [vmem:[#allocation10 + $0x240] sm:$0xff]  ;;  %v3974_v48 = vld [vmem:[#allocation10 + $0x2b8] sm:$0xff] }
 0x3ac   :  { %4778 = vmatprep.subr.mxu0 %v3979_v13  ;;  %4819 = vmatprep.subr.mxu1 %v4088_v7  ;;  %v3613_v35 = vrot.slane %v3612_v14, 2  ;;  %v3563_v49 = vmax.f32 %v3561_v21, %v3562_v58  ;;  %v3596_v62 = vsel %vm1630_vm4, %v3432_v34, -inf  ;;  %v3580_v36 = vrot.slane %v6654_v17, 1  ;;  %v3960_v34 = vld [vmem:[#allocation10 + $0x248] sm:$0xff]  ;;  %v3958_v8 = vld [vmem:[#allocation10 + $0x238] sm:$0xff] }
 0x3ad   :  { %4779 = vmatpush3.msra.mxu0 %v3963_v30  ;;  %v3678_v26 = vrot.slane %v3677_v56, 1  ;;  %v3988_v32 = vsel %vm2206_vm5, %v3672_v51, %v3574_v15  ;;  %4820 = vmatpush3.msra.mxu1 %v4072_v2  ;;  %v3711_v9 = vrot.slane %v3710_v4, 2  ;;  %v3661_v40 = vmax.f32 %v3659_v22, %v3660_v3  ;;  %v4084_v19 = vld [vmem:[#allocation10 + $0x3a8] sm:$0xff]  ;;  %v3957_v15 = vld [vmem:[#allocation10 + $0x230] sm:$0xff]  ;;  %v4067_v51 = vld [vmem:[#allocation10 + $0x320] sm:$0xff] }
 0x3ae   :  { %4780 = vmatprep.subr.mxu0 %v3978_v27  ;;  %v3597_v23 = vrot.slane %v3596_v62, 4  ;;  %4055 = vmatprep.mubr.f32.mxu0 %v3988_v32  ;;  %v3614_v57 = vmax.f32 %v3612_v14, %v3613_v35  ;;  %v3564_v1 = vrot.slane %v3563_v49, 2  ;;  %v3694_v41 = vsel %vm1630_vm4, %v3488_v20, -inf  ;;  %v4068_v30 = vld [vmem:[#allocation10 + $0x328] sm:$0xff]  ;;  %v4083_v14 = vld [vmem:[#allocation10 + $0x3a0] sm:$0xff] }
 0x3af   :  { %4781 = vmatpush3.msra.mxu0 %v3962_v24  ;;  %4821 = vmatprep.subr.mxu1 %v4087_v25  ;;  %v3712_v45 = vmax.f32 %v3710_v4, %v3711_v9  ;;  %v3662_v46 = vrot.slane %v3661_v40, 2  ;;  %v3695_v38 = vrot.slane %v3694_v41, 4  ;;  %v3504_v18 = vcombine.high %v6620_v33, %v6620_v33  ;;  %v3972_v25 = vld [vmem:[#allocation10 + $0x2a8] sm:$0xff] }
 0x3b0   :  { %4782 = vmatprep.subr.mxu0 %v3977_v28  ;;  %v3598_v53 = vmax.f32 %v3596_v62, %v3597_v23  ;;  %4822 = vmatpush3.msra.mxu1 %v4071_v0  ;;  %v3679_v31 = vmax.f32 %v3677_v56, %v3678_v26  ;;  %v3615_v54 = vrot.slane %v3614_v57, 1  ;;  %v3603_v43 = vsel %vm1630_vm4, %v6585_v10, -inf  ;;  %v3973_v56 = vld [vmem:[#allocation10 + $0x2b0] sm:$0xff]  ;;  %v4082_v26 = vld [vmem:[#allocation10 + $0x398] sm:$0xff]  ;;  %v3956_v32 = vld [vmem:[#allocation10 + $0x228] sm:$0xff] }
 0x3b1   :  { %4783 = vmatpush3.msra.mxu0 %v3961_v50  ;;  %4823 = vmatprep.subr.mxu1 %v4086_v59  ;;  %v3713_v44 = vrot.slane %v3712_v45, 1  ;;  %v6669_v21 = vmax.f32 %v3563_v49, %v3564_v1  ;;  %v3696_v13 = vmax.f32 %v3694_v41, %v3695_v38  ;;  %v3581_v39 = vmax.f32 %v6654_v17, %v3580_v36  ;;  %v4066_v50 = vld [vmem:[#allocation10 + $0x318] sm:$0xff]  ;;  %v4081_v59 = vld [vmem:[#allocation10 + $0x390] sm:$0xff]  ;;  %v3955_v41 = vld [vmem:[#allocation10 + $0x220] sm:$0xff] }
 0x3b2   :  { %4784 = vmatprep.subr.mxu0 %v3976_v6  ;;  %v3599_v60 = vrot.slane %v3598_v53, 2  ;;  %4824 = vmatpush3.msra.mxu1 %v4070_v29  ;;  %v6672_v61 = vmax.f32 %v3661_v40, %v3662_v46  ;;  %v3604_v20 = vrot.slane %v3603_v43, 4  ;;  %v3701_v10 = vsel %vm1630_vm4, %v6617_v47, -inf  ;;  %v3971_v6 = vld [vmem:[#allocation10 + $0x2a0] sm:$0xff]  ;;  %v3970_v38 = vld [vmem:[#allocation10 + $0x298] sm:$0xff] }
 0x3b3   :  { %4785 = vmatpush3.msra.mxu0 %v3960_v34  ;;  %4825 = vmatprep.subr.mxu1 %v4085_v16  ;;  %v3616_v7 = vmax.f32 %v3614_v57, %v3615_v54  ;;  %v3714_v5 = vmax.f32 %v3712_v45, %v3713_v44  ;;  %v3697_v2 = vrot.slane %v3696_v13, 2  ;;  %v6677_v17 = vsel %vm2206_vm5, %v3679_v31, %v3581_v39  ;;  %v4065_v34 = vld [vmem:[#allocation10 + $0x310] sm:$0xff] }
 0x3b4   :  { %4786 = vmatprep.subr.mxu0 %v3975_v52  ;;  %v3600_v27 = vmax.f32 %v3598_v53, %v3599_v60  ;;  %4826 = vmatpush3.msra.mxu1 %v4069_v37  ;;  %v3605_v58 = vmax.f32 %v3603_v43, %v3604_v20  ;;  %v3702_v22 = vrot.slane %v3701_v10, 4  ;;  %v3589_v47 = vsel %vm1630_vm4, %v6574_v42, -inf  ;;  %v4080_v52 = vld [vmem:[#allocation10 + $0x388] sm:$0xff]  ;;  %v3954_v43 = vld [vmem:[#allocation10 + $0x218] sm:$0xff] }
 0x3b5   :  { %4787 = vmatpush3.msra.mxu0 %v3959_v11  ;;  %4827 = vmatprep.subr.mxu1 %v4084_v19  ;;  %v6682_v24 = vsel %vm2206_vm5, %v3714_v5, %v3616_v7  ;;  %v3566_v4 = vrot.slane %v6669_v21, 1  ;;  %v3698_v28 = vmax.f32 %v3696_v13, %v3697_v2  ;;  %v3590_v62 = vrot.slane %v3589_v47, 4  ;;  %v4064_v11 = vld [vmem:[#allocation10 + $0x308] sm:$0xff]  ;;  %v3969_v13 = vld [vmem:[#allocation10 + $0x290] sm:$0xff] }
 0x3b6   :  { %4788 = vmatprep.subr.mxu0 %v3974_v48  ;;  %v3601_v3 = vrot.slane %v3600_v27, 1  ;;  %4828 = vmatpush3.msra.mxu1 %v4068_v30  ;;  %v3606_v35 = vrot.slane %v3605_v58, 2  ;;  %v3703_v49 = vmax.f32 %v3701_v10, %v3702_v22  ;;  %v3687_v42 = vsel %vm1630_vm4, %v6612_v55, -inf  ;;  %v4079_v48 = vld [vmem:[#allocation10 + $0x380] sm:$0xff] }
 0x3b7   :  { %4789 = vmatpush3.msra.mxu0 %v3958_v8  ;;  %4829 = vmatprep.subr.mxu1 %v4083_v14  ;;  %v3664_v0 = vrot.slane %v6672_v61, 1  ;;  %v3699_v40 = vrot.slane %v3698_v28, 1  ;;  %v3688_v23 = vrot.slane %v3687_v42, 4  ;;  %v3591_v1 = vmax.f32 %v3589_v47, %v3590_v62  ;;  %v3953_v8 = vld [vmem:[#allocation10 + $0x210] sm:$0xff]  ;;  %v4063_v30 = vld [vmem:[#allocation10 + $0x300] sm:$0xff]  ;;  %v3952_v47 = vld [vmem:[#allocation10 + $0x208] sm:$0xff] }
 0x3b8   :  { %4790 = vmatprep.subr.mxu0 %v3973_v56  ;;  %v3602_v9 = vmax.f32 %v3600_v27, %v3601_v3  ;;  %4830 = vmatpush3.msra.mxu1 %v4067_v51  ;;  %v3607_v36 = vmax.f32 %v3605_v58, %v3606_v35  ;;  %v3704_v57 = vrot.slane %v3703_v49, 2  ;;  %v3624_v55 = vsel %vm1630_vm4, %v3448_v63, -inf }
 0x3b9   :  { %4791 = vmatpush3.msra.mxu0 %v3957_v15  ;;  %4831 = vmatprep.subr.mxu1 %v4082_v26  ;;  %v3700_v29 = vmax.f32 %v3698_v28, %v3699_v40  ;;  %v3689_v45 = vmax.f32 %v3687_v42, %v3688_v23  ;;  %v3625_v46 = vrot.slane %v3624_v55, 4  ;;  %v3722_v53 = vsel %vm1630_vm4, %v3504_v18, -inf  ;;  %v4318_v15 = vld [vmem:[#allocation10 + $0x5f8] sm:$0xff]  ;;  %v3951_v42 = vld [vmem:[#allocation10 + $0x200] sm:$0xff] }
 0x3ba   :  { %4792 = vmatprep.subr.mxu0 %v3972_v25  ;;  %4832 = vmatpush3.msra.mxu1 %v4066_v50  ;;  %v3608_v16 = vrot.slane %v3607_v36, 1  ;;  %v3705_v31 = vmax.f32 %v3703_v49, %v3704_v57  ;;  %v3592_v54 = vrot.slane %v3591_v1, 2  ;;  %v3723_v63 = vrot.slane %v3722_v53, 4  ;;  %v4302_v26 = vld [vmem:[#allocation10 + $0x578] sm:$0xff] }
 0x3bb   :  { %4793 = vmatpush3.msra.mxu0 %v3956_v32  ;;  %4833 = vmatprep.subr.mxu1 %v4081_v59  ;;  %v6697_v37 = vsel %vm2206_vm5, %v3700_v29, %v3602_v9  ;;  %v3690_v44 = vrot.slane %v3689_v45, 2  ;;  %v3626_v60 = vmax.f32 %v3624_v55, %v3625_v46  ;;  %v3617_v18 = vsel %vm1630_vm4, %v6580_v12, -inf  ;;  %v3968_v12 = vld [vmem:[#allocation10 + $0x288] sm:$0xff]  ;;  %v4206_v40 = vld [vmem:[#allocation10 + $0x4f8] sm:$0xff]  ;;  %v4301_v55 = vld [vmem:[#allocation10 + $0x570] sm:$0xff] }
 0x3bc   :  { %4794 = vmatprep.subr.mxu0 %v3971_v6  ;;  %4834 = vmatpush3.msra.mxu1 %v4065_v34  ;;  %v3609_v19 = vmax.f32 %v3607_v36, %v3608_v16  ;;  %v3706_v39 = vrot.slane %v3705_v31, 1  ;;  %v3593_v20 = vmax.f32 %v3591_v1, %v3592_v54  ;;  %v3724_v10 = vmax.f32 %v3722_v53, %v3723_v63  ;;  %v4317_v6 = vld [vmem:[#allocation10 + $0x5f0] sm:$0xff]  ;;  %v4190_v59 = vld [vmem:[#allocation10 + $0x478] sm:$0xff]  ;;  %v4300_v53 = vld [vmem:[#allocation10 + $0x568] sm:$0xff] }
 0x3bd   :  { %4795 = vmatpush3.msra.mxu0 %v3955_v41  ;;  %4835 = vmatprep.subr.mxu1 %v4080_v52  ;;  %v3691_v7 = vmax.f32 %v3689_v45, %v3690_v44  ;;  %v3627_v5 = vrot.slane %v3626_v60, 2  ;;  %v3618_v27 = vrot.slane %v3617_v18, 4  ;;  %v3715_v2 = vsel %vm1630_vm4, %v6620_v33, -inf  ;;  %v3967_v33 = vld [vmem:[#allocation10 + $0x280] sm:$0xff]  ;;  %v4189_v46 = vld [vmem:[#allocation10 + $0x470] sm:$0xff] }
 0x3be   :  { %4796 = vmatprep.subr.mxu0 %v3970_v38  ;;  %4836 = vmatpush3.msra.mxu1 %v4064_v11  ;;  %v3707_v56 = vmax.f32 %v3705_v31, %v3706_v39  ;;  %v3594_v14 = vrot.slane %v3593_v20, 1  ;;  %v3725_v58 = vrot.slane %v3724_v10, 2  ;;  %v3716_v22 = vrot.slane %v3715_v2, 4  ;;  %v4315_v52 = vld [vmem:[#allocation10 + $0x5e0] sm:$0xff]  ;;  %v4188_v31 = vld [vmem:[#allocation10 + $0x468] sm:$0xff]  ;;  %v4297_v39 = vld [vmem:[#allocation10 + $0x550] sm:$0xff] }
 0x3bf   :  { %4797 = vmatpush3.msra.mxu0 %v3954_v43  ;;  %4837 = vmatprep.subr.mxu1 %v4079_v48  ;;  %v3665_v51 = vmax.f32 %v6672_v61, %v3664_v0  ;;  %v3692_v3 = vrot.slane %v3691_v7, 1  ;;  %v3628_v28 = vmax.f32 %v3626_v60, %v3627_v5  ;;  %v3619_v25 = vmax.f32 %v3617_v18, %v3618_v27  ;;  %v4299_v54 = vld [vmem:[#allocation10 + $0x560] sm:$0xff]  ;;  %v4314_v43 = vld [vmem:[#allocation10 + $0x5d8] sm:$0xff]  ;;  %v4184_v27 = vld [vmem:[#allocation10 + $0x448] sm:$0xff] }
 0x3c0   :  { %4798 = vmatprep.subr.mxu0 %v3969_v13  ;;  %4838 = vmatpush3.msra.mxu1 %v4063_v30  ;;  %v6707_v35 = vsel %vm2206_vm5, %v3707_v56, %v3609_v19  ;;  %v3595_v49 = vmax.f32 %v3593_v20, %v3594_v14  ;;  %v3726_v62 = vmax.f32 %v3724_v10, %v3725_v58  ;;  %v4203_v63 = vld [vmem:[#allocation10 + $0x4e0] sm:$0xff]  ;;  %v4298_v18 = vld [vmem:[#allocation10 + $0x558] sm:$0xff]  ;;  %v4313_v13 = vld [vmem:[#allocation10 + $0x5d0] sm:$0xff] }
 0x3c1   :  { %4799 = vmatpush3.msra.mxu0 %v3953_v8  ;;  %4168 = vmatmul.mubr.f32.vlgmr.msra.gmra.mxu1 %v6677_v17  ;;  %v3693_v32 = vmax.f32 %v3691_v7, %v3692_v3  ;;  %v3629_v50 = vrot.slane %v3628_v28, 1  ;;  %v3620_v9 = vrot.slane %v3619_v25, 2  ;;  %v3717_v61 = vmax.f32 %v3715_v2, %v3716_v22  ;;  %v4187_v60 = vld [vmem:[#allocation10 + $0x460] sm:$0xff]  ;;  %v4186_v19 = vld [vmem:[#allocation10 + $0x458] sm:$0xff]  ;;  %v4201_v20 = vld [vmem:[#allocation10 + $0x4d0] sm:$0xff] }
 0x3c2   :  { %4800 = vmatprep.subr.mxu0 %v3968_v12  ;;  %4877 = vmatprep.subr.mxu1 %v4318_v15  ;;  %v3567_v0 = vmax.f32 %v6669_v21, %v3566_v4  ;;  %v3727_v23 = vrot.slane %v3726_v62, 1  ;;  %v4205_v21 = vld [vmem:[#allocation10 + $0x4f0] sm:$0xff]  ;;  %v4316_v4 = vld [vmem:[#allocation10 + $0x5e8] sm:$0xff]  ;;  %v4311_v5 = vld [vmem:[#allocation10 + $0x5c0] sm:$0xff] }
 0x3c3   :  { %4801 = vmatpush3.msra.mxu0 %v3952_v47  ;;  %4878 = vmatpush3.msra.mxu1 %v4302_v26  ;;  %v6714_v36 = vsel %vm2206_vm5, %v3693_v32, %v3595_v49  ;;  %v3621_v17 = vmax.f32 %v3619_v25, %v3620_v9  ;;  %v3718_v57 = vrot.slane %v3717_v61, 2  ;;  %v3630_v41 = vmax.f32 %v3628_v28, %v3629_v50  ;;  %v4312_v10 = vld [vmem:[#allocation10 + $0x5c8] sm:$0xff]  ;;  %v4185_v8 = vld [vmem:[#allocation10 + $0x450] sm:$0xff]  ;;  %v4295_v2 = vld [vmem:[#allocation10 + $0x540] sm:$0xff] }
 0x3c4   :  { %4802 = vmatprep.subr.mxu0 %v3967_v33  ;;  %4391 = vmatprep.mubr.f32.mxu1 %v6682_v24  ;;  %v3987_v1 = vsel %vm2206_vm5, %v3665_v51, %v3567_v0  ;;  %v3728_v34 = vmax.f32 %v3726_v62, %v3727_v23  ;;  %v4204_v24 = vld [vmem:[#allocation10 + $0x4e8] sm:$0xff]  ;;  %v4199_v12 = vld [vmem:[#allocation10 + $0x4c0] sm:$0xff]  ;;  %v4310_v56 = vld [vmem:[#allocation10 + $0x5b8] sm:$0xff] }
 0x3c5   :  { %4803 = vmatpush3.msra.mxu0 %v3951_v42  ;;  %v3622_v29 = vrot.slane %v3621_v17, 1  ;;  %v3719_v45 = vmax.f32 %v3717_v61, %v3718_v57  ;;  %4879 = vmatprep.subr.mxu1 %v4317_v6  ;;  %v4296_v30 = vld [vmem:[#allocation10 + $0x548] sm:$0xff]  ;;  %v4183_v14 = vld [vmem:[#allocation10 + $0x440] sm:$0xff]  ;;  %v4294_v58 = vld [vmem:[#allocation10 + $0x538] sm:$0xff] }
 0x3c6   :  { %4056 = vmatmul.mubr.f32.vlgmr.msra.gmra.mxu0 %v3987_v1  ;;  %4842 = vmatprep.subr.mxu0 %v4206_v40  ;;  %v6719_v38 = vsel %vm2206_vm5, %v3728_v34, %v3630_v41  ;;  %v4200_v7 = vld [vmem:[#allocation10 + $0x4c8] sm:$0xff]  ;;  %v4198_v22 = vld [vmem:[#allocation10 + $0x4b8] sm:$0xff]  ;;  %v4309_v47 = vld [vmem:[#allocation10 + $0x5b0] sm:$0xff] }
 0x3c7   :  { %4843 = vmatpush3.msra.mxu0 %v4190_v59  ;;  %4279 = vmatprep.mubr.f32.mxu0 %v6697_v37  ;;  %v3720_v16 = vrot.slane %v3719_v45, 1  ;;  %v3623_v11 = vmax.f32 %v3621_v17, %v3622_v29  ;;  %v4202_v37 = vld [vmem:[#allocation10 + $0x4d8] sm:$0xff]  ;;  %v4293_v51 = vld [vmem:[#allocation10 + $0x530] sm:$0xff]  ;;  %v4308_v28 = vld [vmem:[#allocation10 + $0x5a8] sm:$0xff] }
 0x3c8   :  { %4880 = vmatpush3.msra.mxu1 %v4301_v55  ;;  %4844 = vmatprep.subr.mxu0 %v4205_v21  ;;  %v4182_v15 = vld [vmem:[#allocation10 + $0x438] sm:$0xff]  ;;  %v4197_v3 = vld [vmem:[#allocation10 + $0x4b0] sm:$0xff]  ;;  %v4292_v33 = vld [vmem:[#allocation10 + $0x528] sm:$0xff] }
 0x3c9   :  { %4881 = vmatprep.subr.mxu1 %v4316_v4  ;;  %4845 = vmatpush3.msra.mxu0 %v4189_v46  ;;  %v3721_v44 = vmax.f32 %v3719_v45, %v3720_v16  ;;  %v4181_v25 = vld [vmem:[#allocation10 + $0x430] sm:$0xff]  ;;  %v4196_v26 = vld [vmem:[#allocation10 + $0x4a8] sm:$0xff]  ;;  %v4307_v49 = vld [vmem:[#allocation10 + $0x5a0] sm:$0xff] }
 0x3ca   :  { %4882 = vmatpush3.msra.mxu1 %v4300_v53  ;;  %4846 = vmatprep.subr.mxu0 %v4204_v24  ;;  %v4180_v62 = vld [vmem:[#allocation10 + $0x428] sm:$0xff]  ;;  %v4291_v42 = vld [vmem:[#allocation10 + $0x520] sm:$0xff]  ;;  %v4306_v50 = vld [vmem:[#allocation10 + $0x598] sm:$0xff]  ;;  %v6885_v24 = vmov 0.0  }
 0x3cb   :  { %4883 = vmatprep.subr.mxu1 %v4315_v52  ;;  %4847 = vmatpush3.msra.mxu0 %v4188_v31  ;;  %v6723_v48 = vsel %vm2206_vm5, %v3721_v44, %v3623_v11  ;;  %v4195_v32 = vld [vmem:[#allocation10 + $0x4a0] sm:$0xff]  ;;  %v4290_v61 = vld [vmem:[#allocation10 + $0x518] sm:$0xff]  ;;  %v4305_v40 = vld [vmem:[#allocation10 + $0x590] sm:$0xff] }
 0x3cc   :  { %4884 = vmatpush3.msra.mxu1 %v4299_v54  ;;  %4848 = vmatprep.subr.mxu0 %v4203_v63  ;;  %v4179_v9 = vld [vmem:[#allocation10 + $0x420] sm:$0xff]  ;;  %v4194_v0 = vld [vmem:[#allocation10 + $0x498] sm:$0xff]  ;;  %v4289_v6 = vld [vmem:[#allocation10 + $0x510] sm:$0xff] }
 0x3cd   :  { %4885 = vmatprep.subr.mxu1 %v4314_v43  ;;  %4849 = vmatpush3.msra.mxu0 %v4187_v60  ;;  %v4178_v23 = vld [vmem:[#allocation10 + $0x418] sm:$0xff]  ;;  %v4193_v59 = vld [vmem:[#allocation10 + $0x490] sm:$0xff]  ;;  %v4304_v17 = vld [vmem:[#allocation10 + $0x588] sm:$0xff] }
 0x3ce   :  { %4886 = vmatpush3.msra.mxu1 %v4298_v18  ;;  %4850 = vmatprep.subr.mxu0 %v4202_v37  ;;  %v4177_v57 = vld [vmem:[#allocation10 + $0x410] sm:$0xff]  ;;  %v4288_v1 = vld [vmem:[#allocation10 + $0x508] sm:$0xff]  ;;  %v4303_v41 = vld [vmem:[#allocation10 + $0x580] sm:$0xff] }
 0x3cf   :  { %4887 = vmatprep.subr.mxu1 %v4313_v13  ;;  %4851 = vmatpush3.msra.mxu0 %v4186_v19  ;;  %v4192_v55 = vld [vmem:[#allocation10 + $0x488] sm:$0xff]  ;;  %v4287_v21 = vld [vmem:[#allocation10 + $0x500] sm:$0xff]  ;;  %v4430_v45 = vld [vmem:[#allocation10 + $0x6f8] sm:$0xff] }
 0x3d0   :  { %4888 = vmatpush3.msra.mxu1 %v4297_v39  ;;  %4852 = vmatprep.subr.mxu0 %v4201_v20  ;;  %v4176_v34 = vld [vmem:[#allocation10 + $0x408] sm:$0xff]  ;;  %v4191_v4 = vld [vmem:[#allocation10 + $0x480] sm:$0xff]  ;;  %v4414_v46 = vld [vmem:[#allocation10 + $0x678] sm:$0xff] }
 0x3d1   :  { %4889 = vmatprep.subr.mxu1 %v4312_v10  ;;  %4853 = vmatpush3.msra.mxu0 %v4185_v8  ;;  %v4175_v29 = vld [vmem:[#allocation10 + $0x400] sm:$0xff]  ;;  %v4429_v53 = vld [vmem:[#allocation10 + $0x6f0] sm:$0xff]  ;;  %v4428_v16 = vld [vmem:[#allocation10 + $0x6e8] sm:$0xff] }
 0x3d2   :  { %4890 = vmatpush3.msra.mxu1 %v4296_v30  ;;  %4854 = vmatprep.subr.mxu0 %v4200_v7  ;;  %v4413_v52 = vld [vmem:[#allocation10 + $0x670] sm:$0xff]  ;;  %v4412_v31 = vld [vmem:[#allocation10 + $0x668] sm:$0xff]  ;;  %v4427_v54 = vld [vmem:[#allocation10 + $0x6e0] sm:$0xff] }
 0x3d3   :  { %4891 = vmatprep.subr.mxu1 %v4311_v5  ;;  %4855 = vmatpush3.msra.mxu0 %v4184_v27  ;;  %v4411_v63 = vld [vmem:[#allocation10 + $0x660] sm:$0xff]  ;;  %v4410_v43 = vld [vmem:[#allocation10 + $0x658] sm:$0xff]  ;;  %v4425_v11 = vld [vmem:[#allocation10 + $0x6d0] sm:$0xff] }
 0x3d4   :  { %4892 = vmatpush3.msra.mxu1 %v4295_v2  ;;  %4856 = vmatprep.subr.mxu0 %v4199_v12  ;;  %v4424_v44 = vld [vmem:[#allocation10 + $0x6c8] sm:$0xff]  ;;  %v4407_v18 = vld [vmem:[#allocation10 + $0x640] sm:$0xff]  ;;  %v4422_v37 = vld [vmem:[#allocation10 + $0x6b8] sm:$0xff] }
 0x3d5   :  { %4893 = vmatprep.subr.mxu1 %v4310_v56  ;;  %4857 = vmatpush3.msra.mxu0 %v4183_v14  ;;  %v4408_v60 = vld [vmem:[#allocation10 + $0x648] sm:$0xff]  ;;  %v4406_v13 = vld [vmem:[#allocation10 + $0x638] sm:$0xff]  ;;  %v4421_v19 = vld [vmem:[#allocation10 + $0x6b0] sm:$0xff] }
 0x3d6   :  { %4894 = vmatpush3.msra.mxu1 %v4294_v58  ;;  %4858 = vmatprep.subr.mxu0 %v4198_v22  ;;  %v4405_v39 = vld [vmem:[#allocation10 + $0x630] sm:$0xff]  ;;  %v4420_v20 = vld [vmem:[#allocation10 + $0x6a8] sm:$0xff]  ;;  %v4419_v8 = vld [vmem:[#allocation10 + $0x6a0] sm:$0xff] }
 0x3d7   :  { %4895 = vmatprep.subr.mxu1 %v4309_v47  ;;  %4859 = vmatpush3.msra.mxu0 %v4182_v15  ;;  %v4404_v10 = vld [vmem:[#allocation10 + $0x628] sm:$0xff]  ;;  %v4403_v30 = vld [vmem:[#allocation10 + $0x620] sm:$0xff]  ;;  %v4418_v7 = vld [vmem:[#allocation10 + $0x698] sm:$0xff] }
 0x3d8   :  { %4896 = vmatpush3.msra.mxu1 %v4293_v51  ;;  %4860 = vmatprep.subr.mxu0 %v4197_v3  ;;  %v4402_v5 = vld [vmem:[#allocation10 + $0x618] sm:$0xff]  ;;  %v4417_v27 = vld [vmem:[#allocation10 + $0x690] sm:$0xff]  ;;  %v4416_v12 = vld [vmem:[#allocation10 + $0x688] sm:$0xff] }
 0x3d9   :  { %4897 = vmatprep.subr.mxu1 %v4308_v28  ;;  %4861 = vmatpush3.msra.mxu0 %v4181_v25  ;;  %v4401_v2 = vld [vmem:[#allocation10 + $0x610] sm:$0xff]  ;;  %v4400_v56 = vld [vmem:[#allocation10 + $0x608] sm:$0xff]  ;;  %v4415_v14 = vld [vmem:[#allocation10 + $0x680] sm:$0xff] }
 0x3da   :  { %4898 = vmatpush3.msra.mxu1 %v4292_v33  ;;  %4862 = vmatprep.subr.mxu0 %v4196_v26  ;;  %v4399_v58 = vld [vmem:[#allocation10 + $0x600] sm:$0xff]  ;;  %v4533_v47 = vld [vmem:[#allocation13 + $0x70] sm:$0xff]  ;;  %v4532_v15 = vld [vmem:[#allocation13 + $0x68] sm:$0xff] }
 0x3db   :  { %4899 = vmatprep.subr.mxu1 %v4307_v49  ;;  %4863 = vmatpush3.msra.mxu0 %v4180_v62  ;;  %v4534_v22 = vld [vmem:[#allocation13 + $0x78] sm:$0xff]  ;;  %v4531_v51 = vld [vmem:[#allocation13 + $0x60] sm:$0xff]  ;;  %v4529_v28 = vld [vmem:[#allocation13 + $0x50] sm:$0xff] }
 0x3dc   :  { %4900 = vmatpush3.msra.mxu1 %v4291_v42  ;;  %4864 = vmatprep.subr.mxu0 %v4195_v32  ;;  %v4530_v3 = vld [vmem:[#allocation13 + $0x58] sm:$0xff]  ;;  %v4527_v25 = vld [vmem:[#allocation13 + $0x40] sm:$0xff]  ;;  %v4525_v26 = vld [vmem:[#allocation13 + $0x30] sm:$0xff] }
 0x3dd   :  { %4901 = vmatprep.subr.mxu1 %v4306_v50  ;;  %4865 = vmatpush3.msra.mxu0 %v4179_v9  ;;  %v4526_v33 = vld [vmem:[#allocation13 + $0x38] sm:$0xff]  ;;  %v4524_v49 = vld [vmem:[#allocation13 + $0x28] sm:$0xff]  ;;  %v4523_v62 = vld [vmem:[#allocation13 + $0x20] sm:$0xff] }
 0x3de   :  { %4902 = vmatpush3.msra.mxu1 %v4290_v61  ;;  %4866 = vmatprep.subr.mxu0 %v4194_v0  ;;  %v4522_v42 = vld [vmem:[#allocation13 + $0x18] sm:$0xff]  ;;  %v4521_v32 = vld [vmem:[#allocation13 + $0x10] sm:$0xff]  ;;  %v4520_v50 = vld [vmem:[#allocation13 + $0x8] sm:$0xff] }
 0x3df   :  { %4903 = vmatprep.subr.mxu1 %v4305_v40  ;;  %4867 = vmatpush3.msra.mxu0 %v4178_v23  ;;  %v4519_v9 = vld [vmem:[#allocation13] sm:$0xff] }
 0x3e0   :  { %4904 = vmatpush3.msra.mxu1 %v4289_v6  ;;  %4868 = vmatprep.subr.mxu0 %v4193_v59 }
 0x3e1   :  { %4905 = vmatprep.subr.mxu1 %v4304_v17  ;;  %4869 = vmatpush3.msra.mxu0 %v4177_v57 }
 0x3e2   :  { %4906 = vmatpush3.msra.mxu1 %v4288_v1  ;;  %4870 = vmatprep.subr.mxu0 %v4192_v55 }
 0x3e3   :  { %4907 = vmatprep.subr.mxu1 %v4303_v41  ;;  %4871 = vmatpush3.msra.mxu0 %v4176_v34 }
 0x3e4   :  { %4908 = vmatpush3.msra.mxu1 %v4287_v21  ;;  %4872 = vmatprep.subr.mxu0 %v4191_v4 }
 0x3e5   :  { %4392 = vmatmul.mubr.f32.vlgmr.msra.gmra.mxu1 %v6707_v35  ;;  %4873 = vmatpush3.msra.mxu0 %v4175_v29  ;;  %v4426_v35 = vld [vmem:[#allocation10 + $0x6d8] sm:$0xff] }
 0x3e6   :  { %4964 = vmatprep.subr.mxu1 %v6885_v24  ;;  %4280 = vmatmul.mubr.f32.vlgmr.msra.gmra.mxu0 %v6714_v36  ;;  %v4409_v36 = vld [vmem:[#allocation10 + $0x650] sm:$0xff] }
 0x3e7   :  { %4912 = vmatprep.subr.mxu0 %v4430_v45  ;;  %4503 = vmatprep.mubr.f32.mxu0 %v6719_v38  ;;  %v4423_v38 = vld [vmem:[#allocation10 + $0x6c0] sm:$0xff] }
 0x3e8   :  { %4913 = vmatpush3.msra.mxu0 %v4414_v46  ;;  %4965 = vmatpush3.msra.mxu1 %v4534_v22 }
 0x3e9   :  { %4914 = vmatprep.subr.mxu0 %v4429_v53  ;;  %4966 = vmatprep.subr.mxu1 %v6885_v24 }
 0x3ea   :  { %4915 = vmatpush3.msra.mxu0 %v4413_v52  ;;  %4967 = vmatpush3.msra.mxu1 %v4533_v47 }
 0x3eb   :  { %4916 = vmatprep.subr.mxu0 %v4428_v16  ;;  %4968 = vmatprep.subr.mxu1 %v6885_v24 }
 0x3ec   :  { %4917 = vmatpush3.msra.mxu0 %v4412_v31  ;;  %4969 = vmatpush3.msra.mxu1 %v4532_v15 }
 0x3ed   :  { %4918 = vmatprep.subr.mxu0 %v4427_v54  ;;  %4970 = vmatprep.subr.mxu1 %v6885_v24 }
 0x3ee   :  { %4919 = vmatpush3.msra.mxu0 %v4411_v63  ;;  %4971 = vmatpush3.msra.mxu1 %v4531_v51 }
 0x3ef   :  { %4920 = vmatprep.subr.mxu0 %v4426_v35  ;;  %4972 = vmatprep.subr.mxu1 %v6885_v24 }
 0x3f0   :  { %4921 = vmatpush3.msra.mxu0 %v4410_v43  ;;  %4973 = vmatpush3.msra.mxu1 %v4530_v3 }
 0x3f1   :  { %4922 = vmatprep.subr.mxu0 %v4425_v11  ;;  %4974 = vmatprep.subr.mxu1 %v6885_v24  ;;  %v4700_v11 = vld [vmem:[#allocation11] ss:$0 sm:$0xff] }
 0x3f2   :  { %4923 = vmatpush3.msra.mxu0 %v4409_v36  ;;  %4975 = vmatpush3.msra.mxu1 %v4529_v28 }
 0x3f3   :  { %4924 = vmatprep.subr.mxu0 %v4424_v44  ;;  %4976 = vmatprep.subr.mxu1 %v6885_v24 }
 0x3f4   :  { %4925 = vmatpush3.msra.mxu0 %v4408_v60  ;;  %4996 = vmatprep.mubr.msk.f32.mxu1 %vm5221_vm14, %v6885_v24 }
 0x3f5   :  { %4926 = vmatprep.subr.mxu0 %v4423_v38  ;;  %v4701_v38 = vld [vmem:[#allocation14] ss:$0 sm:$0xff] }
 0x3f6   :  { %4927 = vmatpush3.msra.mxu0 %v4407_v18 }
 0x3f7   :  { %4928 = vmatprep.subr.mxu0 %v4422_v37 }
 0x3f8   :  { %4929 = vmatpush3.msra.mxu0 %v4406_v13 }
 0x3f9   :  { %4930 = vmatprep.subr.mxu0 %v4421_v19 }
 0x3fa   :  { %4931 = vmatpush3.msra.mxu0 %v4405_v39 }
 0x3fb   :  { %4932 = vmatprep.subr.mxu0 %v4420_v20 }
 0x3fc   :  { %4933 = vmatpush3.msra.mxu0 %v4404_v10 }
 0x3fd   :  { %4934 = vmatprep.subr.mxu0 %v4419_v8 }
 0x3fe   :  { %4935 = vmatpush3.msra.mxu0 %v4403_v30 }
 0x3ff   :  { %4936 = vmatprep.subr.mxu0 %v4418_v7 }
 0x400   :  { %4937 = vmatpush3.msra.mxu0 %v4402_v5 }
 0x401   :  { %4938 = vmatprep.subr.mxu0 %v4417_v27 }
 0x402   :  { %4939 = vmatpush3.msra.mxu0 %v4401_v2 }
 0x403   :  { %4940 = vmatprep.subr.mxu0 %v4416_v12 }
 0x404   :  { %4941 = vmatpush3.msra.mxu0 %v4400_v56 }
 0x405   :  { %4942 = vmatprep.subr.mxu0 %v4415_v14 }
 0x406   :  { %4943 = vmatpush3.msra.mxu0 %v4399_v58 }
 0x407   :  { %4504 = vmatmul.mubr.f32.vlgmr.msra.gmra.mxu0 %v6723_v48  ;;  %v4528_v48 = vld [vmem:[#allocation13 + $0x48] sm:$0xff] }
 0x408   :  { %4977 = vmatpush3.msra.mxu1 %v4528_v48 }
 0x409   :  { %4978 = vmatprep.subr.mxu1 %v6885_v24 }
 0x40a   :  { %4979 = vmatpush3.msra.mxu1 %v4527_v25 }
 0x40b   :  { %4980 = vmatprep.subr.mxu1 %v6885_v24 }
 0x40c   :  { %4981 = vmatpush3.msra.mxu1 %v4526_v33 }
 0x40d   :  { %4982 = vmatprep.subr.mxu1 %v6885_v24 }
 0x40e   :  { %4983 = vmatpush3.msra.mxu1 %v4525_v26 }
 0x40f   :  { %4984 = vmatprep.subr.mxu1 %v6885_v24 }
 0x410   :  { %4985 = vmatpush3.msra.mxu1 %v4524_v49 }
 0x411   :  { %4986 = vmatprep.subr.mxu1 %v6885_v24 }
 0x412   :  { %4987 = vmatpush3.msra.mxu1 %v4523_v62 }
 0x413   :  { %4988 = vmatprep.subr.mxu1 %v6885_v24 }
 0x414   :  { %4989 = vmatpush3.msra.mxu1 %v4522_v42 }
 0x415   :  { %4990 = vmatprep.subr.mxu1 %v6885_v24 }
 0x416   :  { %4991 = vmatpush3.msra.mxu1 %v4521_v32 }
 0x417   :  { %4992 = vmatprep.subr.mxu1 %v6885_v24 }
 0x418   :  { %4993 = vmatpush3.msra.mxu1 %v4520_v50 }
 0x419   :  { %4994 = vmatprep.subr.mxu1 %v6885_v24 }
 0x41a   :  { %4995 = vmatpush3.msra.mxu1 %v4519_v9 }
 0x45f   :  { %v4769_v40 = vpop.f32.mrf.mxu1 }
 0x461   :  { %v4770_v6 = vpop.f32.mrf.mxu1 }
 0x462   :  { %v4771_v55 = vadd.f32 %v4770_v6, %v4769_v40 }
 0x466   :  { %v4734_v61 = vpop.f32.mrf.mxu0 }
 0x468   :  { %v4735_v0 = vpop.f32.mrf.mxu0 }
 0x469   :  { %v4736_v17 = vadd.f32 %v4735_v0, %v4734_v61 }
 0x46b   :  { %v3947_v34 = vadd.f32 %v4771_v55, %v4736_v17 }
 0x481   :  { %v4839_v57 = vpop.f32.mrf.mxu1 }
 0x483   :  { %v4840_v21 = vpop.f32.mrf.mxu1 }
 0x484   :  { %v4841_v46 = vadd.f32 %v4840_v21, %v4839_v57 }
 0x486   :  { %v4804_v23 = vpop.f32.mrf.mxu0 }
 0x488   :  { %v4805_v59 = vpop.f32.mrf.mxu0 }
 0x489   :  { %v4806_v41 = vadd.f32 %v4805_v59, %v4804_v23 }
 0x48b   :  { %v4061_v29 = vadd.f32 %v4806_v41, %v3947_v34 }
 0x48d   :  { %v4173_v24 = vadd.f32 %v4841_v46, %v4061_v29 }
 0x4a5   :  { %v4909_v45 = vpop.f32.mrf.mxu1 }
 0x4a6   :  { %v4874_v1 = vpop.f32.mrf.mxu0 }
 0x4a7   :  { %v4910_v52 = vpop.f32.mrf.mxu1 }
 0x4a8   :  { %v4875_v4 = vpop.f32.mrf.mxu0  ;;  %v4911_v54 = vadd.f32 %v4910_v52, %v4909_v45 }
 0x4a9   :  { %v4876_v53 = vadd.f32 %v4875_v4, %v4874_v1 }
 0x4ab   :  { %v4285_v16 = vadd.f32 %v4876_v53, %v4173_v24 }
 0x4ad   :  { %v4397_v35 = vadd.f32 %v4911_v54, %v4285_v16 }
 0x4c7   :  { %v4944_v31 = vpop.f32.mrf.mxu0 }
 0x4c9   :  { %v4945_v63 = vpop.f32.mrf.mxu0 }
 0x4ca   :  { %v4946_v43 = vadd.f32 %v4945_v63, %v4944_v31 }
 0x4cc   :  { %v4509_v36 = vadd.f32 %v4946_v43, %v4397_v35 }
 0x4ce   :  { %v4517_v44 = vadd.f32 %v4700_v11, %v4509_v36 }
 0x4d0   :  { %v4518_v60 = vmax.f32 %v4517_v44, 0.0 }
 0x4d2   :  { %4997 = vmatmul.mubr.f32.vlgmr.msra.gmra.mxu1 %v4518_v60 }
 0x592   :  { %v4608_v18 = vpop.f32.mrf.mxu1 }
 0x593   :  { %v4609_v37 = vadd.f32 %v4701_v38, %v4608_v18 }
 0x594   :  { %v4998_v13 = vpop.f32.mrf.mxu1 }
 0x595   :  { %4612 = vst [vmem:[#allocation16] sm:$0x3] %v4609_v37 }
 0x596   :  { %5186 = shalt.err (!%p5183_p2)
}
 0x597   :  { %4622 = dma.vmem_to_hbm [thread:$0]  %s4620_s17, 32, %s6758_s9, [#allocation4]  }
 0x598   :  { %5205 = dma.done.wait [#allocation4], 32  }
 0x599   :  { %5206 = vsyncadd [#allocation4], 4294967264 }
 0x59a   :  { %4626 = vsyncpa [#allocation3], 1 }
 0x59b   :  { %4627 = vsyncpa [#allocation6], 1 }
 0x59c   :  { %4628 = vsyncpa [#allocation9], 1 }
 0x59d   :  { %4629 = vsyncpa [#allocation12], 1 }
 0x59e   :  { %4630 = vsyncpa [#allocation15], 1 }
 0x59f   :  { %4631 = vsyncpa [#allocation4], 1 }

</bundles_post_ra>
